<compile_context>
chip_gen: v6e
topology: v6e:2x2x1
jax: 0.10.0
libtpu: 0.0.40
codegen_flags: <defaults>
</compile_context>

<pallas_src>
import functools

import jax
import jax.numpy as jnp
import numpy as np
from jax.experimental import pallas as pl
from jax.experimental.pallas import tpu as pltpu


def _lin_taps(size):
    """Static (i0, i1, frac) taps for 2x linear upsampling (align_corners=False)."""
    taps = []
    for o in range(2 * size):
        src = max((o + 0.5) * 0.5 - 0.5, 0.0)   # PyTorch half-pixel rule, clamped at 0
        i0 = int(np.floor(src))
        frac = float(src - i0)
        i1 = min(i0 + 1, size - 1)
        taps.append((i0, i1, frac))
    return tuple(taps)


def _interp_matrix(size):
    """(2*size, size) matrix M such that out = M @ in is the 1-D 2x upsample."""
    m = np.zeros((2 * size, size), dtype=np.float32)
    for o, (i0, i1, frac) in enumerate(_lin_taps(size)):
        m[o, i0] += 1.0 - frac
        m[o, i1] += frac
    return m


def _upsample_conv_kernel(x_ref, w_ref, b_ref, mhw_ref, o_ref,
                          acc_ref, conv2_ref, *, C, Co, D, H, W, d_taps):
    # x_ref    : (1, C, (D+3)*Hp*Wp)  zero-padded, hw/d-flattened sample
    # w_ref    : (27, Co, C)          per-tap conv weight matrices (VMEM)
    # b_ref    : (Co, 1)              conv bias (VMEM)
    # mhw_ref  : (Hp*Wp, 4*H*W)       fused H/W 2x interpolation matrix (VMEM)
    # o_ref    : (1, Co, 2D, 4*H*W)   lane-dense output block
    # acc_ref  : (Co, D*Hp*Wp)        f32 conv accumulator (VMEM scratch)
    # conv2_ref: (D*Co, Hp*Wp)        conv result regrouped per depth (VMEM scratch)
    Hp, Wp = H + 2, W + 2
    HpWp = Hp * Wp
    L = D * HpWp

    # ---- 3x3x3 conv: 27 channel-contraction matmuls on the MXU --------------
    acc_ref[...] = jnp.zeros_like(acc_ref)
    t = 0
    for kd in range(3):
        for kh in range(3):
            for kw in range(3):
                base = kd * HpWp + kh * Wp + kw
                xs = x_ref[0, :, base:base + L].astype(jnp.float32)   # (C, L)
                acc_ref[...] += jnp.dot(w_ref[t], xs,
                                        preferred_element_type=jnp.float32)
                t += 1

    # ---- regroup to (D*Co, Hp*Wp) rows and add bias --------------------------
    # (columns with padded h/w hold garbage; the interp matrix zeroes them out)
    for d in range(D):
        conv2_ref[d * Co:(d + 1) * Co, :] = (
            acc_ref[:, d * HpWp:(d + 1) * HpWp] + b_ref[...])

    # ---- fused H/W 2x trilinear upsample: one batched MXU matmul -------------
    zhw = jnp.dot(conv2_ref[...], mhw_ref[...],
                  preferred_element_type=jnp.float32)        # (D*Co, 4*H*W)

    # ---- D-axis 2x upsample: static two-tap blends, lane-dense plane stores --
    for od, (i0, i1, frac) in enumerate(d_taps):
        z0 = zhw[i0 * Co:(i0 + 1) * Co, :]                   # (Co, 4*H*W)
        if frac == 0.0:
            plane = z0
        else:
            z1 = zhw[i1 * Co:(i1 + 1) * Co, :]
            plane = (1.0 - frac) * z0 + frac * z1
        o_ref[0, :, od, :] = plane.astype(o_ref.dtype)


def upsample_conv(x, weight, bias):
    """Conv3d(C -> C//2, k=3, s=1, p=1, bias) + trilinear 2x upsample, NCDHW."""
    N, C, D, H, W = x.shape
    Co = weight.shape[0]
    assert weight.shape == (Co, C, 3, 3, 3)
    assert bias.shape == (Co,)

    Hp, Wp = H + 2, W + 2
    HpWp = Hp * Wp
    Dx = D + 3                  # front pad 1, back pad 1 (conv) + 1 plane of slab slack
    Lx = Dx * HpWp
    L = D * HpWp
    HWo = 4 * H * W

    # Zero-pad for the conv (plus one extra trailing depth plane so every tap's
    # contiguous slab [base, base + D*Hp*Wp) stays in range) and flatten the
    # spatial dims so in-kernel tap windows are pure lane slices.
    xp = jnp.pad(x, ((0, 0), (0, 0), (1, 2), (1, 1), (1, 1))).reshape(N, C, Lx)

    # Conv weights as 27 per-tap (Co, C) matrices; bias as a (Co, 1) column.
    w_taps = jnp.transpose(weight, (2, 3, 4, 0, 1)).reshape(27, Co, C)
    w_taps = w_taps.astype(jnp.float32)
    bias2d = bias.reshape(Co, 1).astype(jnp.float32)

    # Fused (H, W) 2x interpolation matrix on padded hw-flat rows:
    # mhw[h*Wp + w, oh*2W + ow] = Mh[oh, h] * Mw[ow, w]  (zero for padded h/w).
    mh = _interp_matrix(H)                       # (2H, H)
    mw = _interp_matrix(W)                       # (2W, W)
    mhw_np = np.zeros((HpWp, HWo), np.float32)
    for h in range(H):
        for w in range(W):
            mhw_np[h * Wp + w, :] = np.kron(mh[:, h], mw[:, w])
    mhw = jnp.asarray(mhw_np)

    kernel = functools.partial(
        _upsample_conv_kernel, C=C, Co=Co, D=D, H=H, W=W, d_taps=_lin_taps(D))

    grid_spec = pltpu.PrefetchScalarGridSpec(
        num_scalar_prefetch=0,
        grid=(N,),
        in_specs=[
            pl.BlockSpec((1, C, Lx), lambda n: (n, 0, 0)),        # padded sample
            pl.BlockSpec((27, Co, C), lambda n: (0, 0, 0)),       # conv weights
            pl.BlockSpec((Co, 1), lambda n: (0, 0)),              # conv bias
            pl.BlockSpec((HpWp, HWo), lambda n: (0, 0)),          # H/W interp matrix
        ],
        out_specs=pl.BlockSpec((1, Co, 2 * D, HWo), lambda n: (n, 0, 0, 0)),
        scratch_shapes=[
            pltpu.VMEM((Co, L), jnp.float32),                     # conv accumulator
            pltpu.VMEM((D * Co, HpWp), jnp.float32),              # per-depth conv rows
        ],
    )

    out_flat = pl.pallas_call(
        kernel,
        out_shape=jax.ShapeDtypeStruct((N, Co, 2 * D, HWo), x.dtype),
        grid_spec=grid_spec,
        compiler_params=pltpu.CompilerParams(
            dimension_semantics=("parallel",),
            vmem_limit_bytes=32 * 1024 * 1024),
    )(xp, w_taps, bias2d, mhw)

    # Lane-dense (N, Co, 2D, 4*H*W) slab back to NCDHW.
    return out_flat.reshape(N, Co, 2 * D, 2 * H, 2 * W)


def _reference(x, weight, bias):
    """Pure-JAX reference: Conv3d (cross-correlation) + separable trilinear x2."""
    hi = jax.lax.Precision.HIGHEST
    xf = x.astype(jnp.float32)
    y = jax.lax.conv_general_dilated(
        xf, weight.astype(jnp.float32),
        window_strides=(1, 1, 1),
        padding=((1, 1), (1, 1), (1, 1)),
        dimension_numbers=("NCDHW", "OIDHW", "NCDHW"),
        precision=hi)
    y = y + bias.astype(jnp.float32)[None, :, None, None, None]
    _, _, D, H, W = y.shape
    md = jnp.asarray(_interp_matrix(D))
    mh = jnp.asarray(_interp_matrix(H))
    mw = jnp.asarray(_interp_matrix(W))
    z = jnp.einsum("pd,ncdhw->ncphw", md, y, precision=hi)
    z = jnp.einsum("qh,ncphw->ncpqw", mh, z, precision=hi)
    z = jnp.einsum("rw,ncpqw->ncpqr", mw, z, precision=hi)
    return z.astype(x.dtype)


if __name__ == "__main__":
    key = jax.random.PRNGKey(0)
    k_x, k_w, k_b = jax.random.split(key, 3)

    # odim = 4 (conv maps 4 -> 2 channels), spatial 8^3 -> output 16^3.
    N, C, D, H, W = 2, 4, 8, 8, 8
    Co = C // 2
    x = jax.random.normal(k_x, (N, C, D, H, W), dtype=jnp.float32)
    weight = 0.1 * jax.random.normal(k_w, (Co, C, 3, 3, 3), dtype=jnp.float32)
    bias = 0.1 * jax.random.normal(k_b, (Co,), dtype=jnp.float32)

    out = upsample_conv(x, weight, bias)
    jax.block_until_ready(out)

    assert out.shape == (N, Co, 2 * D, 2 * H, 2 * W)
    assert out.dtype == x.dtype

    ref = _reference(x, weight, bias)
    max_err = float(jnp.max(jnp.abs(out - ref)))
    # Tolerance leaves headroom for MXU f32 multi-pass matmuls in the conv and
    # the H/W interpolation; the D blends are exact f32 VPU math.
    assert jnp.allclose(out, ref, atol=1e-2, rtol=1e-2), max_err
    print("KERNEL_OK")
</pallas_src>

<mosaic_0001>
module attributes {stable_mosaic.version = 11 : i64} {
  func.func @_upsample_conv_kernel(%arg0: i32, %arg1: memref<1x4x1100xf32, #tpu.memory_space<vmem>>, %arg2: memref<27x2x4xf32, #tpu.memory_space<vmem>>, %arg3: memref<2x1xf32, #tpu.memory_space<vmem>>, %arg4: memref<100x256xf32, #tpu.memory_space<vmem>>, %arg5: memref<1x2x16x256xf32, #tpu.memory_space<vmem>>, %arg6: memref<2x800xf32, #tpu.memory_space<vmem>>, %arg7: memref<16x100xf32, #tpu.memory_space<vmem>>) attributes {dimension_semantics = [#tpu.dimension_semantics<parallel>], iteration_bounds = array<i64: 2>, scalar_prefetch = 0 : i64, scratch_operands = 2 : i64, tpu.core_type = #tpu.core_type<tc>, window_params = [{transform_indices = @transform_0, window_bounds = array<i64: 1, 4, 1100>}, {pipeline_mode = #tpu.pipeline_mode<synchronous>, transform_indices = @transform_1, window_bounds = array<i64: 27, 2, 4>}, {pipeline_mode = #tpu.pipeline_mode<synchronous>, transform_indices = @transform_2, window_bounds = array<i64: 2, 1>}, {pipeline_mode = #tpu.pipeline_mode<synchronous>, transform_indices = @transform_3, window_bounds = array<i64: 100, 256>}, {transform_indices = @transform_4, window_bounds = array<i64: 1, 2, 16, 256>}]} {
    %cst = arith.constant 0.000000e+00 : f32
    %0 = vector.broadcast %cst : f32 to vector<2x800xf32>
    %c0 = arith.constant 0 : index
    %c0_0 = arith.constant 0 : index
    %1 = vector.load %arg6[%c0, %c0_0] : memref<2x800xf32, #tpu.memory_space<vmem>>, vector<2x800xf32>
    tpu.vector_store %arg6[%c0, %c0_0], %0 {strides = array<i32>} : memref<2x800xf32, #tpu.memory_space<vmem>>, vector<2x800xf32>,
    %c0_1 = arith.constant 0 : index
    %c0_2 = arith.constant 0 : index
    %c0_3 = arith.constant 0 : index
    %2 = vector.load %arg1[%c0_1, %c0_2, %c0_3] : memref<1x4x1100xf32, #tpu.memory_space<vmem>>, vector<1x4x800xf32>
    %3 = vector.shape_cast %2 : vector<1x4x800xf32> to vector<4x800xf32>
    %c0_4 = arith.constant 0 : index
    %c0_5 = arith.constant 0 : index
    %4 = vector.load %arg6[%c0_4, %c0_5] : memref<2x800xf32, #tpu.memory_space<vmem>>, vector<2x800xf32>
    %c0_6 = arith.constant 0 : index
    %c0_7 = arith.constant 0 : index
    %c0_8 = arith.constant 0 : index
    %5 = vector.load %arg2[%c0_6, %c0_7, %c0_8] : memref<27x2x4xf32, #tpu.memory_space<vmem>>, vector<1x2x4xf32>
    %6 = vector.shape_cast %5 : vector<1x2x4xf32> to vector<2x4xf32>
    %cst_9 = arith.constant dense<0.000000e+00> : vector<2x800xf32>
    %7 = tpu.matmul %6, %3, %cst_9 {dimension_numbers = #tpu.dot_dimension_numbers<[1], [0], [0], [1], [0, 0, 1, 1], [], []>} : vector<2x4xf32>, vector<4x800xf32>, vector<2x800xf32> -> vector<2x800xf32>
    %8 = arith.addf %4, %7 : vector<2x800xf32>
    %c0_10 = arith.constant 0 : index
    %c0_11 = arith.constant 0 : index
    %9 = vector.load %arg6[%c0_10, %c0_11] : memref<2x800xf32, #tpu.memory_space<vmem>>, vector<2x800xf32>
    tpu.vector_store %arg6[%c0_10, %c0_11], %8 {strides = array<i32>} : memref<2x800xf32, #tpu.memory_space<vmem>>, vector<2x800xf32>,
    %c0_12 = arith.constant 0 : index
    %c0_13 = arith.constant 0 : index
    %c1 = arith.constant 1 : index
    %10 = vector.load %arg1[%c0_12, %c0_13, %c1] : memref<1x4x1100xf32, #tpu.memory_space<vmem>>, vector<1x4x800xf32>
    %11 = vector.shape_cast %10 : vector<1x4x800xf32> to vector<4x800xf32>
    %c0_14 = arith.constant 0 : index
    %c0_15 = arith.constant 0 : index
    %12 = vector.load %arg6[%c0_14, %c0_15] : memref<2x800xf32, #tpu.memory_space<vmem>>, vector<2x800xf32>
    %c1_16 = arith.constant 1 : index
    %c0_17 = arith.constant 0 : index
    %c0_18 = arith.constant 0 : index
    %13 = vector.load %arg2[%c1_16, %c0_17, %c0_18] : memref<27x2x4xf32, #tpu.memory_space<vmem>>, vector<1x2x4xf32>
    %14 = vector.shape_cast %13 : vector<1x2x4xf32> to vector<2x4xf32>
    %cst_19 = arith.constant dense<0.000000e+00> : vector<2x800xf32>
    %15 = tpu.matmul %14, %11, %cst_19 {dimension_numbers = #tpu.dot_dimension_numbers<[1], [0], [0], [1], [0, 0, 1, 1], [], []>} : vector<2x4xf32>, vector<4x800xf32>, vector<2x800xf32> -> vector<2x800xf32>
    %16 = arith.addf %12, %15 : vector<2x800xf32>
    %c0_20 = arith.constant 0 : index
    %c0_21 = arith.constant 0 : index
    %17 = vector.load %arg6[%c0_20, %c0_21] : memref<2x800xf32, #tpu.memory_space<vmem>>, vector<2x800xf32>
    tpu.vector_store %arg6[%c0_20, %c0_21], %16 {strides = array<i32>} : memref<2x800xf32, #tpu.memory_space<vmem>>, vector<2x800xf32>,
    %c0_22 = arith.constant 0 : index
    %c0_23 = arith.constant 0 : index
    %c2 = arith.constant 2 : index
    %18 = vector.load %arg1[%c0_22, %c0_23, %c2] : memref<1x4x1100xf32, #tpu.memory_space<vmem>>, vector<1x4x800xf32>
    %19 = vector.shape_cast %18 : vector<1x4x800xf32> to vector<4x800xf32>
    %c0_24 = arith.constant 0 : index
    %c0_25 = arith.constant 0 : index
    %20 = vector.load %arg6[%c0_24, %c0_25] : memref<2x800xf32, #tpu.memory_space<vmem>>, vector<2x800xf32>
    %c2_26 = arith.constant 2 : index
    %c0_27 = arith.constant 0 : index
    %c0_28 = arith.constant 0 : index
    %21 = vector.load %arg2[%c2_26, %c0_27, %c0_28] : memref<27x2x4xf32, #tpu.memory_space<vmem>>, vector<1x2x4xf32>
    %22 = vector.shape_cast %21 : vector<1x2x4xf32> to vector<2x4xf32>
    %cst_29 = arith.constant dense<0.000000e+00> : vector<2x800xf32>
    %23 = tpu.matmul %22, %19, %cst_29 {dimension_numbers = #tpu.dot_dimension_numbers<[1], [0], [0], [1], [0, 0, 1, 1], [], []>} : vector<2x4xf32>, vector<4x800xf32>, vector<2x800xf32> -> vector<2x800xf32>
    %24 = arith.addf %20, %23 : vector<2x800xf32>
    %c0_30 = arith.constant 0 : index
    %c0_31 = arith.constant 0 : index
    %25 = vector.load %arg6[%c0_30, %c0_31] : memref<2x800xf32, #tpu.memory_space<vmem>>, vector<2x800xf32>
    tpu.vector_store %arg6[%c0_30, %c0_31], %24 {strides = array<i32>} : memref<2x800xf32, #tpu.memory_space<vmem>>, vector<2x800xf32>,
    %c0_32 = arith.constant 0 : index
    %c0_33 = arith.constant 0 : index
    %c10 = arith.constant 10 : index
    %26 = vector.load %arg1[%c0_32, %c0_33, %c10] : memref<1x4x1100xf32, #tpu.memory_space<vmem>>, vector<1x4x800xf32>
    %27 = vector.shape_cast %26 : vector<1x4x800xf32> to vector<4x800xf32>
    %c0_34 = arith.constant 0 : index
    %c0_35 = arith.constant 0 : index
    %28 = vector.load %arg6[%c0_34, %c0_35] : memref<2x800xf32, #tpu.memory_space<vmem>>, vector<2x800xf32>
    %c3 = arith.constant 3 : index
    %c0_36 = arith.constant 0 : index
    %c0_37 = arith.constant 0 : index
    %29 = vector.load %arg2[%c3, %c0_36, %c0_37] : memref<27x2x4xf32, #tpu.memory_space<vmem>>, vector<1x2x4xf32>
    %30 = vector.shape_cast %29 : vector<1x2x4xf32> to vector<2x4xf32>
    %cst_38 = arith.constant dense<0.000000e+00> : vector<2x800xf32>
    %31 = tpu.matmul %30, %27, %cst_38 {dimension_numbers = #tpu.dot_dimension_numbers<[1], [0], [0], [1], [0, 0, 1, 1], [], []>} : vector<2x4xf32>, vector<4x800xf32>, vector<2x800xf32> -> vector<2x800xf32>
    %32 = arith.addf %28, %31 : vector<2x800xf32>
    %c0_39 = arith.constant 0 : index
    %c0_40 = arith.constant 0 : index
    %33 = vector.load %arg6[%c0_39, %c0_40] : memref<2x800xf32, #tpu.memory_space<vmem>>, vector<2x800xf32>
    tpu.vector_store %arg6[%c0_39, %c0_40], %32 {strides = array<i32>} : memref<2x800xf32, #tpu.memory_space<vmem>>, vector<2x800xf32>,
    %c0_41 = arith.constant 0 : index
    %c0_42 = arith.constant 0 : index
    %c11 = arith.constant 11 : index
    %34 = vector.load %arg1[%c0_41, %c0_42, %c11] : memref<1x4x1100xf32, #tpu.memory_space<vmem>>, vector<1x4x800xf32>
    %35 = vector.shape_cast %34 : vector<1x4x800xf32> to vector<4x800xf32>
    %c0_43 = arith.constant 0 : index
    %c0_44 = arith.constant 0 : index
    %36 = vector.load %arg6[%c0_43, %c0_44] : memref<2x800xf32, #tpu.memory_space<vmem>>, vector<2x800xf32>
    %c4 = arith.constant 4 : index
    %c0_45 = arith.constant 0 : index
    %c0_46 = arith.constant 0 : index
    %37 = vector.load %arg2[%c4, %c0_45, %c0_46] : memref<27x2x4xf32, #tpu.memory_space<vmem>>, vector<1x2x4xf32>
    %38 = vector.shape_cast %37 : vector<1x2x4xf32> to vector<2x4xf32>
    %cst_47 = arith.constant dense<0.000000e+00> : vector<2x800xf32>
    %39 = tpu.matmul %38, %35, %cst_47 {dimension_numbers = #tpu.dot_dimension_numbers<[1], [0], [0], [1], [0, 0, 1, 1], [], []>} : vector<2x4xf32>, vector<4x800xf32>, vector<2x800xf32> -> vector<2x800xf32>
    %40 = arith.addf %36, %39 : vector<2x800xf32>
    %c0_48 = arith.constant 0 : index
    %c0_49 = arith.constant 0 : index
    %41 = vector.load %arg6[%c0_48, %c0_49] : memref<2x800xf32, #tpu.memory_space<vmem>>, vector<2x800xf32>
    tpu.vector_store %arg6[%c0_48, %c0_49], %40 {strides = array<i32>} : memref<2x800xf32, #tpu.memory_space<vmem>>, vector<2x800xf32>,
    %c0_50 = arith.constant 0 : index
    %c0_51 = arith.constant 0 : index
    %c12 = arith.constant 12 : index
    %42 = vector.load %arg1[%c0_50, %c0_51, %c12] : memref<1x4x1100xf32, #tpu.memory_space<vmem>>, vector<1x4x800xf32>
    %43 = vector.shape_cast %42 : vector<1x4x800xf32> to vector<4x800xf32>
    %c0_52 = arith.constant 0 : index
    %c0_53 = arith.constant 0 : index
    %44 = vector.load %arg6[%c0_52, %c0_53] : memref<2x800xf32, #tpu.memory_space<vmem>>, vector<2x800xf32>
    %c5 = arith.constant 5 : index
    %c0_54 = arith.constant 0 : index
    %c0_55 = arith.constant 0 : index
    %45 = vector.load %arg2[%c5, %c0_54, %c0_55] : memref<27x2x4xf32, #tpu.memory_space<vmem>>, vector<1x2x4xf32>
    %46 = vector.shape_cast %45 : vector<1x2x4xf32> to vector<2x4xf32>
    %cst_56 = arith.constant dense<0.000000e+00> : vector<2x800xf32>
    %47 = tpu.matmul %46, %43, %cst_56 {dimension_numbers = #tpu.dot_dimension_numbers<[1], [0], [0], [1], [0, 0, 1, 1], [], []>} : vector<2x4xf32>, vector<4x800xf32>, vector<2x800xf32> -> vector<2x800xf32>
    %48 = arith.addf %44, %47 : vector<2x800xf32>
    %c0_57 = arith.constant 0 : index
    %c0_58 = arith.constant 0 : index
    %49 = vector.load %arg6[%c0_57, %c0_58] : memref<2x800xf32, #tpu.memory_space<vmem>>, vector<2x800xf32>
    tpu.vector_store %arg6[%c0_57, %c0_58], %48 {strides = array<i32>} : memref<2x800xf32, #tpu.memory_space<vmem>>, vector<2x800xf32>,
    %c0_59 = arith.constant 0 : index
    %c0_60 = arith.constant 0 : index
    %c20 = arith.constant 20 : index
    %50 = vector.load %arg1[%c0_59, %c0_60, %c20] : memref<1x4x1100xf32, #tpu.memory_space<vmem>>, vector<1x4x800xf32>
    %51 = vector.shape_cast %50 : vector<1x4x800xf32> to vector<4x800xf32>
    %c0_61 = arith.constant 0 : index
    %c0_62 = arith.constant 0 : index
    %52 = vector.load %arg6[%c0_61, %c0_62] : memref<2x800xf32, #tpu.memory_space<vmem>>, vector<2x800xf32>
    %c6 = arith.constant 6 : index
    %c0_63 = arith.constant 0 : index
    %c0_64 = arith.constant 0 : index
    %53 = vector.load %arg2[%c6, %c0_63, %c0_64] : memref<27x2x4xf32, #tpu.memory_space<vmem>>, vector<1x2x4xf32>
    %54 = vector.shape_cast %53 : vector<1x2x4xf32> to vector<2x4xf32>
    %cst_65 = arith.constant dense<0.000000e+00> : vector<2x800xf32>
    %55 = tpu.matmul %54, %51, %cst_65 {dimension_numbers = #tpu.dot_dimension_numbers<[1], [0], [0], [1], [0, 0, 1, 1], [], []>} : vector<2x4xf32>, vector<4x800xf32>, vector<2x800xf32> -> vector<2x800xf32>
    %56 = arith.addf %52, %55 : vector<2x800xf32>
    %c0_66 = arith.constant 0 : index
    %c0_67 = arith.constant 0 : index
    %57 = vector.load %arg6[%c0_66, %c0_67] : memref<2x800xf32, #tpu.memory_space<vmem>>, vector<2x800xf32>
    tpu.vector_store %arg6[%c0_66, %c0_67], %56 {strides = array<i32>} : memref<2x800xf32, #tpu.memory_space<vmem>>, vector<2x800xf32>,
    %c0_68 = arith.constant 0 : index
    %c0_69 = arith.constant 0 : index
    %c21 = arith.constant 21 : index
    %58 = vector.load %arg1[%c0_68, %c0_69, %c21] : memref<1x4x1100xf32, #tpu.memory_space<vmem>>, vector<1x4x800xf32>
    %59 = vector.shape_cast %58 : vector<1x4x800xf32> to vector<4x800xf32>
    %c0_70 = arith.constant 0 : index
    %c0_71 = arith.constant 0 : index
    %60 = vector.load %arg6[%c0_70, %c0_71] : memref<2x800xf32, #tpu.memory_space<vmem>>, vector<2x800xf32>
    %c7 = arith.constant 7 : index
    %c0_72 = arith.constant 0 : index
    %c0_73 = arith.constant 0 : index
    %61 = vector.load %arg2[%c7, %c0_72, %c0_73] : memref<27x2x4xf32, #tpu.memory_space<vmem>>, vector<1x2x4xf32>
    %62 = vector.shape_cast %61 : vector<1x2x4xf32> to vector<2x4xf32>
    %cst_74 = arith.constant dense<0.000000e+00> : vector<2x800xf32>
    %63 = tpu.matmul %62, %59, %cst_74 {dimension_numbers = #tpu.dot_dimension_numbers<[1], [0], [0], [1], [0, 0, 1, 1], [], []>} : vector<2x4xf32>, vector<4x800xf32>, vector<2x800xf32> -> vector<2x800xf32>
    %64 = arith.addf %60, %63 : vector<2x800xf32>
    %c0_75 = arith.constant 0 : index
    %c0_76 = arith.constant 0 : index
    %65 = vector.load %arg6[%c0_75, %c0_76] : memref<2x800xf32, #tpu.memory_space<vmem>>, vector<2x800xf32>
    tpu.vector_store %arg6[%c0_75, %c0_76], %64 {strides = array<i32>} : memref<2x800xf32, #tpu.memory_space<vmem>>, vector<2x800xf32>,
    %c0_77 = arith.constant 0 : index
    %c0_78 = arith.constant 0 : index
    %c22 = arith.constant 22 : index
    %66 = vector.load %arg1[%c0_77, %c0_78, %c22] : memref<1x4x1100xf32, #tpu.memory_space<vmem>>, vector<1x4x800xf32>
    %67 = vector.shape_cast %66 : vector<1x4x800xf32> to vector<4x800xf32>
    %c0_79 = arith.constant 0 : index
    %c0_80 = arith.constant 0 : index
    %68 = vector.load %arg6[%c0_79, %c0_80] : memref<2x800xf32, #tpu.memory_space<vmem>>, vector<2x800xf32>
    %c8 = arith.constant 8 : index
    %c0_81 = arith.constant 0 : index
    %c0_82 = arith.constant 0 : index
    %69 = vector.load %arg2[%c8, %c0_81, %c0_82] : memref<27x2x4xf32, #tpu.memory_space<vmem>>, vector<1x2x4xf32>
    %70 = vector.shape_cast %69 : vector<1x2x4xf32> to vector<2x4xf32>
    %cst_83 = arith.constant dense<0.000000e+00> : vector<2x800xf32>
    %71 = tpu.matmul %70, %67, %cst_83 {dimension_numbers = #tpu.dot_dimension_numbers<[1], [0], [0], [1], [0, 0, 1, 1], [], []>} : vector<2x4xf32>, vector<4x800xf32>, vector<2x800xf32> -> vector<2x800xf32>
    %72 = arith.addf %68, %71 : vector<2x800xf32>
    %c0_84 = arith.constant 0 : index
    %c0_85 = arith.constant 0 : index
    %73 = vector.load %arg6[%c0_84, %c0_85] : memref<2x800xf32, #tpu.memory_space<vmem>>, vector<2x800xf32>
    tpu.vector_store %arg6[%c0_84, %c0_85], %72 {strides = array<i32>} : memref<2x800xf32, #tpu.memory_space<vmem>>, vector<2x800xf32>,
    %c0_86 = arith.constant 0 : index
    %c0_87 = arith.constant 0 : index
    %c100 = arith.constant 100 : index
    %74 = vector.load %arg1[%c0_86, %c0_87, %c100] : memref<1x4x1100xf32, #tpu.memory_space<vmem>>, vector<1x4x800xf32>
    %75 = vector.shape_cast %74 : vector<1x4x800xf32> to vector<4x800xf32>
    %c0_88 = arith.constant 0 : index
    %c0_89 = arith.constant 0 : index
    %76 = vector.load %arg6[%c0_88, %c0_89] : memref<2x800xf32, #tpu.memory_space<vmem>>, vector<2x800xf32>
    %c9 = arith.constant 9 : index
    %c0_90 = arith.constant 0 : index
    %c0_91 = arith.constant 0 : index
    %77 = vector.load %arg2[%c9, %c0_90, %c0_91] : memref<27x2x4xf32, #tpu.memory_space<vmem>>, vector<1x2x4xf32>
    %78 = vector.shape_cast %77 : vector<1x2x4xf32> to vector<2x4xf32>
    %cst_92 = arith.constant dense<0.000000e+00> : vector<2x800xf32>
    %79 = tpu.matmul %78, %75, %cst_92 {dimension_numbers = #tpu.dot_dimension_numbers<[1], [0], [0], [1], [0, 0, 1, 1], [], []>} : vector<2x4xf32>, vector<4x800xf32>, vector<2x800xf32> -> vector<2x800xf32>
    %80 = arith.addf %76, %79 : vector<2x800xf32>
    %c0_93 = arith.constant 0 : index
    %c0_94 = arith.constant 0 : index
    %81 = vector.load %arg6[%c0_93, %c0_94] : memref<2x800xf32, #tpu.memory_space<vmem>>, vector<2x800xf32>
    tpu.vector_store %arg6[%c0_93, %c0_94], %80 {strides = array<i32>} : memref<2x800xf32, #tpu.memory_space<vmem>>, vector<2x800xf32>,
    %c0_95 = arith.constant 0 : index
    %c0_96 = arith.constant 0 : index
    %c101 = arith.constant 101 : index
    %82 = vector.load %arg1[%c0_95, %c0_96, %c101] : memref<1x4x1100xf32, #tpu.memory_space<vmem>>, vector<1x4x800xf32>
    %83 = vector.shape_cast %82 : vector<1x4x800xf32> to vector<4x800xf32>
    %c0_97 = arith.constant 0 : index
    %c0_98 = arith.constant 0 : index
    %84 = vector.load %arg6[%c0_97, %c0_98] : memref<2x800xf32, #tpu.memory_space<vmem>>, vector<2x800xf32>
    %c10_99 = arith.constant 10 : index
    %c0_100 = arith.constant 0 : index
    %c0_101 = arith.constant 0 : index
    %85 = vector.load %arg2[%c10_99, %c0_100, %c0_101] : memref<27x2x4xf32, #tpu.memory_space<vmem>>, vector<1x2x4xf32>
    %86 = vector.shape_cast %85 : vector<1x2x4xf32> to vector<2x4xf32>
    %cst_102 = arith.constant dense<0.000000e+00> : vector<2x800xf32>
    %87 = tpu.matmul %86, %83, %cst_102 {dimension_numbers = #tpu.dot_dimension_numbers<[1], [0], [0], [1], [0, 0, 1, 1], [], []>} : vector<2x4xf32>, vector<4x800xf32>, vector<2x800xf32> -> vector<2x800xf32>
    %88 = arith.addf %84, %87 : vector<2x800xf32>
    %c0_103 = arith.constant 0 : index
    %c0_104 = arith.constant 0 : index
    %89 = vector.load %arg6[%c0_103, %c0_104] : memref<2x800xf32, #tpu.memory_space<vmem>>, vector<2x800xf32>
    tpu.vector_store %arg6[%c0_103, %c0_104], %88 {strides = array<i32>} : memref<2x800xf32, #tpu.memory_space<vmem>>, vector<2x800xf32>,
    %c0_105 = arith.constant 0 : index
    %c0_106 = arith.constant 0 : index
    %c102 = arith.constant 102 : index
    %90 = vector.load %arg1[%c0_105, %c0_106, %c102] : memref<1x4x1100xf32, #tpu.memory_space<vmem>>, vector<1x4x800xf32>
    %91 = vector.shape_cast %90 : vector<1x4x800xf32> to vector<4x800xf32>
    %c0_107 = arith.constant 0 : index
    %c0_108 = arith.constant 0 : index
    %92 = vector.load %arg6[%c0_107, %c0_108] : memref<2x800xf32, #tpu.memory_space<vmem>>, vector<2x800xf32>
    %c11_109 = arith.constant 11 : index
    %c0_110 = arith.constant 0 : index
    %c0_111 = arith.constant 0 : index
    %93 = vector.load %arg2[%c11_109, %c0_110, %c0_111] : memref<27x2x4xf32, #tpu.memory_space<vmem>>, vector<1x2x4xf32>
    %94 = vector.shape_cast %93 : vector<1x2x4xf32> to vector<2x4xf32>
    %cst_112 = arith.constant dense<0.000000e+00> : vector<2x800xf32>
    %95 = tpu.matmul %94, %91, %cst_112 {dimension_numbers = #tpu.dot_dimension_numbers<[1], [0], [0], [1], [0, 0, 1, 1], [], []>} : vector<2x4xf32>, vector<4x800xf32>, vector<2x800xf32> -> vector<2x800xf32>
    %96 = arith.addf %92, %95 : vector<2x800xf32>
    %c0_113 = arith.constant 0 : index
    %c0_114 = arith.constant 0 : index
    %97 = vector.load %arg6[%c0_113, %c0_114] : memref<2x800xf32, #tpu.memory_space<vmem>>, vector<2x800xf32>
    tpu.vector_store %arg6[%c0_113, %c0_114], %96 {strides = array<i32>} : memref<2x800xf32, #tpu.memory_space<vmem>>, vector<2x800xf32>,
    %c0_115 = arith.constant 0 : index
    %c0_116 = arith.constant 0 : index
    %c110 = arith.constant 110 : index
    %98 = vector.load %arg1[%c0_115, %c0_116, %c110] : memref<1x4x1100xf32, #tpu.memory_space<vmem>>, vector<1x4x800xf32>
    %99 = vector.shape_cast %98 : vector<1x4x800xf32> to vector<4x800xf32>
    %c0_117 = arith.constant 0 : index
    %c0_118 = arith.constant 0 : index
    %100 = vector.load %arg6[%c0_117, %c0_118] : memref<2x800xf32, #tpu.memory_space<vmem>>, vector<2x800xf32>
    %c12_119 = arith.constant 12 : index
    %c0_120 = arith.constant 0 : index
    %c0_121 = arith.constant 0 : index
    %101 = vector.load %arg2[%c12_119, %c0_120, %c0_121] : memref<27x2x4xf32, #tpu.memory_space<vmem>>, vector<1x2x4xf32>
    %102 = vector.shape_cast %101 : vector<1x2x4xf32> to vector<2x4xf32>
    %cst_122 = arith.constant dense<0.000000e+00> : vector<2x800xf32>
    %103 = tpu.matmul %102, %99, %cst_122 {dimension_numbers = #tpu.dot_dimension_numbers<[1], [0], [0], [1], [0, 0, 1, 1], [], []>} : vector<2x4xf32>, vector<4x800xf32>, vector<2x800xf32> -> vector<2x800xf32>
    %104 = arith.addf %100, %103 : vector<2x800xf32>
    %c0_123 = arith.constant 0 : index
    %c0_124 = arith.constant 0 : index
    %105 = vector.load %arg6[%c0_123, %c0_124] : memref<2x800xf32, #tpu.memory_space<vmem>>, vector<2x800xf32>
    tpu.vector_store %arg6[%c0_123, %c0_124], %104 {strides = array<i32>} : memref<2x800xf32, #tpu.memory_space<vmem>>, vector<2x800xf32>,
    %c0_125 = arith.constant 0 : index
    %c0_126 = arith.constant 0 : index
    %c111 = arith.constant 111 : index
    %106 = vector.load %arg1[%c0_125, %c0_126, %c111] : memref<1x4x1100xf32, #tpu.memory_space<vmem>>, vector<1x4x800xf32>
    %107 = vector.shape_cast %106 : vector<1x4x800xf32> to vector<4x800xf32>
    %c0_127 = arith.constant 0 : index
    %c0_128 = arith.constant 0 : index
    %108 = vector.load %arg6[%c0_127, %c0_128] : memref<2x800xf32, #tpu.memory_space<vmem>>, vector<2x800xf32>
    %c13 = arith.constant 13 : index
    %c0_129 = arith.constant 0 : index
    %c0_130 = arith.constant 0 : index
    %109 = vector.load %arg2[%c13, %c0_129, %c0_130] : memref<27x2x4xf32, #tpu.memory_space<vmem>>, vector<1x2x4xf32>
    %110 = vector.shape_cast %109 : vector<1x2x4xf32> to vector<2x4xf32>
    %cst_131 = arith.constant dense<0.000000e+00> : vector<2x800xf32>
    %111 = tpu.matmul %110, %107, %cst_131 {dimension_numbers = #tpu.dot_dimension_numbers<[1], [0], [0], [1], [0, 0, 1, 1], [], []>} : vector<2x4xf32>, vector<4x800xf32>, vector<2x800xf32> -> vector<2x800xf32>
    %112 = arith.addf %108, %111 : vector<2x800xf32>
    %c0_132 = arith.constant 0 : index
    %c0_133 = arith.constant 0 : index
    %113 = vector.load %arg6[%c0_132, %c0_133] : memref<2x800xf32, #tpu.memory_space<vmem>>, vector<2x800xf32>
    tpu.vector_store %arg6[%c0_132, %c0_133], %112 {strides = array<i32>} : memref<2x800xf32, #tpu.memory_space<vmem>>, vector<2x800xf32>,
    %c0_134 = arith.constant 0 : index
    %c0_135 = arith.constant 0 : index
    %c112 = arith.constant 112 : index
    %114 = vector.load %arg1[%c0_134, %c0_135, %c112] : memref<1x4x1100xf32, #tpu.memory_space<vmem>>, vector<1x4x800xf32>
    %115 = vector.shape_cast %114 : vector<1x4x800xf32> to vector<4x800xf32>
    %c0_136 = arith.constant 0 : index
    %c0_137 = arith.constant 0 : index
    %116 = vector.load %arg6[%c0_136, %c0_137] : memref<2x800xf32, #tpu.memory_space<vmem>>, vector<2x800xf32>
    %c14 = arith.constant 14 : index
    %c0_138 = arith.constant 0 : index
    %c0_139 = arith.constant 0 : index
    %117 = vector.load %arg2[%c14, %c0_138, %c0_139] : memref<27x2x4xf32, #tpu.memory_space<vmem>>, vector<1x2x4xf32>
    %118 = vector.shape_cast %117 : vector<1x2x4xf32> to vector<2x4xf32>
    %cst_140 = arith.constant dense<0.000000e+00> : vector<2x800xf32>
    %119 = tpu.matmul %118, %115, %cst_140 {dimension_numbers = #tpu.dot_dimension_numbers<[1], [0], [0], [1], [0, 0, 1, 1], [], []>} : vector<2x4xf32>, vector<4x800xf32>, vector<2x800xf32> -> vector<2x800xf32>
    %120 = arith.addf %116, %119 : vector<2x800xf32>
    %c0_141 = arith.constant 0 : index
    %c0_142 = arith.constant 0 : index
    %121 = vector.load %arg6[%c0_141, %c0_142] : memref<2x800xf32, #tpu.memory_space<vmem>>, vector<2x800xf32>
    tpu.vector_store %arg6[%c0_141, %c0_142], %120 {strides = array<i32>} : memref<2x800xf32, #tpu.memory_space<vmem>>, vector<2x800xf32>,
    %c0_143 = arith.constant 0 : index
    %c0_144 = arith.constant 0 : index
    %c120 = arith.constant 120 : index
    %122 = vector.load %arg1[%c0_143, %c0_144, %c120] : memref<1x4x1100xf32, #tpu.memory_space<vmem>>, vector<1x4x800xf32>
    %123 = vector.shape_cast %122 : vector<1x4x800xf32> to vector<4x800xf32>
    %c0_145 = arith.constant 0 : index
    %c0_146 = arith.constant 0 : index
    %124 = vector.load %arg6[%c0_145, %c0_146] : memref<2x800xf32, #tpu.memory_space<vmem>>, vector<2x800xf32>
    %c15 = arith.constant 15 : index
    %c0_147 = arith.constant 0 : index
    %c0_148 = arith.constant 0 : index
    %125 = vector.load %arg2[%c15, %c0_147, %c0_148] : memref<27x2x4xf32, #tpu.memory_space<vmem>>, vector<1x2x4xf32>
    %126 = vector.shape_cast %125 : vector<1x2x4xf32> to vector<2x4xf32>
    %cst_149 = arith.constant dense<0.000000e+00> : vector<2x800xf32>
    %127 = tpu.matmul %126, %123, %cst_149 {dimension_numbers = #tpu.dot_dimension_numbers<[1], [0], [0], [1], [0, 0, 1, 1], [], []>} : vector<2x4xf32>, vector<4x800xf32>, vector<2x800xf32> -> vector<2x800xf32>
    %128 = arith.addf %124, %127 : vector<2x800xf32>
    %c0_150 = arith.constant 0 : index
    %c0_151 = arith.constant 0 : index
    %129 = vector.load %arg6[%c0_150, %c0_151] : memref<2x800xf32, #tpu.memory_space<vmem>>, vector<2x800xf32>
    tpu.vector_store %arg6[%c0_150, %c0_151], %128 {strides = array<i32>} : memref<2x800xf32, #tpu.memory_space<vmem>>, vector<2x800xf32>,
    %c0_152 = arith.constant 0 : index
    %c0_153 = arith.constant 0 : index
    %c121 = arith.constant 121 : index
    %130 = vector.load %arg1[%c0_152, %c0_153, %c121] : memref<1x4x1100xf32, #tpu.memory_space<vmem>>, vector<1x4x800xf32>
    %131 = vector.shape_cast %130 : vector<1x4x800xf32> to vector<4x800xf32>
    %c0_154 = arith.constant 0 : index
    %c0_155 = arith.constant 0 : index
    %132 = vector.load %arg6[%c0_154, %c0_155] : memref<2x800xf32, #tpu.memory_space<vmem>>, vector<2x800xf32>
    %c16 = arith.constant 16 : index
    %c0_156 = arith.constant 0 : index
    %c0_157 = arith.constant 0 : index
    %133 = vector.load %arg2[%c16, %c0_156, %c0_157] : memref<27x2x4xf32, #tpu.memory_space<vmem>>, vector<1x2x4xf32>
    %134 = vector.shape_cast %133 : vector<1x2x4xf32> to vector<2x4xf32>
    %cst_158 = arith.constant dense<0.000000e+00> : vector<2x800xf32>
    %135 = tpu.matmul %134, %131, %cst_158 {dimension_numbers = #tpu.dot_dimension_numbers<[1], [0], [0], [1], [0, 0, 1, 1], [], []>} : vector<2x4xf32>, vector<4x800xf32>, vector<2x800xf32> -> vector<2x800xf32>
    %136 = arith.addf %132, %135 : vector<2x800xf32>
    %c0_159 = arith.constant 0 : index
    %c0_160 = arith.constant 0 : index
    %137 = vector.load %arg6[%c0_159, %c0_160] : memref<2x800xf32, #tpu.memory_space<vmem>>, vector<2x800xf32>
    tpu.vector_store %arg6[%c0_159, %c0_160], %136 {strides = array<i32>} : memref<2x800xf32, #tpu.memory_space<vmem>>, vector<2x800xf32>,
    %c0_161 = arith.constant 0 : index
    %c0_162 = arith.constant 0 : index
    %c122 = arith.constant 122 : index
    %138 = vector.load %arg1[%c0_161, %c0_162, %c122] : memref<1x4x1100xf32, #tpu.memory_space<vmem>>, vector<1x4x800xf32>
    %139 = vector.shape_cast %138 : vector<1x4x800xf32> to vector<4x800xf32>
    %c0_163 = arith.constant 0 : index
    %c0_164 = arith.constant 0 : index
    %140 = vector.load %arg6[%c0_163, %c0_164] : memref<2x800xf32, #tpu.memory_space<vmem>>, vector<2x800xf32>
    %c17 = arith.constant 17 : index
    %c0_165 = arith.constant 0 : index
    %c0_166 = arith.constant 0 : index
    %141 = vector.load %arg2[%c17, %c0_165, %c0_166] : memref<27x2x4xf32, #tpu.memory_space<vmem>>, vector<1x2x4xf32>
    %142 = vector.shape_cast %141 : vector<1x2x4xf32> to vector<2x4xf32>
    %cst_167 = arith.constant dense<0.000000e+00> : vector<2x800xf32>
    %143 = tpu.matmul %142, %139, %cst_167 {dimension_numbers = #tpu.dot_dimension_numbers<[1], [0], [0], [1], [0, 0, 1, 1], [], []>} : vector<2x4xf32>, vector<4x800xf32>, vector<2x800xf32> -> vector<2x800xf32>
    %144 = arith.addf %140, %143 : vector<2x800xf32>
    %c0_168 = arith.constant 0 : index
    %c0_169 = arith.constant 0 : index
    %145 = vector.load %arg6[%c0_168, %c0_169] : memref<2x800xf32, #tpu.memory_space<vmem>>, vector<2x800xf32>
    tpu.vector_store %arg6[%c0_168, %c0_169], %144 {strides = array<i32>} : memref<2x800xf32, #tpu.memory_space<vmem>>, vector<2x800xf32>,
    %c0_170 = arith.constant 0 : index
    %c0_171 = arith.constant 0 : index
    %c200 = arith.constant 200 : index
    %146 = vector.load %arg1[%c0_170, %c0_171, %c200] : memref<1x4x1100xf32, #tpu.memory_space<vmem>>, vector<1x4x800xf32>
    %147 = vector.shape_cast %146 : vector<1x4x800xf32> to vector<4x800xf32>
    %c0_172 = arith.constant 0 : index
    %c0_173 = arith.constant 0 : index
    %148 = vector.load %arg6[%c0_172, %c0_173] : memref<2x800xf32, #tpu.memory_space<vmem>>, vector<2x800xf32>
    %c18 = arith.constant 18 : index
    %c0_174 = arith.constant 0 : index
    %c0_175 = arith.constant 0 : index
    %149 = vector.load %arg2[%c18, %c0_174, %c0_175] : memref<27x2x4xf32, #tpu.memory_space<vmem>>, vector<1x2x4xf32>
    %150 = vector.shape_cast %149 : vector<1x2x4xf32> to vector<2x4xf32>
    %cst_176 = arith.constant dense<0.000000e+00> : vector<2x800xf32>
    %151 = tpu.matmul %150, %147, %cst_176 {dimension_numbers = #tpu.dot_dimension_numbers<[1], [0], [0], [1], [0, 0, 1, 1], [], []>} : vector<2x4xf32>, vector<4x800xf32>, vector<2x800xf32> -> vector<2x800xf32>
    %152 = arith.addf %148, %151 : vector<2x800xf32>
    %c0_177 = arith.constant 0 : index
    %c0_178 = arith.constant 0 : index
    %153 = vector.load %arg6[%c0_177, %c0_178] : memref<2x800xf32, #tpu.memory_space<vmem>>, vector<2x800xf32>
    tpu.vector_store %arg6[%c0_177, %c0_178], %152 {strides = array<i32>} : memref<2x800xf32, #tpu.memory_space<vmem>>, vector<2x800xf32>,
    %c0_179 = arith.constant 0 : index
    %c0_180 = arith.constant 0 : index
    %c201 = arith.constant 201 : index
    %154 = vector.load %arg1[%c0_179, %c0_180, %c201] : memref<1x4x1100xf32, #tpu.memory_space<vmem>>, vector<1x4x800xf32>
    %155 = vector.shape_cast %154 : vector<1x4x800xf32> to vector<4x800xf32>
    %c0_181 = arith.constant 0 : index
    %c0_182 = arith.constant 0 : index
    %156 = vector.load %arg6[%c0_181, %c0_182] : memref<2x800xf32, #tpu.memory_space<vmem>>, vector<2x800xf32>
    %c19 = arith.constant 19 : index
    %c0_183 = arith.constant 0 : index
    %c0_184 = arith.constant 0 : index
    %157 = vector.load %arg2[%c19, %c0_183, %c0_184] : memref<27x2x4xf32, #tpu.memory_space<vmem>>, vector<1x2x4xf32>
    %158 = vector.shape_cast %157 : vector<1x2x4xf32> to vector<2x4xf32>
    %cst_185 = arith.constant dense<0.000000e+00> : vector<2x800xf32>
    %159 = tpu.matmul %158, %155, %cst_185 {dimension_numbers = #tpu.dot_dimension_numbers<[1], [0], [0], [1], [0, 0, 1, 1], [], []>} : vector<2x4xf32>, vector<4x800xf32>, vector<2x800xf32> -> vector<2x800xf32>
    %160 = arith.addf %156, %159 : vector<2x800xf32>
    %c0_186 = arith.constant 0 : index
    %c0_187 = arith.constant 0 : index
    %161 = vector.load %arg6[%c0_186, %c0_187] : memref<2x800xf32, #tpu.memory_space<vmem>>, vector<2x800xf32>
    tpu.vector_store %arg6[%c0_186, %c0_187], %160 {strides = array<i32>} : memref<2x800xf32, #tpu.memory_space<vmem>>, vector<2x800xf32>,
    %c0_188 = arith.constant 0 : index
    %c0_189 = arith.constant 0 : index
    %c202 = arith.constant 202 : index
    %162 = vector.load %arg1[%c0_188, %c0_189, %c202] : memref<1x4x1100xf32, #tpu.memory_space<vmem>>, vector<1x4x800xf32>
    %163 = vector.shape_cast %162 : vector<1x4x800xf32> to vector<4x800xf32>
    %c0_190 = arith.constant 0 : index
    %c0_191 = arith.constant 0 : index
    %164 = vector.load %arg6[%c0_190, %c0_191] : memref<2x800xf32, #tpu.memory_space<vmem>>, vector<2x800xf32>
    %c20_192 = arith.constant 20 : index
    %c0_193 = arith.constant 0 : index
    %c0_194 = arith.constant 0 : index
    %165 = vector.load %arg2[%c20_192, %c0_193, %c0_194] : memref<27x2x4xf32, #tpu.memory_space<vmem>>, vector<1x2x4xf32>
    %166 = vector.shape_cast %165 : vector<1x2x4xf32> to vector<2x4xf32>
    %cst_195 = arith.constant dense<0.000000e+00> : vector<2x800xf32>
    %167 = tpu.matmul %166, %163, %cst_195 {dimension_numbers = #tpu.dot_dimension_numbers<[1], [0], [0], [1], [0, 0, 1, 1], [], []>} : vector<2x4xf32>, vector<4x800xf32>, vector<2x800xf32> -> vector<2x800xf32>
    %168 = arith.addf %164, %167 : vector<2x800xf32>
    %c0_196 = arith.constant 0 : index
    %c0_197 = arith.constant 0 : index
    %169 = vector.load %arg6[%c0_196, %c0_197] : memref<2x800xf32, #tpu.memory_space<vmem>>, vector<2x800xf32>
    tpu.vector_store %arg6[%c0_196, %c0_197], %168 {strides = array<i32>} : memref<2x800xf32, #tpu.memory_space<vmem>>, vector<2x800xf32>,
    %c0_198 = arith.constant 0 : index
    %c0_199 = arith.constant 0 : index
    %c210 = arith.constant 210 : index
    %170 = vector.load %arg1[%c0_198, %c0_199, %c210] : memref<1x4x1100xf32, #tpu.memory_space<vmem>>, vector<1x4x800xf32>
    %171 = vector.shape_cast %170 : vector<1x4x800xf32> to vector<4x800xf32>
    %c0_200 = arith.constant 0 : index
    %c0_201 = arith.constant 0 : index
    %172 = vector.load %arg6[%c0_200, %c0_201] : memref<2x800xf32, #tpu.memory_space<vmem>>, vector<2x800xf32>
    %c21_202 = arith.constant 21 : index
    %c0_203 = arith.constant 0 : index
    %c0_204 = arith.constant 0 : index
    %173 = vector.load %arg2[%c21_202, %c0_203, %c0_204] : memref<27x2x4xf32, #tpu.memory_space<vmem>>, vector<1x2x4xf32>
    %174 = vector.shape_cast %173 : vector<1x2x4xf32> to vector<2x4xf32>
    %cst_205 = arith.constant dense<0.000000e+00> : vector<2x800xf32>
    %175 = tpu.matmul %174, %171, %cst_205 {dimension_numbers = #tpu.dot_dimension_numbers<[1], [0], [0], [1], [0, 0, 1, 1], [], []>} : vector<2x4xf32>, vector<4x800xf32>, vector<2x800xf32> -> vector<2x800xf32>
    %176 = arith.addf %172, %175 : vector<2x800xf32>
    %c0_206 = arith.constant 0 : index
    %c0_207 = arith.constant 0 : index
    %177 = vector.load %arg6[%c0_206, %c0_207] : memref<2x800xf32, #tpu.memory_space<vmem>>, vector<2x800xf32>
    tpu.vector_store %arg6[%c0_206, %c0_207], %176 {strides = array<i32>} : memref<2x800xf32, #tpu.memory_space<vmem>>, vector<2x800xf32>,
    %c0_208 = arith.constant 0 : index
    %c0_209 = arith.constant 0 : index
    %c211 = arith.constant 211 : index
    %178 = vector.load %arg1[%c0_208, %c0_209, %c211] : memref<1x4x1100xf32, #tpu.memory_space<vmem>>, vector<1x4x800xf32>
    %179 = vector.shape_cast %178 : vector<1x4x800xf32> to vector<4x800xf32>
    %c0_210 = arith.constant 0 : index
    %c0_211 = arith.constant 0 : index
    %180 = vector.load %arg6[%c0_210, %c0_211] : memref<2x800xf32, #tpu.memory_space<vmem>>, vector<2x800xf32>
    %c22_212 = arith.constant 22 : index
    %c0_213 = arith.constant 0 : index
    %c0_214 = arith.constant 0 : index
    %181 = vector.load %arg2[%c22_212, %c0_213, %c0_214] : memref<27x2x4xf32, #tpu.memory_space<vmem>>, vector<1x2x4xf32>
    %182 = vector.shape_cast %181 : vector<1x2x4xf32> to vector<2x4xf32>
    %cst_215 = arith.constant dense<0.000000e+00> : vector<2x800xf32>
    %183 = tpu.matmul %182, %179, %cst_215 {dimension_numbers = #tpu.dot_dimension_numbers<[1], [0], [0], [1], [0, 0, 1, 1], [], []>} : vector<2x4xf32>, vector<4x800xf32>, vector<2x800xf32> -> vector<2x800xf32>
    %184 = arith.addf %180, %183 : vector<2x800xf32>
    %c0_216 = arith.constant 0 : index
    %c0_217 = arith.constant 0 : index
    %185 = vector.load %arg6[%c0_216, %c0_217] : memref<2x800xf32, #tpu.memory_space<vmem>>, vector<2x800xf32>
    tpu.vector_store %arg6[%c0_216, %c0_217], %184 {strides = array<i32>} : memref<2x800xf32, #tpu.memory_space<vmem>>, vector<2x800xf32>,
    %c0_218 = arith.constant 0 : index
    %c0_219 = arith.constant 0 : index
    %c212 = arith.constant 212 : index
    %186 = vector.load %arg1[%c0_218, %c0_219, %c212] : memref<1x4x1100xf32, #tpu.memory_space<vmem>>, vector<1x4x800xf32>
    %187 = vector.shape_cast %186 : vector<1x4x800xf32> to vector<4x800xf32>
    %c0_220 = arith.constant 0 : index
    %c0_221 = arith.constant 0 : index
    %188 = vector.load %arg6[%c0_220, %c0_221] : memref<2x800xf32, #tpu.memory_space<vmem>>, vector<2x800xf32>
    %c23 = arith.constant 23 : index
    %c0_222 = arith.constant 0 : index
    %c0_223 = arith.constant 0 : index
    %189 = vector.load %arg2[%c23, %c0_222, %c0_223] : memref<27x2x4xf32, #tpu.memory_space<vmem>>, vector<1x2x4xf32>
    %190 = vector.shape_cast %189 : vector<1x2x4xf32> to vector<2x4xf32>
    %cst_224 = arith.constant dense<0.000000e+00> : vector<2x800xf32>
    %191 = tpu.matmul %190, %187, %cst_224 {dimension_numbers = #tpu.dot_dimension_numbers<[1], [0], [0], [1], [0, 0, 1, 1], [], []>} : vector<2x4xf32>, vector<4x800xf32>, vector<2x800xf32> -> vector<2x800xf32>
    %192 = arith.addf %188, %191 : vector<2x800xf32>
    %c0_225 = arith.constant 0 : index
    %c0_226 = arith.constant 0 : index
    %193 = vector.load %arg6[%c0_225, %c0_226] : memref<2x800xf32, #tpu.memory_space<vmem>>, vector<2x800xf32>
    tpu.vector_store %arg6[%c0_225, %c0_226], %192 {strides = array<i32>} : memref<2x800xf32, #tpu.memory_space<vmem>>, vector<2x800xf32>,
    %c0_227 = arith.constant 0 : index
    %c0_228 = arith.constant 0 : index
    %c220 = arith.constant 220 : index
    %194 = vector.load %arg1[%c0_227, %c0_228, %c220] : memref<1x4x1100xf32, #tpu.memory_space<vmem>>, vector<1x4x800xf32>
    %195 = vector.shape_cast %194 : vector<1x4x800xf32> to vector<4x800xf32>
    %c0_229 = arith.constant 0 : index
    %c0_230 = arith.constant 0 : index
    %196 = vector.load %arg6[%c0_229, %c0_230] : memref<2x800xf32, #tpu.memory_space<vmem>>, vector<2x800xf32>
    %c24 = arith.constant 24 : index
    %c0_231 = arith.constant 0 : index
    %c0_232 = arith.constant 0 : index
    %197 = vector.load %arg2[%c24, %c0_231, %c0_232] : memref<27x2x4xf32, #tpu.memory_space<vmem>>, vector<1x2x4xf32>
    %198 = vector.shape_cast %197 : vector<1x2x4xf32> to vector<2x4xf32>
    %cst_233 = arith.constant dense<0.000000e+00> : vector<2x800xf32>
    %199 = tpu.matmul %198, %195, %cst_233 {dimension_numbers = #tpu.dot_dimension_numbers<[1], [0], [0], [1], [0, 0, 1, 1], [], []>} : vector<2x4xf32>, vector<4x800xf32>, vector<2x800xf32> -> vector<2x800xf32>
    %200 = arith.addf %196, %199 : vector<2x800xf32>
    %c0_234 = arith.constant 0 : index
    %c0_235 = arith.constant 0 : index
    %201 = vector.load %arg6[%c0_234, %c0_235] : memref<2x800xf32, #tpu.memory_space<vmem>>, vector<2x800xf32>
    tpu.vector_store %arg6[%c0_234, %c0_235], %200 {strides = array<i32>} : memref<2x800xf32, #tpu.memory_space<vmem>>, vector<2x800xf32>,
    %c0_236 = arith.constant 0 : index
    %c0_237 = arith.constant 0 : index
    %c221 = arith.constant 221 : index
    %202 = vector.load %arg1[%c0_236, %c0_237, %c221] : memref<1x4x1100xf32, #tpu.memory_space<vmem>>, vector<1x4x800xf32>
    %203 = vector.shape_cast %202 : vector<1x4x800xf32> to vector<4x800xf32>
    %c0_238 = arith.constant 0 : index
    %c0_239 = arith.constant 0 : index
    %204 = vector.load %arg6[%c0_238, %c0_239] : memref<2x800xf32, #tpu.memory_space<vmem>>, vector<2x800xf32>
    %c25 = arith.constant 25 : index
    %c0_240 = arith.constant 0 : index
    %c0_241 = arith.constant 0 : index
    %205 = vector.load %arg2[%c25, %c0_240, %c0_241] : memref<27x2x4xf32, #tpu.memory_space<vmem>>, vector<1x2x4xf32>
    %206 = vector.shape_cast %205 : vector<1x2x4xf32> to vector<2x4xf32>
    %cst_242 = arith.constant dense<0.000000e+00> : vector<2x800xf32>
    %207 = tpu.matmul %206, %203, %cst_242 {dimension_numbers = #tpu.dot_dimension_numbers<[1], [0], [0], [1], [0, 0, 1, 1], [], []>} : vector<2x4xf32>, vector<4x800xf32>, vector<2x800xf32> -> vector<2x800xf32>
    %208 = arith.addf %204, %207 : vector<2x800xf32>
    %c0_243 = arith.constant 0 : index
    %c0_244 = arith.constant 0 : index
    %209 = vector.load %arg6[%c0_243, %c0_244] : memref<2x800xf32, #tpu.memory_space<vmem>>, vector<2x800xf32>
    tpu.vector_store %arg6[%c0_243, %c0_244], %208 {strides = array<i32>} : memref<2x800xf32, #tpu.memory_space<vmem>>, vector<2x800xf32>,
    %c0_245 = arith.constant 0 : index
    %c0_246 = arith.constant 0 : index
    %c222 = arith.constant 222 : index
    %210 = vector.load %arg1[%c0_245, %c0_246, %c222] : memref<1x4x1100xf32, #tpu.memory_space<vmem>>, vector<1x4x800xf32>
    %211 = vector.shape_cast %210 : vector<1x4x800xf32> to vector<4x800xf32>
    %c0_247 = arith.constant 0 : index
    %c0_248 = arith.constant 0 : index
    %212 = vector.load %arg6[%c0_247, %c0_248] : memref<2x800xf32, #tpu.memory_space<vmem>>, vector<2x800xf32>
    %c26 = arith.constant 26 : index
    %c0_249 = arith.constant 0 : index
    %c0_250 = arith.constant 0 : index
    %213 = vector.load %arg2[%c26, %c0_249, %c0_250] : memref<27x2x4xf32, #tpu.memory_space<vmem>>, vector<1x2x4xf32>
    %214 = vector.shape_cast %213 : vector<1x2x4xf32> to vector<2x4xf32>
    %cst_251 = arith.constant dense<0.000000e+00> : vector<2x800xf32>
    %215 = tpu.matmul %214, %211, %cst_251 {dimension_numbers = #tpu.dot_dimension_numbers<[1], [0], [0], [1], [0, 0, 1, 1], [], []>} : vector<2x4xf32>, vector<4x800xf32>, vector<2x800xf32> -> vector<2x800xf32>
    %216 = arith.addf %212, %215 : vector<2x800xf32>
    %c0_252 = arith.constant 0 : index
    %c0_253 = arith.constant 0 : index
    %217 = vector.load %arg6[%c0_252, %c0_253] : memref<2x800xf32, #tpu.memory_space<vmem>>, vector<2x800xf32>
    tpu.vector_store %arg6[%c0_252, %c0_253], %216 {strides = array<i32>} : memref<2x800xf32, #tpu.memory_space<vmem>>, vector<2x800xf32>,
    %c0_254 = arith.constant 0 : index
    %c0_255 = arith.constant 0 : index
    %218 = vector.load %arg6[%c0_254, %c0_255] : memref<2x800xf32, #tpu.memory_space<vmem>>, vector<2x100xf32>
    %c0_256 = arith.constant 0 : index
    %c0_257 = arith.constant 0 : index
    %219 = vector.load %arg3[%c0_256, %c0_257] : memref<2x1xf32, #tpu.memory_space<vmem>>, vector<2x1xf32>
    %220 = vector.broadcast %219 : vector<2x1xf32> to vector<2x100xf32>
    %221 = arith.addf %218, %220 : vector<2x100xf32>
    %c0_258 = arith.constant 0 : index
    %c0_259 = arith.constant 0 : index
    %222 = vector.load %arg7[%c0_258, %c0_259] : memref<16x100xf32, #tpu.memory_space<vmem>>, vector<2x100xf32>
    tpu.vector_store %arg7[%c0_258, %c0_259], %221 {strides = array<i32>} : memref<16x100xf32, #tpu.memory_space<vmem>>, vector<2x100xf32>,
    %c0_260 = arith.constant 0 : index
    %c100_261 = arith.constant 100 : index
    %223 = vector.load %arg6[%c0_260, %c100_261] : memref<2x800xf32, #tpu.memory_space<vmem>>, vector<2x100xf32>
    %c0_262 = arith.constant 0 : index
    %c0_263 = arith.constant 0 : index
    %224 = vector.load %arg3[%c0_262, %c0_263] : memref<2x1xf32, #tpu.memory_space<vmem>>, vector<2x1xf32>
    %225 = vector.broadcast %224 : vector<2x1xf32> to vector<2x100xf32>
    %226 = arith.addf %223, %225 : vector<2x100xf32>
    %c2_264 = arith.constant 2 : index
    %c0_265 = arith.constant 0 : index
    %227 = vector.load %arg7[%c2_264, %c0_265] : memref<16x100xf32, #tpu.memory_space<vmem>>, vector<2x100xf32>
    tpu.vector_store %arg7[%c2_264, %c0_265], %226 {strides = array<i32>} : memref<16x100xf32, #tpu.memory_space<vmem>>, vector<2x100xf32>,
    %c0_266 = arith.constant 0 : index
    %c200_267 = arith.constant 200 : index
    %228 = vector.load %arg6[%c0_266, %c200_267] : memref<2x800xf32, #tpu.memory_space<vmem>>, vector<2x100xf32>
    %c0_268 = arith.constant 0 : index
    %c0_269 = arith.constant 0 : index
    %229 = vector.load %arg3[%c0_268, %c0_269] : memref<2x1xf32, #tpu.memory_space<vmem>>, vector<2x1xf32>
    %230 = vector.broadcast %229 : vector<2x1xf32> to vector<2x100xf32>
    %231 = arith.addf %228, %230 : vector<2x100xf32>
    %c4_270 = arith.constant 4 : index
    %c0_271 = arith.constant 0 : index
    %232 = vector.load %arg7[%c4_270, %c0_271] : memref<16x100xf32, #tpu.memory_space<vmem>>, vector<2x100xf32>
    tpu.vector_store %arg7[%c4_270, %c0_271], %231 {strides = array<i32>} : memref<16x100xf32, #tpu.memory_space<vmem>>, vector<2x100xf32>,
    %c0_272 = arith.constant 0 : index
    %c300 = arith.constant 300 : index
    %233 = vector.load %arg6[%c0_272, %c300] : memref<2x800xf32, #tpu.memory_space<vmem>>, vector<2x100xf32>
    %c0_273 = arith.constant 0 : index
    %c0_274 = arith.constant 0 : index
    %234 = vector.load %arg3[%c0_273, %c0_274] : memref<2x1xf32, #tpu.memory_space<vmem>>, vector<2x1xf32>
    %235 = vector.broadcast %234 : vector<2x1xf32> to vector<2x100xf32>
    %236 = arith.addf %233, %235 : vector<2x100xf32>
    %c6_275 = arith.constant 6 : index
    %c0_276 = arith.constant 0 : index
    %237 = vector.load %arg7[%c6_275, %c0_276] : memref<16x100xf32, #tpu.memory_space<vmem>>, vector<2x100xf32>
    tpu.vector_store %arg7[%c6_275, %c0_276], %236 {strides = array<i32>} : memref<16x100xf32, #tpu.memory_space<vmem>>, vector<2x100xf32>,
    %c0_277 = arith.constant 0 : index
    %c400 = arith.constant 400 : index
    %238 = vector.load %arg6[%c0_277, %c400] : memref<2x800xf32, #tpu.memory_space<vmem>>, vector<2x100xf32>
    %c0_278 = arith.constant 0 : index
    %c0_279 = arith.constant 0 : index
    %239 = vector.load %arg3[%c0_278, %c0_279] : memref<2x1xf32, #tpu.memory_space<vmem>>, vector<2x1xf32>
    %240 = vector.broadcast %239 : vector<2x1xf32> to vector<2x100xf32>
    %241 = arith.addf %238, %240 : vector<2x100xf32>
    %c8_280 = arith.constant 8 : index
    %c0_281 = arith.constant 0 : index
    %242 = vector.load %arg7[%c8_280, %c0_281] : memref<16x100xf32, #tpu.memory_space<vmem>>, vector<2x100xf32>
    tpu.vector_store %arg7[%c8_280, %c0_281], %241 {strides = array<i32>} : memref<16x100xf32, #tpu.memory_space<vmem>>, vector<2x100xf32>,
    %c0_282 = arith.constant 0 : index
    %c500 = arith.constant 500 : index
    %243 = vector.load %arg6[%c0_282, %c500] : memref<2x800xf32, #tpu.memory_space<vmem>>, vector<2x100xf32>
    %c0_283 = arith.constant 0 : index
    %c0_284 = arith.constant 0 : index
    %244 = vector.load %arg3[%c0_283, %c0_284] : memref<2x1xf32, #tpu.memory_space<vmem>>, vector<2x1xf32>
    %245 = vector.broadcast %244 : vector<2x1xf32> to vector<2x100xf32>
    %246 = arith.addf %243, %245 : vector<2x100xf32>
    %c10_285 = arith.constant 10 : index
    %c0_286 = arith.constant 0 : index
    %247 = vector.load %arg7[%c10_285, %c0_286] : memref<16x100xf32, #tpu.memory_space<vmem>>, vector<2x100xf32>
    tpu.vector_store %arg7[%c10_285, %c0_286], %246 {strides = array<i32>} : memref<16x100xf32, #tpu.memory_space<vmem>>, vector<2x100xf32>,
    %c0_287 = arith.constant 0 : index
    %c600 = arith.constant 600 : index
    %248 = vector.load %arg6[%c0_287, %c600] : memref<2x800xf32, #tpu.memory_space<vmem>>, vector<2x100xf32>
    %c0_288 = arith.constant 0 : index
    %c0_289 = arith.constant 0 : index
    %249 = vector.load %arg3[%c0_288, %c0_289] : memref<2x1xf32, #tpu.memory_space<vmem>>, vector<2x1xf32>
    %250 = vector.broadcast %249 : vector<2x1xf32> to vector<2x100xf32>
    %251 = arith.addf %248, %250 : vector<2x100xf32>
    %c12_290 = arith.constant 12 : index
    %c0_291 = arith.constant 0 : index
    %252 = vector.load %arg7[%c12_290, %c0_291] : memref<16x100xf32, #tpu.memory_space<vmem>>, vector<2x100xf32>
    tpu.vector_store %arg7[%c12_290, %c0_291], %251 {strides = array<i32>} : memref<16x100xf32, #tpu.memory_space<vmem>>, vector<2x100xf32>,
    %c0_292 = arith.constant 0 : index
    %c700 = arith.constant 700 : index
    %253 = vector.load %arg6[%c0_292, %c700] : memref<2x800xf32, #tpu.memory_space<vmem>>, vector<2x100xf32>
    %c0_293 = arith.constant 0 : index
    %c0_294 = arith.constant 0 : index
    %254 = vector.load %arg3[%c0_293, %c0_294] : memref<2x1xf32, #tpu.memory_space<vmem>>, vector<2x1xf32>
    %255 = vector.broadcast %254 : vector<2x1xf32> to vector<2x100xf32>
    %256 = arith.addf %253, %255 : vector<2x100xf32>
    %c14_295 = arith.constant 14 : index
    %c0_296 = arith.constant 0 : index
    %257 = vector.load %arg7[%c14_295, %c0_296] : memref<16x100xf32, #tpu.memory_space<vmem>>, vector<2x100xf32>
    tpu.vector_store %arg7[%c14_295, %c0_296], %256 {strides = array<i32>} : memref<16x100xf32, #tpu.memory_space<vmem>>, vector<2x100xf32>,
    %c0_297 = arith.constant 0 : index
    %c0_298 = arith.constant 0 : index
    %258 = vector.load %arg7[%c0_297, %c0_298] : memref<16x100xf32, #tpu.memory_space<vmem>>, vector<16x100xf32>
    %c0_299 = arith.constant 0 : index
    %c0_300 = arith.constant 0 : index
    %259 = vector.load %arg4[%c0_299, %c0_300] : memref<100x256xf32, #tpu.memory_space<vmem>>, vector<100x256xf32>
    %cst_301 = arith.constant dense<0.000000e+00> : vector<16x256xf32>
    %260 = tpu.matmul %258, %259, %cst_301 {dimension_numbers = #tpu.dot_dimension_numbers<[1], [0], [0], [1], [0, 0, 1, 1], [], []>} : vector<16x100xf32>, vector<100x256xf32>, vector<16x256xf32> -> vector<16x256xf32>
    %261 = vector.extract_strided_slice %260 {offsets = [0, 0], sizes = [2, 256], strides = [1, 1]} : vector<16x256xf32> to vector<2x256xf32>
    %c0_302 = arith.constant 0 : index
    %c0_303 = arith.constant 0 : index
    %c0_304 = arith.constant 0 : index
    %c0_305 = arith.constant 0 : index
    %262 = vector.load %arg5[%c0_302, %c0_303, %c0_304, %c0_305] : memref<1x2x16x256xf32, #tpu.memory_space<vmem>>, vector<1x2x1x256xf32>
    %263 = vector.shape_cast %262 : vector<1x2x1x256xf32> to vector<2x256xf32>
    %264 = vector.shape_cast %261 : vector<2x256xf32> to vector<1x2x1x256xf32>
    tpu.vector_store %arg5[%c0_302, %c0_303, %c0_304, %c0_305], %264 {strides = array<i32>} : memref<1x2x16x256xf32, #tpu.memory_space<vmem>>, vector<1x2x1x256xf32>,
    %265 = vector.extract_strided_slice %260 {offsets = [0, 0], sizes = [2, 256], strides = [1, 1]} : vector<16x256xf32> to vector<2x256xf32>
    %266 = vector.extract_strided_slice %260 {offsets = [2, 0], sizes = [2, 256], strides = [1, 1]} : vector<16x256xf32> to vector<2x256xf32>
    %cst_306 = arith.constant 7.500000e-01 : f32
    %267 = vector.broadcast %cst_306 : f32 to vector<2x256xf32>
    %268 = arith.mulf %267, %265 : vector<2x256xf32>
    %cst_307 = arith.constant 2.500000e-01 : f32
    %269 = vector.broadcast %cst_307 : f32 to vector<2x256xf32>
    %270 = arith.mulf %269, %266 : vector<2x256xf32>
    %271 = arith.addf %268, %270 : vector<2x256xf32>
    %c0_308 = arith.constant 0 : index
    %c0_309 = arith.constant 0 : index
    %c1_310 = arith.constant 1 : index
    %c0_311 = arith.constant 0 : index
    %272 = vector.load %arg5[%c0_308, %c0_309, %c1_310, %c0_311] : memref<1x2x16x256xf32, #tpu.memory_space<vmem>>, vector<1x2x1x256xf32>
    %273 = vector.shape_cast %272 : vector<1x2x1x256xf32> to vector<2x256xf32>
    %274 = vector.shape_cast %271 : vector<2x256xf32> to vector<1x2x1x256xf32>
    tpu.vector_store %arg5[%c0_308, %c0_309, %c1_310, %c0_311], %274 {strides = array<i32>} : memref<1x2x16x256xf32, #tpu.memory_space<vmem>>, vector<1x2x1x256xf32>,
    %275 = vector.extract_strided_slice %260 {offsets = [0, 0], sizes = [2, 256], strides = [1, 1]} : vector<16x256xf32> to vector<2x256xf32>
    %276 = vector.extract_strided_slice %260 {offsets = [2, 0], sizes = [2, 256], strides = [1, 1]} : vector<16x256xf32> to vector<2x256xf32>
    %cst_312 = arith.constant 2.500000e-01 : f32
    %277 = vector.broadcast %cst_312 : f32 to vector<2x256xf32>
    %278 = arith.mulf %277, %275 : vector<2x256xf32>
    %cst_313 = arith.constant 7.500000e-01 : f32
    %279 = vector.broadcast %cst_313 : f32 to vector<2x256xf32>
    %280 = arith.mulf %279, %276 : vector<2x256xf32>
    %281 = arith.addf %278, %280 : vector<2x256xf32>
    %c0_314 = arith.constant 0 : index
    %c0_315 = arith.constant 0 : index
    %c2_316 = arith.constant 2 : index
    %c0_317 = arith.constant 0 : index
    %282 = vector.load %arg5[%c0_314, %c0_315, %c2_316, %c0_317] : memref<1x2x16x256xf32, #tpu.memory_space<vmem>>, vector<1x2x1x256xf32>
    %283 = vector.shape_cast %282 : vector<1x2x1x256xf32> to vector<2x256xf32>
    %284 = vector.shape_cast %281 : vector<2x256xf32> to vector<1x2x1x256xf32>
    tpu.vector_store %arg5[%c0_314, %c0_315, %c2_316, %c0_317], %284 {strides = array<i32>} : memref<1x2x16x256xf32, #tpu.memory_space<vmem>>, vector<1x2x1x256xf32>,
    %285 = vector.extract_strided_slice %260 {offsets = [2, 0], sizes = [2, 256], strides = [1, 1]} : vector<16x256xf32> to vector<2x256xf32>
    %286 = vector.extract_strided_slice %260 {offsets = [4, 0], sizes = [2, 256], strides = [1, 1]} : vector<16x256xf32> to vector<2x256xf32>
    %cst_318 = arith.constant 7.500000e-01 : f32
    %287 = vector.broadcast %cst_318 : f32 to vector<2x256xf32>
    %288 = arith.mulf %287, %285 : vector<2x256xf32>
    %cst_319 = arith.constant 2.500000e-01 : f32
    %289 = vector.broadcast %cst_319 : f32 to vector<2x256xf32>
    %290 = arith.mulf %289, %286 : vector<2x256xf32>
    %291 = arith.addf %288, %290 : vector<2x256xf32>
    %c0_320 = arith.constant 0 : index
    %c0_321 = arith.constant 0 : index
    %c3_322 = arith.constant 3 : index
    %c0_323 = arith.constant 0 : index
    %292 = vector.load %arg5[%c0_320, %c0_321, %c3_322, %c0_323] : memref<1x2x16x256xf32, #tpu.memory_space<vmem>>, vector<1x2x1x256xf32>
    %293 = vector.shape_cast %292 : vector<1x2x1x256xf32> to vector<2x256xf32>
    %294 = vector.shape_cast %291 : vector<2x256xf32> to vector<1x2x1x256xf32>
    tpu.vector_store %arg5[%c0_320, %c0_321, %c3_322, %c0_323], %294 {strides = array<i32>} : memref<1x2x16x256xf32, #tpu.memory_space<vmem>>, vector<1x2x1x256xf32>,
    %295 = vector.extract_strided_slice %260 {offsets = [2, 0], sizes = [2, 256], strides = [1, 1]} : vector<16x256xf32> to vector<2x256xf32>
    %296 = vector.extract_strided_slice %260 {offsets = [4, 0], sizes = [2, 256], strides = [1, 1]} : vector<16x256xf32> to vector<2x256xf32>
    %cst_324 = arith.constant 2.500000e-01 : f32
    %297 = vector.broadcast %cst_324 : f32 to vector<2x256xf32>
    %298 = arith.mulf %297, %295 : vector<2x256xf32>
    %cst_325 = arith.constant 7.500000e-01 : f32
    %299 = vector.broadcast %cst_325 : f32 to vector<2x256xf32>
    %300 = arith.mulf %299, %296 : vector<2x256xf32>
    %301 = arith.addf %298, %300 : vector<2x256xf32>
    %c0_326 = arith.constant 0 : index
    %c0_327 = arith.constant 0 : index
    %c4_328 = arith.constant 4 : index
    %c0_329 = arith.constant 0 : index
    %302 = vector.load %arg5[%c0_326, %c0_327, %c4_328, %c0_329] : memref<1x2x16x256xf32, #tpu.memory_space<vmem>>, vector<1x2x1x256xf32>
    %303 = vector.shape_cast %302 : vector<1x2x1x256xf32> to vector<2x256xf32>
    %304 = vector.shape_cast %301 : vector<2x256xf32> to vector<1x2x1x256xf32>
    tpu.vector_store %arg5[%c0_326, %c0_327, %c4_328, %c0_329], %304 {strides = array<i32>} : memref<1x2x16x256xf32, #tpu.memory_space<vmem>>, vector<1x2x1x256xf32>,
    %305 = vector.extract_strided_slice %260 {offsets = [4, 0], sizes = [2, 256], strides = [1, 1]} : vector<16x256xf32> to vector<2x256xf32>
    %306 = vector.extract_strided_slice %260 {offsets = [6, 0], sizes = [2, 256], strides = [1, 1]} : vector<16x256xf32> to vector<2x256xf32>
    %cst_330 = arith.constant 7.500000e-01 : f32
    %307 = vector.broadcast %cst_330 : f32 to vector<2x256xf32>
    %308 = arith.mulf %307, %305 : vector<2x256xf32>
    %cst_331 = arith.constant 2.500000e-01 : f32
    %309 = vector.broadcast %cst_331 : f32 to vector<2x256xf32>
    %310 = arith.mulf %309, %306 : vector<2x256xf32>
    %311 = arith.addf %308, %310 : vector<2x256xf32>
    %c0_332 = arith.constant 0 : index
    %c0_333 = arith.constant 0 : index
    %c5_334 = arith.constant 5 : index
    %c0_335 = arith.constant 0 : index
    %312 = vector.load %arg5[%c0_332, %c0_333, %c5_334, %c0_335] : memref<1x2x16x256xf32, #tpu.memory_space<vmem>>, vector<1x2x1x256xf32>
    %313 = vector.shape_cast %312 : vector<1x2x1x256xf32> to vector<2x256xf32>
    %314 = vector.shape_cast %311 : vector<2x256xf32> to vector<1x2x1x256xf32>
    tpu.vector_store %arg5[%c0_332, %c0_333, %c5_334, %c0_335], %314 {strides = array<i32>} : memref<1x2x16x256xf32, #tpu.memory_space<vmem>>, vector<1x2x1x256xf32>,
    %315 = vector.extract_strided_slice %260 {offsets = [4, 0], sizes = [2, 256], strides = [1, 1]} : vector<16x256xf32> to vector<2x256xf32>
    %316 = vector.extract_strided_slice %260 {offsets = [6, 0], sizes = [2, 256], strides = [1, 1]} : vector<16x256xf32> to vector<2x256xf32>
    %cst_336 = arith.constant 2.500000e-01 : f32
    %317 = vector.broadcast %cst_336 : f32 to vector<2x256xf32>
    %318 = arith.mulf %317, %315 : vector<2x256xf32>
    %cst_337 = arith.constant 7.500000e-01 : f32
    %319 = vector.broadcast %cst_337 : f32 to vector<2x256xf32>
    %320 = arith.mulf %319, %316 : vector<2x256xf32>
    %321 = arith.addf %318, %320 : vector<2x256xf32>
    %c0_338 = arith.constant 0 : index
    %c0_339 = arith.constant 0 : index
    %c6_340 = arith.constant 6 : index
    %c0_341 = arith.constant 0 : index
    %322 = vector.load %arg5[%c0_338, %c0_339, %c6_340, %c0_341] : memref<1x2x16x256xf32, #tpu.memory_space<vmem>>, vector<1x2x1x256xf32>
    %323 = vector.shape_cast %322 : vector<1x2x1x256xf32> to vector<2x256xf32>
    %324 = vector.shape_cast %321 : vector<2x256xf32> to vector<1x2x1x256xf32>
    tpu.vector_store %arg5[%c0_338, %c0_339, %c6_340, %c0_341], %324 {strides = array<i32>} : memref<1x2x16x256xf32, #tpu.memory_space<vmem>>, vector<1x2x1x256xf32>,
    %325 = vector.extract_strided_slice %260 {offsets = [6, 0], sizes = [2, 256], strides = [1, 1]} : vector<16x256xf32> to vector<2x256xf32>
    %326 = vector.extract_strided_slice %260 {offsets = [8, 0], sizes = [2, 256], strides = [1, 1]} : vector<16x256xf32> to vector<2x256xf32>
    %cst_342 = arith.constant 7.500000e-01 : f32
    %327 = vector.broadcast %cst_342 : f32 to vector<2x256xf32>
    %328 = arith.mulf %327, %325 : vector<2x256xf32>
    %cst_343 = arith.constant 2.500000e-01 : f32
    %329 = vector.broadcast %cst_343 : f32 to vector<2x256xf32>
    %330 = arith.mulf %329, %326 : vector<2x256xf32>
    %331 = arith.addf %328, %330 : vector<2x256xf32>
    %c0_344 = arith.constant 0 : index
    %c0_345 = arith.constant 0 : index
    %c7_346 = arith.constant 7 : index
    %c0_347 = arith.constant 0 : index
    %332 = vector.load %arg5[%c0_344, %c0_345, %c7_346, %c0_347] : memref<1x2x16x256xf32, #tpu.memory_space<vmem>>, vector<1x2x1x256xf32>
    %333 = vector.shape_cast %332 : vector<1x2x1x256xf32> to vector<2x256xf32>
    %334 = vector.shape_cast %331 : vector<2x256xf32> to vector<1x2x1x256xf32>
    tpu.vector_store %arg5[%c0_344, %c0_345, %c7_346, %c0_347], %334 {strides = array<i32>} : memref<1x2x16x256xf32, #tpu.memory_space<vmem>>, vector<1x2x1x256xf32>,
    %335 = vector.extract_strided_slice %260 {offsets = [6, 0], sizes = [2, 256], strides = [1, 1]} : vector<16x256xf32> to vector<2x256xf32>
    %336 = vector.extract_strided_slice %260 {offsets = [8, 0], sizes = [2, 256], strides = [1, 1]} : vector<16x256xf32> to vector<2x256xf32>
    %cst_348 = arith.constant 2.500000e-01 : f32
    %337 = vector.broadcast %cst_348 : f32 to vector<2x256xf32>
    %338 = arith.mulf %337, %335 : vector<2x256xf32>
    %cst_349 = arith.constant 7.500000e-01 : f32
    %339 = vector.broadcast %cst_349 : f32 to vector<2x256xf32>
    %340 = arith.mulf %339, %336 : vector<2x256xf32>
    %341 = arith.addf %338, %340 : vector<2x256xf32>
    %c0_350 = arith.constant 0 : index
    %c0_351 = arith.constant 0 : index
    %c8_352 = arith.constant 8 : index
    %c0_353 = arith.constant 0 : index
    %342 = vector.load %arg5[%c0_350, %c0_351, %c8_352, %c0_353] : memref<1x2x16x256xf32, #tpu.memory_space<vmem>>, vector<1x2x1x256xf32>
    %343 = vector.shape_cast %342 : vector<1x2x1x256xf32> to vector<2x256xf32>
    %344 = vector.shape_cast %341 : vector<2x256xf32> to vector<1x2x1x256xf32>
    tpu.vector_store %arg5[%c0_350, %c0_351, %c8_352, %c0_353], %344 {strides = array<i32>} : memref<1x2x16x256xf32, #tpu.memory_space<vmem>>, vector<1x2x1x256xf32>,
    %345 = vector.extract_strided_slice %260 {offsets = [8, 0], sizes = [2, 256], strides = [1, 1]} : vector<16x256xf32> to vector<2x256xf32>
    %346 = vector.extract_strided_slice %260 {offsets = [10, 0], sizes = [2, 256], strides = [1, 1]} : vector<16x256xf32> to vector<2x256xf32>
    %cst_354 = arith.constant 7.500000e-01 : f32
    %347 = vector.broadcast %cst_354 : f32 to vector<2x256xf32>
    %348 = arith.mulf %347, %345 : vector<2x256xf32>
    %cst_355 = arith.constant 2.500000e-01 : f32
    %349 = vector.broadcast %cst_355 : f32 to vector<2x256xf32>
    %350 = arith.mulf %349, %346 : vector<2x256xf32>
    %351 = arith.addf %348, %350 : vector<2x256xf32>
    %c0_356 = arith.constant 0 : index
    %c0_357 = arith.constant 0 : index
    %c9_358 = arith.constant 9 : index
    %c0_359 = arith.constant 0 : index
    %352 = vector.load %arg5[%c0_356, %c0_357, %c9_358, %c0_359] : memref<1x2x16x256xf32, #tpu.memory_space<vmem>>, vector<1x2x1x256xf32>
    %353 = vector.shape_cast %352 : vector<1x2x1x256xf32> to vector<2x256xf32>
    %354 = vector.shape_cast %351 : vector<2x256xf32> to vector<1x2x1x256xf32>
    tpu.vector_store %arg5[%c0_356, %c0_357, %c9_358, %c0_359], %354 {strides = array<i32>} : memref<1x2x16x256xf32, #tpu.memory_space<vmem>>, vector<1x2x1x256xf32>,
    %355 = vector.extract_strided_slice %260 {offsets = [8, 0], sizes = [2, 256], strides = [1, 1]} : vector<16x256xf32> to vector<2x256xf32>
    %356 = vector.extract_strided_slice %260 {offsets = [10, 0], sizes = [2, 256], strides = [1, 1]} : vector<16x256xf32> to vector<2x256xf32>
    %cst_360 = arith.constant 2.500000e-01 : f32
    %357 = vector.broadcast %cst_360 : f32 to vector<2x256xf32>
    %358 = arith.mulf %357, %355 : vector<2x256xf32>
    %cst_361 = arith.constant 7.500000e-01 : f32
    %359 = vector.broadcast %cst_361 : f32 to vector<2x256xf32>
    %360 = arith.mulf %359, %356 : vector<2x256xf32>
    %361 = arith.addf %358, %360 : vector<2x256xf32>
    %c0_362 = arith.constant 0 : index
    %c0_363 = arith.constant 0 : index
    %c10_364 = arith.constant 10 : index
    %c0_365 = arith.constant 0 : index
    %362 = vector.load %arg5[%c0_362, %c0_363, %c10_364, %c0_365] : memref<1x2x16x256xf32, #tpu.memory_space<vmem>>, vector<1x2x1x256xf32>
    %363 = vector.shape_cast %362 : vector<1x2x1x256xf32> to vector<2x256xf32>
    %364 = vector.shape_cast %361 : vector<2x256xf32> to vector<1x2x1x256xf32>
    tpu.vector_store %arg5[%c0_362, %c0_363, %c10_364, %c0_365], %364 {strides = array<i32>} : memref<1x2x16x256xf32, #tpu.memory_space<vmem>>, vector<1x2x1x256xf32>,
    %365 = vector.extract_strided_slice %260 {offsets = [10, 0], sizes = [2, 256], strides = [1, 1]} : vector<16x256xf32> to vector<2x256xf32>
    %366 = vector.extract_strided_slice %260 {offsets = [12, 0], sizes = [2, 256], strides = [1, 1]} : vector<16x256xf32> to vector<2x256xf32>
    %cst_366 = arith.constant 7.500000e-01 : f32
    %367 = vector.broadcast %cst_366 : f32 to vector<2x256xf32>
    %368 = arith.mulf %367, %365 : vector<2x256xf32>
    %cst_367 = arith.constant 2.500000e-01 : f32
    %369 = vector.broadcast %cst_367 : f32 to vector<2x256xf32>
    %370 = arith.mulf %369, %366 : vector<2x256xf32>
    %371 = arith.addf %368, %370 : vector<2x256xf32>
    %c0_368 = arith.constant 0 : index
    %c0_369 = arith.constant 0 : index
    %c11_370 = arith.constant 11 : index
    %c0_371 = arith.constant 0 : index
    %372 = vector.load %arg5[%c0_368, %c0_369, %c11_370, %c0_371] : memref<1x2x16x256xf32, #tpu.memory_space<vmem>>, vector<1x2x1x256xf32>
    %373 = vector.shape_cast %372 : vector<1x2x1x256xf32> to vector<2x256xf32>
    %374 = vector.shape_cast %371 : vector<2x256xf32> to vector<1x2x1x256xf32>
    tpu.vector_store %arg5[%c0_368, %c0_369, %c11_370, %c0_371], %374 {strides = array<i32>} : memref<1x2x16x256xf32, #tpu.memory_space<vmem>>, vector<1x2x1x256xf32>,
    %375 = vector.extract_strided_slice %260 {offsets = [10, 0], sizes = [2, 256], strides = [1, 1]} : vector<16x256xf32> to vector<2x256xf32>
    %376 = vector.extract_strided_slice %260 {offsets = [12, 0], sizes = [2, 256], strides = [1, 1]} : vector<16x256xf32> to vector<2x256xf32>
    %cst_372 = arith.constant 2.500000e-01 : f32
    %377 = vector.broadcast %cst_372 : f32 to vector<2x256xf32>
    %378 = arith.mulf %377, %375 : vector<2x256xf32>
    %cst_373 = arith.constant 7.500000e-01 : f32
    %379 = vector.broadcast %cst_373 : f32 to vector<2x256xf32>
    %380 = arith.mulf %379, %376 : vector<2x256xf32>
    %381 = arith.addf %378, %380 : vector<2x256xf32>
    %c0_374 = arith.constant 0 : index
    %c0_375 = arith.constant 0 : index
    %c12_376 = arith.constant 12 : index
    %c0_377 = arith.constant 0 : index
    %382 = vector.load %arg5[%c0_374, %c0_375, %c12_376, %c0_377] : memref<1x2x16x256xf32, #tpu.memory_space<vmem>>, vector<1x2x1x256xf32>
    %383 = vector.shape_cast %382 : vector<1x2x1x256xf32> to vector<2x256xf32>
    %384 = vector.shape_cast %381 : vector<2x256xf32> to vector<1x2x1x256xf32>
    tpu.vector_store %arg5[%c0_374, %c0_375, %c12_376, %c0_377], %384 {strides = array<i32>} : memref<1x2x16x256xf32, #tpu.memory_space<vmem>>, vector<1x2x1x256xf32>,
    %385 = vector.extract_strided_slice %260 {offsets = [12, 0], sizes = [2, 256], strides = [1, 1]} : vector<16x256xf32> to vector<2x256xf32>
    %386 = vector.extract_strided_slice %260 {offsets = [14, 0], sizes = [2, 256], strides = [1, 1]} : vector<16x256xf32> to vector<2x256xf32>
    %cst_378 = arith.constant 7.500000e-01 : f32
    %387 = vector.broadcast %cst_378 : f32 to vector<2x256xf32>
    %388 = arith.mulf %387, %385 : vector<2x256xf32>
    %cst_379 = arith.constant 2.500000e-01 : f32
    %389 = vector.broadcast %cst_379 : f32 to vector<2x256xf32>
    %390 = arith.mulf %389, %386 : vector<2x256xf32>
    %391 = arith.addf %388, %390 : vector<2x256xf32>
    %c0_380 = arith.constant 0 : index
    %c0_381 = arith.constant 0 : index
    %c13_382 = arith.constant 13 : index
    %c0_383 = arith.constant 0 : index
    %392 = vector.load %arg5[%c0_380, %c0_381, %c13_382, %c0_383] : memref<1x2x16x256xf32, #tpu.memory_space<vmem>>, vector<1x2x1x256xf32>
    %393 = vector.shape_cast %392 : vector<1x2x1x256xf32> to vector<2x256xf32>
    %394 = vector.shape_cast %391 : vector<2x256xf32> to vector<1x2x1x256xf32>
    tpu.vector_store %arg5[%c0_380, %c0_381, %c13_382, %c0_383], %394 {strides = array<i32>} : memref<1x2x16x256xf32, #tpu.memory_space<vmem>>, vector<1x2x1x256xf32>,
    %395 = vector.extract_strided_slice %260 {offsets = [12, 0], sizes = [2, 256], strides = [1, 1]} : vector<16x256xf32> to vector<2x256xf32>
    %396 = vector.extract_strided_slice %260 {offsets = [14, 0], sizes = [2, 256], strides = [1, 1]} : vector<16x256xf32> to vector<2x256xf32>
    %cst_384 = arith.constant 2.500000e-01 : f32
    %397 = vector.broadcast %cst_384 : f32 to vector<2x256xf32>
    %398 = arith.mulf %397, %395 : vector<2x256xf32>
    %cst_385 = arith.constant 7.500000e-01 : f32
    %399 = vector.broadcast %cst_385 : f32 to vector<2x256xf32>
    %400 = arith.mulf %399, %396 : vector<2x256xf32>
    %401 = arith.addf %398, %400 : vector<2x256xf32>
    %c0_386 = arith.constant 0 : index
    %c0_387 = arith.constant 0 : index
    %c14_388 = arith.constant 14 : index
    %c0_389 = arith.constant 0 : index
    %402 = vector.load %arg5[%c0_386, %c0_387, %c14_388, %c0_389] : memref<1x2x16x256xf32, #tpu.memory_space<vmem>>, vector<1x2x1x256xf32>
    %403 = vector.shape_cast %402 : vector<1x2x1x256xf32> to vector<2x256xf32>
    %404 = vector.shape_cast %401 : vector<2x256xf32> to vector<1x2x1x256xf32>
    tpu.vector_store %arg5[%c0_386, %c0_387, %c14_388, %c0_389], %404 {strides = array<i32>} : memref<1x2x16x256xf32, #tpu.memory_space<vmem>>, vector<1x2x1x256xf32>,
    %405 = vector.extract_strided_slice %260 {offsets = [14, 0], sizes = [2, 256], strides = [1, 1]} : vector<16x256xf32> to vector<2x256xf32>
    %406 = vector.extract_strided_slice %260 {offsets = [14, 0], sizes = [2, 256], strides = [1, 1]} : vector<16x256xf32> to vector<2x256xf32>
    %cst_390 = arith.constant 7.500000e-01 : f32
    %407 = vector.broadcast %cst_390 : f32 to vector<2x256xf32>
    %408 = arith.mulf %407, %405 : vector<2x256xf32>
    %cst_391 = arith.constant 2.500000e-01 : f32
    %409 = vector.broadcast %cst_391 : f32 to vector<2x256xf32>
    %410 = arith.mulf %409, %406 : vector<2x256xf32>
    %411 = arith.addf %408, %410 : vector<2x256xf32>
    %c0_392 = arith.constant 0 : index
    %c0_393 = arith.constant 0 : index
    %c15_394 = arith.constant 15 : index
    %c0_395 = arith.constant 0 : index
    %412 = vector.load %arg5[%c0_392, %c0_393, %c15_394, %c0_395] : memref<1x2x16x256xf32, #tpu.memory_space<vmem>>, vector<1x2x1x256xf32>
    %413 = vector.shape_cast %412 : vector<1x2x1x256xf32> to vector<2x256xf32>
    %414 = vector.shape_cast %411 : vector<2x256xf32> to vector<1x2x1x256xf32>
    tpu.vector_store %arg5[%c0_392, %c0_393, %c15_394, %c0_395], %414 {strides = array<i32>} : memref<1x2x16x256xf32, #tpu.memory_space<vmem>>, vector<1x2x1x256xf32>,
    return
  }
  func.func @transform_0(%arg0: i32) -> (i32, i32, i32) {
    %c0_i32 = arith.constant 0 : i32
    %c0_i32_0 = arith.constant 0 : i32
    %c0_i32_1 = arith.constant 0 : i32
    return %arg0, %c0_i32, %c0_i32_0 : i32, i32, i32
  }
  func.func @transform_1(%arg0: i32) -> (i32, i32, i32) {
    %c0_i32 = arith.constant 0 : i32
    %c0_i32_0 = arith.constant 0 : i32
    %c0_i32_1 = arith.constant 0 : i32
    %c0_i32_2 = arith.constant 0 : i32
    return %c0_i32, %c0_i32_0, %c0_i32_1 : i32, i32, i32
  }
  func.func @transform_2(%arg0: i32) -> (i32, i32) {
    %c0_i32 = arith.constant 0 : i32
    %c0_i32_0 = arith.constant 0 : i32
    %c0_i32_1 = arith.constant 0 : i32
    return %c0_i32, %c0_i32_0 : i32, i32
  }
  func.func @transform_3(%arg0: i32) -> (i32, i32) {
    %c0_i32 = arith.constant 0 : i32
    %c0_i32_0 = arith.constant 0 : i32
    %c0_i32_1 = arith.constant 0 : i32
    return %c0_i32, %c0_i32_0 : i32, i32
  }
  func.func @transform_4(%arg0: i32) -> (i32, i32, i32, i32) {
    %c0_i32 = arith.constant 0 : i32
    %c0_i32_0 = arith.constant 0 : i32
    %c0_i32_1 = arith.constant 0 : i32
    %c0_i32_2 = arith.constant 0 : i32
    return %arg0, %c0_i32, %c0_i32_0, %c0_i32_1 : i32, i32, i32, i32
  }
}

</mosaic_0001>

<bundles_post_ra>
// kernel: tpu_custom_call.1
= control target key start
LH: loop header
LB: loop body
LE: loop exit
PB: predicated region body
PF: predicated region fallthrough
CT: control target
= control target key end

     0   :  { %9 = vsyncpa [#allocation5], 0  ;;  %s14015_s0 = inlined_call_operand.hbm [shape: f32[2,4,1100], index: 0, kind: input, shape index: {}]   ;;  %s14016_s1 = inlined_call_operand.vmem [shape: f32[27,2,4], index: 1, kind: input, shape index: {}]   ;;  %s14017_s2 = inlined_call_operand.vmem [shape: f32[2,1], index: 2, kind: input, shape index: {}]   ;;  %s14018_s3 = inlined_call_operand.hbm [shape: f32[100,256], index: 3, kind: input, shape index: {}]   ;;  %s14019_s4 = inlined_call_operand.hbm [shape: f32[2,2,16,256], index: 4, kind: output, shape index: {}]  }
   0x1   :  { %11 = vsyncpa [#allocation5 + $0x1], 0 }
   0x2   :  { %12 = vsyncpa [#allocation8], 0 }
   0x3   :  { %13 = vsyncpa [#allocation6], 0 }
   0x4   :  { %15 = vsyncpa [#allocation6 + $0x1], 0  ;;  %s12305_s15 = smov 0   ;;  %s12307_s16 = smov 0  }
   0x5   :  { %s12309_s17 = smov 0   ;;  %s12311_s18 = smov 0  }
   0x6 LB: > { %s12326_s19 = sadd.s32 4294967295, %s12236_s18   ;;  %s11442_s20 = sadd.s32 4294967294, %s12236_s18   ;;  %s12236_s18 = sphi %s12311_s18, %s14045_s18   ;;  %s12232_s17 = sphi %s12309_s17, %s14044_s17   ;;  %s12228_s16 = sphi %s12307_s16, %s14043_s16   ;;  %s12224_s15 = sphi %s12305_s15, %s14042_s15  }
   0x7   : > { %p41_p0 = scmp.ne.s32.totalorder %s12228_s16, %s12224_s15  ;;  %p14020_p1 = scmp.eq.s32.totalorder %s12326_s19, 0 }
   0x8   : > { %p134_p3 = scmp.eq.s32.totalorder %s11442_s20, 1  ;;  %p11443_p5 = scmp.ge.s32.totalorder %s12236_s18, 1 }
   0x9   : > { %p12335_p4 = por %p14020_p1, %p41_p0  ;;  %p141_p7 = scmp.lt.s32.totalorder %s12236_s18, 3 }
   0xa   : > { %p12340_p6 = por %p134_p3, %p41_p0  ;;  %s12238_s24 = smov [#allocation7]  }
   0xb   : > { %s14024_s21 = scalar_select %p12335_p4, 1, 0 }
   0xc   : > { %s14025_s22 = scalar_select %p12340_p6, 1, 0 }
   0xd   : > { %p12345_p8 = pnand %p11443_p5, %p141_p7  ;;  %s159_s25 = sshll.u32 %s12238_s24, 4  ;;  %s160_s25 = int_to_ptr.vmem [resolvable:$true] %s159_s25 }
   0xe   : > { %s12359_s27 = sadd.s32 1, %s12236_s18   ;;  %s28_s28 = sadd.s32 1, %s12232_s17 }
   0xf   : > { %s14026_s23 = scalar_select %p12345_p8, 1, 0 }
  0x10   : > { %p12014_p9 = pneg %p12345_p8  ;;  %s25_s29 = ssub.s32 %s12236_s18, %s12359_s27 }
  0x11   : > { %s12125_s30 = scalar_lea.vmem %s160_s25, 3328  ;;  %p12133_p5 = scmp.lt.s32.totalorder %s160_s25, %s160_s25 }
  0x12   : > { %p12354_p11 = pnand %p12014_p9, %p14020_p1  ;;  %p12126_p13 = scmp.ne.s32.totalorder %s160_s25, %s12125_s30 }
  0x13   : > { %p12134_p7 = scmp.lt.s32.totalorder %s12125_s30, %s12125_s30 }
  0x14   : > { %p12116_p12 = pneg %p12354_p11 }
  0x15   : > { %p12135_p10 = por %p12134_p7, %p12133_p5 }
  0x16   : > { %p12128_p0 = pnand %p12126_p13, %p12116_p12 }
  0x18   : > { %p12129_p3 = pneg %p12128_p0 }
  0x1a   : > { %p12136_p2 = pnand %p12135_p10, %p12129_p3 }
  0x1c   : > { %12139 = shalt.err (!%p12136_p2)
}
  0x1d   : > { %s12239_s5 = smov 256   ;;  %s12240_s6 = smov 16  }
  0x1e   : > { %12017 = dma.hbm_to_vmem [thread:$0]  (!%p12354_p11), %s14018_s3, 3328, %s160_s25, [#allocation8], %s12239_s5, %s12239_s5, %s12240_s6  }
  0x1f   : > { %p26_p9 = scmp.eq.s32.totalorder %s25_s29, 0  ;;  %p35_p12 = scmp.ne.s32.totalorder %s12232_s17, %s12228_s16 }
  0x20   : > { %p36_p10 = scmp.eq.s32.totalorder %s12236_s18, 0  ;;  %p12027_p2 = scmp.lt.s32.totalorder %s12236_s18, 2 }
  0x21   : > { %s12376_s9 = scalar_select %p26_p9, %s12232_s17, %s28_s28  }
  0x22   : > { %p37_p13 = por %p36_p10, %p35_p12  ;;  %p14028_p0 = scmp.eq.s32.totalorder %s12326_s19, 1 }
  0x23   : > { %s173_s11 = sand.u32 1, %s12232_s17   ;;  %s12004_s12 = smul.u32 576, %s12236_s18 }
  0x24   : > { %p12380_p3 = por %p14028_p0, %p35_p12  ;;  %s12003_s13 = smul.u32 36, %s173_s11 }
  0x25   : > { %p12386_p5 = pnand %p12027_p2, %p37_p13  ;;  %s12393_s25 = scalar_lea.hbm %s14015_s0, %s12004_s12 }
  0x26   : > { %s14029_s10 = scalar_select %p12380_p3, 1, 0 }
  0x27   : > { %s177_s26 = scalar_lea.vmem [#allocation4], %s12003_s13  ;;  %s174_s29 = scalar_lea.sflag [#allocation5], %s173_s11 }
  0x28   : > { %s185_s28 = sshll.u32 %s177_s26, 4  ;;  %s12140_s30 = scalar_lea.hbm %s12393_s25, 576  ;;  %s186_s28 = int_to_ptr.vmem [resolvable:$true] %s185_s28 }
  0x29   : > { %p12141_p11 = scmp.ne.s32.totalorder %s12393_s25, %s12140_s30  ;;  %p12142_p7 = pneg %p12386_p5 }
  0x2a   : > { %s12145_s7 = scalar_lea.hbm %s14015_s0, 1152  ;;  %p12146_p10 = scmp.lt.s32.totalorder %s12393_s25, %s14015_s0 }
  0x2b   : > { %p12143_p9 = pnand %p12142_p7, %p12141_p11  ;;  %p12147_p2 = scmp.lt.s32.totalorder %s12145_s7, %s12140_s30 }
  0x2d   : > { %p12144_p12 = pneg %p12143_p9  ;;  %p12148_p13 = por %p12147_p2, %p12146_p10 }
  0x2f   : > { %p12149_p0 = pnand %p12148_p13, %p12144_p12 }
  0x31   : > { %12152 = shalt.err (!%p12149_p0)
}
  0x32   : > { %s12153_s13 = scalar_lea.vmem %s186_s28, 576  ;;  %s12241_s11 = smov [#allocation4]  }
  0x33   : > { %p12154_p1 = scmp.ne.s32.totalorder %s186_s28, %s12153_s13  ;;  %s12158_s20 = sshll.u32 %s12241_s11, 4  ;;  %s12159_s20 = int_to_ptr.vmem [resolvable:$false] %s12158_s20 }
  0x34   : > { %s12160_s24 = scalar_lea.vmem %s12159_s20, 1152  ;;  %p12161_p11 = scmp.lt.s32.totalorder %s186_s28, %s12159_s20 }
  0x35   : > { %p12156_p6 = pnand %p12154_p1, %p12142_p7  ;;  %p12162_p9 = scmp.lt.s32.totalorder %s12160_s24, %s12153_s13 }
  0x37   : > { %p12157_p3 = pneg %p12156_p6  ;;  %p12163_p4 = por %p12162_p9, %p12161_p11 }
  0x39   : > { %p12164_p8 = pnand %p12163_p4, %p12157_p3 }
  0x3b   : > { %12167 = shalt.err (!%p12164_p8)
}
  0x3c   : > { %12021 = dma.hbm_to_vmem [thread:$0]  (!%p12386_p5), %s12393_s25, 576, %s186_s28, %s174_s29  }
  0x3d   : > { %p14031_p12 = scmp.ne.s32.totalorder %s14026_s23, 0 }
  0x3e   : > { %s12412_s26 = sand.u32 (!%p14031_p12), 1, %s12228_s16   ;;  %p14032_p1 = scmp.ne.s32.totalorder (!%p14031_p12), %s14024_s21, 0 }
  0x3f   : > { %194 = sbr.rel (%p14031_p12) target bundleno = 1164 (0x48c), region = 36  ;;  %s197_s5 = scalar_lea.sflag (!%p14031_p12), [#allocation5], %s12412_s26 }
  0x40   : > { %s12005_s30 = smul.u32 (!%p14031_p12), 36, %s12412_s26 }
  0x42   : > { %s12416_s6 = scalar_lea.vmem (!%p14031_p12), [#allocation4], %s12005_s30 }
  0x44   : > { %12211 = dma.done.wait (%p14032_p1), %s197_s5, 576  }
  0x45   : > { %12213 = vsyncadd (%p14032_p1), %s197_s5, 4294966720  ;;  %p14033_p4 = scmp.eq.s32.totalorder %s12326_s19, 0 }
  0x47   : > { %12215 = dma.done.wait (%p14033_p4), [#allocation8], 3328   ;;  %p14034_p6 = pmov %p14033_p4 }
  0x48   : > { %v12242_v0 = vmov 0.0   ;;  %v12429_v1 = vld [vmem:[%s12416_s6 + $0x8] sm:$0xff]  ;;  %v12432_v2 = vld [vmem:[%s12416_s6] sm:$0xff]  ;;  %vm254_vm0 = vcmask 1043456   ;;  %s12243_s21 = smov 127   ;;  %v12445_v5 = vld [vmem:[%s12416_s6 + $0x10] sm:$0xff] }
  0x49   : > { %12217 = vsyncadd (%p14034_p6), [#allocation8], 4294963968  ;;  %333 = vmatprep.mubr.f32.mxu1 %v12242_v0  ;;  %1097 = vmatprep.mubr.f32.mxu0 %v12242_v0  ;;  %v12437_v3 = vcombine.high %v12429_v1, %v12429_v1  ;;  %v12442_v4 = vcombine.high %v12432_v2, %v12432_v2  ;;  %vm250_vm1 = vcmask 31744   ;;  %v242_v6 = vld [vmem:[%s14016_s1] sm:$0x3]  ;;  %v12456_v7 = vcombine.high %v12445_v5, %v12445_v5  ;;  %s12244_s25 = smov 126  }
  0x4a   : > { %617 = vrot.lane.b32.xlu0 %v12429_v1, %s12243_s21  ;;  %613 = vrot.lane.b32.xlu1 %v12432_v2, %s12243_s21  ;;  %v601_v8 = vld [vmem:[%s12416_s6 + $0x18] sm:$0xf]  ;;  %vm12245_vm2 = vmmov 0   ;;  %s12246_s28 = smov 118   ;;  %s12247_s29 = smov 117   ;;  %vm627_vm3 = vcmask 1039360  }
  0x4b   : > { %11450 = vmatprep.subr.msk.mxu1 %vm254_vm0, %v12442_v4  ;;  %v239_v9 = vld [vmem:[%s12416_s6 + $0x18] sm:$0xf]  ;;  %s12248_s7 = smov 116   ;;  %s12249_s8 = smov 108   ;;  %v11461_v27 = vld [vmem:[%s14016_s1 + $0x2] sm:$0x3] }
  0x4c   : > { %11451 = vmatpush1.msk.msra.mxu1 %vm254_vm0, %v12432_v2  ;;  %v983_v10 = vld [vmem:[%s12416_s6 + $0x18] sm:$0xf]  ;;  %s12250_s12 = smov 107   ;;  %s12251_s13 = smov 106   ;;  %vm1009_vm4 = vcmask 1031168   ;;  %vm1391_vm5 = vcmask 965632  }
  0x4d   : > { %11452 = vmatmul.mubr.msk.f32.vlgmr.msra.gmra.mxu1 %vm250_vm1, %v242_v6  ;;  %11453 = vmatprep.subr.msk.mxu1 %vm254_vm0, %v12437_v3  ;;  %v1365_v11 = vld [vmem:[%s12416_s6 + $0x18] sm:$0xf]  ;;  %s12252_s11 = smov 28   ;;  %s12253_s30 = smov 27   ;;  %v11473_v41 = vld [vmem:[%s14016_s1 + $0x4] sm:$0x3] }
  0x4e   : > { %621 = vrot.lane.b32.xlu0 %v12445_v5, %s12243_s21  ;;  %619 = vrot.lane.b32.xlu1 %v12437_v3, %s12243_s21  ;;  %v1747_v12 = vld [vmem:[%s12416_s6 + $0x18] sm:$0xf]  ;;  %s12254_s23 = smov 26   ;;  %v11485_v54 = vld [vmem:[%s14016_s1 + $0x6] sm:$0x3]  ;;  %vm1773_vm6 = vcmask 957440  }
  0x4f   : > { %11454 = vmatpush1.msk.msra.mxu1 %vm254_vm0, %v12429_v1  ;;  %404 = vmatprep.mubr.f32.mxu1 %v12242_v0  ;;  %v2129_v13 = vld [vmem:[%s12416_s6 + $0x18] sm:$0xf]  ;;  %vm2155_vm7 = vcmask 949248   ;;  %vm2537_vm8 = vcmask 883712   ;;  %vm2919_vm9 = vcmask 875520   ;;  %vm3301_vm10 = vcmask 867328  }
  0x50   : > { %11456 = vmatprep.subr.msk.mxu1 %vm254_vm0, %v12456_v7  ;;  %v2511_v14 = vld [vmem:[%s12416_s6 + $0x18] sm:$0xf]  ;;  %vm3686_vm11 = vcmask 228352   ;;  %vm4072_vm12 = vcmask 220160   ;;  %s12261_s20 = smov 56   ;;  %vm4458_vm13 = vcmask 211968  }
  0x51   : > { %11455 = vmatmul.mubr.msk.f32.vlgmr.msra.gmra.mxu1 %vm250_vm1, %v242_v6  ;;  %v2893_v15 = vld [vmem:[%s12416_s6 + $0x18] sm:$0xf]  ;;  %vm4844_vm14 = vcmask 146432   ;;  %vm230_vm15 = vcmask 1041408   ;;  %s12267_s24 = smov 44   ;;  %s11346_s5 = scalar_lea.sflag [#allocation6], %s12412_s26 }
  0x52   : > { %623 = vrot.lane.b32.xlu1 %v12456_v7, %s12243_s21  ;;  %615 = vrot.lane.b32.xlu0 %v12442_v4, %s12243_s21  ;;  %v3275_v16 = vld [vmem:[%s12416_s6 + $0x18] sm:$0xf]  ;;  %p14039_p3 = scmp.ne.s32.totalorder %s14029_s10, 0 }
  0x53   : > { %11457 = vmatpush1.msk.msra.mxu1 %vm254_vm0, %v12445_v5  ;;  %475 = vmatprep.mubr.f32.mxu1 %v12242_v0  ;;  %v12541_v19 = vld [vmem:[%s12416_s6 + $0x18] sm:$0xff] }
  0x54   : > { %11868 = vmatprep.subr.mxu1 %v12242_v0  ;;  %v12549_v22 = vcombine.high %v12541_v19, %v12541_v19 }
  0x55   : > { %11458 = vmatmul.mubr.msk.f32.vlgmr.msra.gmra.mxu1 %vm250_vm1, %v242_v6 }
  0x56   : > { %997 = vrot.lane.b32.xlu1 %v12442_v4, %s12244_s25  ;;  %625 = vrot.lane.b32.xlu0 %v601_v8, %s12243_s21  ;;  %s12262_s21 = smov 55  }
  0x57   : > { %11869 = vmatpush3.msk.msra.mxu1 %vm254_vm0, %v239_v9  ;;  %11870 = vmatprep.mubr.msk.f32.mxu1 %vm12245_vm2, %v12242_v0 }
  0x59   : > { %11871 = vmatmul.mubr.msk.f32.vlgmr.msra.gmra.mxu1 %vm250_vm1, %v242_v6 }
  0x5a   : > { %1001 = vrot.lane.b32.xlu1 %v12437_v3, %s12244_s25  ;;  %999 = vrot.lane.b32.xlu0 %v12429_v1, %s12244_s25 }
  0x5b   : > { %715 = vmatprep.mubr.f32.mxu1 %v12242_v0 }
  0x5e   : > { %995 = vrot.lane.b32.xlu1 %v12432_v2, %s12244_s25  ;;  %1003 = vrot.lane.b32.xlu0 %v12445_v5, %s12244_s25 }
  0x62   : > { %1007 = vrot.lane.b32.xlu1 %v983_v10, %s12244_s25  ;;  %1005 = vrot.lane.b32.xlu0 %v12456_v7, %s12244_s25  ;;  %s12264_s25 = smov 54  }
  0x66   : > { %1381 = vrot.lane.b32.xlu1 %v12429_v1, %s12246_s28  ;;  %1379 = vrot.lane.b32.xlu0 %v12442_v4, %s12246_s28 }
  0x6a   : > { %1385 = vrot.lane.b32.xlu1 %v12445_v5, %s12246_s28  ;;  %1383 = vrot.lane.b32.xlu0 %v12437_v3, %s12246_s28 }
  0x6e   : > { %1387 = vrot.lane.b32.xlu1 %v12456_v7, %s12246_s28  ;;  %1377 = vrot.lane.b32.xlu0 %v12432_v2, %s12246_s28 }
  0x72   : > { %1761 = vrot.lane.b32.xlu1 %v12442_v4, %s12247_s29  ;;  %1389 = vrot.lane.b32.xlu0 %v1365_v11, %s12246_s28  ;;  %s12255_s28 = smov 18  }
  0x76   : > { %1765 = vrot.lane.b32.xlu1 %v12437_v3, %s12247_s29  ;;  %1763 = vrot.lane.b32.xlu0 %v12429_v1, %s12247_s29 }
  0x7a   : > { %1759 = vrot.lane.b32.xlu1 %v12432_v2, %s12247_s29  ;;  %1767 = vrot.lane.b32.xlu0 %v12445_v5, %s12247_s29 }
  0x7e   : > { %1771 = vrot.lane.b32.xlu1 %v1747_v12, %s12247_s29  ;;  %1769 = vrot.lane.b32.xlu0 %v12456_v7, %s12247_s29  ;;  %v11497_v12 = vld [vmem:[%s14016_s1 + $0x8] sm:$0x3]  ;;  %s12276_s29 = smov 112  }
  0x82   : > { %2145 = vrot.lane.b32.xlu1 %v12429_v1, %s12248_s7  ;;  %2143 = vrot.lane.b32.xlu0 %v12442_v4, %s12248_s7 }
  0x86   : > { %2149 = vrot.lane.b32.xlu1 %v12445_v5, %s12248_s7  ;;  %2147 = vrot.lane.b32.xlu0 %v12437_v3, %s12248_s7 }
  0x8a   : > { %2151 = vrot.lane.b32.xlu1 %v12456_v7, %s12248_s7  ;;  %2141 = vrot.lane.b32.xlu0 %v12432_v2, %s12248_s7 }
  0x8e   : > { %2525 = vrot.lane.b32.xlu1 %v12442_v4, %s12249_s8  ;;  %2153 = vrot.lane.b32.xlu0 %v2129_v13, %s12248_s7  ;;  %s11449_s7 = sshll.u32 %s12412_s26, 6 }
  0x92   : > { %2529 = vrot.lane.b32.xlu1 %v12437_v3, %s12249_s8  ;;  %2527 = vrot.lane.b32.xlu0 %v12429_v1, %s12249_s8 }
  0x96   : > { %2523 = vrot.lane.b32.xlu1 %v12432_v2, %s12249_s8  ;;  %2531 = vrot.lane.b32.xlu0 %v12445_v5, %s12249_s8 }
  0x9a   : > { %2535 = vrot.lane.b32.xlu1 %v2511_v14, %s12249_s8  ;;  %2533 = vrot.lane.b32.xlu0 %v12456_v7, %s12249_s8  ;;  %s12260_s8 = smov 6  }
  0x9e   : > { %2909 = vrot.lane.b32.xlu1 %v12429_v1, %s12250_s12  ;;  %2907 = vrot.lane.b32.xlu0 %v12442_v4, %s12250_s12 }
  0xa2   : > { %2913 = vrot.lane.b32.xlu1 %v12445_v5, %s12250_s12  ;;  %2911 = vrot.lane.b32.xlu0 %v12437_v3, %s12250_s12 }
  0xa6   : > { %2915 = vrot.lane.b32.xlu1 %v12456_v7, %s12250_s12  ;;  %2905 = vrot.lane.b32.xlu0 %v12432_v2, %s12250_s12 }
  0xaa   : > { %3289 = vrot.lane.b32.xlu1 %v12442_v4, %s12251_s13  ;;  %2917 = vrot.lane.b32.xlu0 %v2893_v15, %s12250_s12  ;;  %s11813_s12 = sshll.u32 %s12326_s19, 10 }
  0xae   : > { %3293 = vrot.lane.b32.xlu1 %v12437_v3, %s12251_s13  ;;  %3291 = vrot.lane.b32.xlu0 %v12429_v1, %s12251_s13 }
  0xb2   : > { %3287 = vrot.lane.b32.xlu1 %v12432_v2, %s12251_s13  ;;  %3295 = vrot.lane.b32.xlu0 %v12445_v5, %s12251_s13 }
  0xb6   : > { %3299 = vrot.lane.b32.xlu1 %v3275_v16, %s12251_s13  ;;  %3297 = vrot.lane.b32.xlu0 %v12456_v7, %s12251_s13  ;;  %s12256_s13 = smov 17  }
  0xba   : > { %3674 = vrot.lane.b32.xlu1 %v12429_v1, %s12252_s11  ;;  %3672 = vrot.lane.b32.xlu0 %v12442_v4, %s12252_s11 }
  0xbc   : > { %v618_v17 = vpop.permute.xlu0 %617  ;;  %v614_v18 = vpop.permute.xlu1 %613 }
  0xbe   : > { %3678 = vrot.lane.b32.xlu1 %v12445_v5, %s12252_s11  ;;  %3676 = vrot.lane.b32.xlu0 %v12437_v3, %s12252_s11 }
  0xc0   : > { %v622_v20 = vpop.permute.xlu0 %621  ;;  %v620_v21 = vpop.permute.xlu1 %619 }
  0xc1   : > { %v631_v30 = vsel %vm627_vm3, %v620_v21, %v622_v20  ;;  %v630_v31 = vsel %vm627_vm3, %v618_v17, %v620_v21 }
  0xc2   : > { %3680 = vrot.lane.b32.xlu1 %v12456_v7, %s12252_s11  ;;  %3670 = vrot.lane.b32.xlu0 %v12432_v2, %s12252_s11 }
  0xc4   : > { %v624_v23 = vpop.permute.xlu1 %623  ;;  %v616_v24 = vpop.permute.xlu0 %615 }
  0xc5   : > { %v628_v25 = vsel %vm627_vm3, %v614_v18, %v616_v24  ;;  %v629_v26 = vsel %vm627_vm3, %v616_v24, %v618_v17  ;;  %v632_v35 = vsel %vm627_vm3, %v622_v20, %v624_v23 }
  0xc6   : > { %3684 = vrot.lane.b32.xlu1 %v12549_v22, %s12252_s11  ;;  %3682 = vrot.lane.b32.xlu0 %v12541_v19, %s12252_s11 }
  0xc7   : > { %11462 = vmatprep.subr.msk.mxu1 %vm254_vm0, %v629_v26 }
  0xc8   : > { %11463 = vmatpush1.msk.msra.mxu1 %vm254_vm0, %v628_v25  ;;  %v998_v28 = vpop.permute.xlu1 %997  ;;  %v626_v29 = vpop.permute.xlu0 %625 }
  0xc9   : > { %11464 = vmatmul.mubr.msk.f32.vlgmr.msra.gmra.mxu1 %vm250_vm1, %v11461_v27  ;;  %11465 = vmatprep.subr.msk.mxu1 %vm254_vm0, %v631_v30  ;;  %v633_v32 = vsel %vm627_vm3, %v624_v23, %v626_v29  ;;  %vm231_vm3 = vcmask 1043458  }
  0xca   : > { %11466 = vmatpush1.msk.msra.mxu1 %vm254_vm0, %v630_v31  ;;  %4060 = vrot.lane.b32.xlu1 %v12429_v1, %s12253_s30 }
  0xcb   : > { %4058 = vrot.lane.b32.xlu0 %v12442_v4, %s12253_s30  ;;  %11468 = vmatprep.subr.msk.mxu1 %vm254_vm0, %v633_v32 }
  0xcc   : > { %786 = vmatprep.mubr.f32.mxu1 %v12242_v0  ;;  %v1002_v33 = vpop.permute.xlu1 %1001  ;;  %v1000_v34 = vpop.permute.xlu0 %999 }
  0xcd   : > { %11467 = vmatmul.mubr.msk.f32.vlgmr.msra.gmra.mxu1 %vm250_vm1, %v11461_v27  ;;  %v1011_v36 = vsel %vm1009_vm4, %v998_v28, %v1000_v34  ;;  %v1012_v44 = vsel %vm1009_vm4, %v1000_v34, %v1002_v33 }
  0xce   : > { %11469 = vmatpush1.msk.msra.mxu1 %vm254_vm0, %v632_v35  ;;  %4064 = vrot.lane.b32.xlu1 %v12445_v5, %s12253_s30 }
  0xcf   : > { %4062 = vrot.lane.b32.xlu0 %v12437_v3, %s12253_s30  ;;  %11474 = vmatprep.subr.msk.mxu0 %vm254_vm0, %v1011_v36 }
  0xd0   : > { %857 = vmatprep.mubr.f32.mxu1 %v12242_v0  ;;  %11873 = vmatprep.subr.mxu1 %v12242_v0  ;;  %v996_v37 = vpop.permute.xlu1 %995  ;;  %v1004_v38 = vpop.permute.xlu0 %1003 }
  0xd1   : > { %11470 = vmatmul.mubr.msk.f32.vlgmr.msra.gmra.mxu1 %vm250_vm1, %v11461_v27  ;;  %v1010_v39 = vsel %vm1009_vm4, %v996_v37, %v998_v28  ;;  %v1013_v40 = vsel %vm1009_vm4, %v1002_v33, %v1004_v38 }
  0xd2   : > { %11874 = vmatpush3.msk.msra.mxu1 %vm254_vm0, %v626_v29  ;;  %4066 = vrot.lane.b32.xlu1 %v12456_v7, %s12253_s30 }
  0xd3   : > { %4056 = vrot.lane.b32.xlu0 %v12432_v2, %s12253_s30  ;;  %11475 = vmatpush1.msk.msra.mxu0 %vm254_vm0, %v1010_v39 }
  0xd4   : > { %11477 = vmatprep.subr.msk.mxu1 %vm254_vm0, %v1013_v40  ;;  %11875 = vmatprep.mubr.msk.f32.mxu1 %vm12245_vm2, %v12242_v0  ;;  %v1008_v42 = vpop.permute.xlu1 %1007  ;;  %v1006_v43 = vpop.permute.xlu0 %1005 }
  0xd5   : > { %v1014_v45 = vsel %vm1009_vm4, %v1004_v38, %v1006_v43  ;;  %11876 = vmatmul.mubr.msk.f32.vlgmr.msra.gmra.mxu1 %vm250_vm1, %v11461_v27  ;;  %v1015_v46 = vsel %vm1009_vm4, %v1006_v43, %v1008_v42  ;;  %11476 = vmatmul.mubr.msk.f32.vlgmr.msra.gmra.mxu0 %vm250_vm1, %v11473_v41  ;;  %v11509_v27 = vld [vmem:[%s14016_s1 + $0xa] sm:$0x3]  ;;  %vm5230_vm4 = vcmask 138240  }
  0xd6   : > { %11478 = vmatpush1.msk.msra.mxu1 %vm254_vm0, %v1012_v44  ;;  %4070 = vrot.lane.b32.xlu1 %v12549_v22, %s12253_s30 }
  0xd7   : > { %4068 = vrot.lane.b32.xlu0 %v12541_v19, %s12253_s30  ;;  %11480 = vmatprep.subr.msk.mxu0 %vm254_vm0, %v1015_v46  ;;  %s12257_s30 = smov 16  }
  0xd8   : > { %1168 = vmatprep.mubr.f32.mxu1 %v12242_v0  ;;  %11481 = vmatpush1.msk.msra.mxu0 %vm254_vm0, %v1014_v45  ;;  %v1382_v47 = vpop.permute.xlu1 %1381  ;;  %v1380_v48 = vpop.permute.xlu0 %1379 }
  0xd9   : > { %11878 = vmatprep.subr.mxu1 %v12242_v0  ;;  %11479 = vmatmul.mubr.msk.f32.vlgmr.msra.gmra.mxu1 %vm250_vm1, %v11473_v41  ;;  %v1393_v49 = vsel %vm1391_vm5, %v1380_v48, %v1382_v47 }
  0xda   : > { %11879 = vmatpush3.msk.msra.mxu1 %vm254_vm0, %v1008_v42  ;;  %4446 = vrot.lane.b32.xlu1 %v12429_v1, %s12254_s23  ;;  %v11521_v42 = vld [vmem:[%s14016_s1 + $0xc] sm:$0x3] }
  0xdb   : > { %4444 = vrot.lane.b32.xlu0 %v12442_v4, %s12254_s23  ;;  %11486 = vmatprep.subr.msk.mxu0 %vm254_vm0, %v1393_v49 }
  0xdc   : > { %v1386_v50 = vpop.permute.xlu1 %1385  ;;  %v1384_v51 = vpop.permute.xlu0 %1383  ;;  %11880 = vmatprep.mubr.msk.f32.mxu1 %vm12245_vm2, %v12242_v0  ;;  %1239 = vmatprep.mubr.f32.mxu0 %v12242_v0 }
  0xdd   : > { %v1394_v52 = vsel %vm1391_vm5, %v1382_v47, %v1384_v51  ;;  %v1395_v53 = vsel %vm1391_vm5, %v1384_v51, %v1386_v50  ;;  %11881 = vmatmul.mubr.msk.f32.vlgmr.msra.gmra.mxu1 %vm250_vm1, %v11473_v41  ;;  %11482 = vmatmul.mubr.msk.f32.vlgmr.msra.gmra.mxu0 %vm250_vm1, %v11473_v41 }
  0xde   : > { %4450 = vrot.lane.b32.xlu1 %v12445_v5, %s12254_s23  ;;  %11489 = vmatprep.subr.msk.mxu1 %vm254_vm0, %v1395_v53 }
  0xdf   : > { %4448 = vrot.lane.b32.xlu0 %v12437_v3, %s12254_s23  ;;  %11490 = vmatpush1.msk.msra.mxu1 %vm254_vm0, %v1394_v52 }
  0xe0   : > { %v1388_v55 = vpop.permute.xlu1 %1387  ;;  %v1378_v56 = vpop.permute.xlu0 %1377  ;;  %1550 = vmatprep.mubr.f32.mxu1 %v12242_v0  ;;  %11883 = vmatprep.subr.mxu1 %v12242_v0 }
  0xe1   : > { %v1392_v57 = vsel %vm1391_vm5, %v1378_v56, %v1380_v48  ;;  %11491 = vmatmul.mubr.msk.f32.vlgmr.msra.gmra.mxu1 %vm250_vm1, %v11485_v54  ;;  %1479 = vmatprep.mubr.f32.mxu0 %v12242_v0  ;;  %v1396_v61 = vsel %vm1391_vm5, %v1386_v50, %v1388_v55 }
  0xe2   : > { %4452 = vrot.lane.b32.xlu1 %v12456_v7, %s12254_s23  ;;  %11487 = vmatpush1.msk.msra.mxu0 %vm254_vm0, %v1392_v57 }
  0xe3   : > { %4442 = vrot.lane.b32.xlu0 %v12432_v2, %s12254_s23  ;;  %11488 = vmatmul.mubr.msk.f32.vlgmr.msra.gmra.mxu0 %vm250_vm1, %v11485_v54 }
  0xe4   : > { %v1762_v58 = vpop.permute.xlu1 %1761  ;;  %v1390_v59 = vpop.permute.xlu0 %1389  ;;  %1621 = vmatprep.mubr.f32.mxu0 %v12242_v0  ;;  %11885 = vmatprep.mubr.msk.f32.mxu1 %vm12245_vm2, %v12242_v0 }
  0xe5   : > { %11884 = vmatpush3.msk.msra.mxu1 %vm254_vm0, %v1390_v59  ;;  %v1397_v60 = vsel %vm1391_vm5, %v1388_v55, %v1390_v59  ;;  %v11533_v55 = vld [vmem:[%s14016_s1 + $0xe] sm:$0x3]  ;;  %vm232_vm5 = vmor %vm231_vm3, %vm230_vm15  ;;  %vm7921_vm15 = vcmask 441344   ;;  %vm8303_vm3 = vcmask 375808  }
  0xe6   : > { %4456 = vrot.lane.b32.xlu1 %v12549_v22, %s12254_s23  ;;  %11492 = vmatprep.subr.msk.mxu0 %vm254_vm0, %v1397_v60 }
  0xe7   : > { %4454 = vrot.lane.b32.xlu0 %v12541_v19, %s12254_s23  ;;  %11493 = vmatpush1.msk.msra.mxu0 %vm254_vm0, %v1396_v61  ;;  %s12258_s23 = smov 8  }
  0xe8   : > { %v1766_v62 = vpop.permute.xlu1 %1765  ;;  %v1764_v63 = vpop.permute.xlu0 %1763  ;;  %11494 = vmatmul.mubr.msk.f32.vlgmr.msra.gmra.mxu0 %vm250_vm1, %v11485_v54  ;;  %11886 = vmatmul.mubr.msk.f32.vlgmr.msra.gmra.mxu1 %vm250_vm1, %v11485_v54 }
  0xe9   : > { %v1775_v6 = vsel %vm1773_vm6, %v1762_v58, %v1764_v63  ;;  %1861 = vmatprep.mubr.f32.mxu0 %v12242_v0  ;;  %1932 = vmatprep.mubr.f32.mxu1 %v12242_v0  ;;  %v1776_v13 = vsel %vm1773_vm6, %v1764_v63, %v1766_v62 }
  0xea   : > { %4832 = vrot.lane.b32.xlu1 %v12429_v1, %s12255_s28  ;;  %11498 = vmatprep.subr.msk.mxu0 %vm254_vm0, %v1775_v6 }
  0xeb   : > { %4830 = vrot.lane.b32.xlu0 %v12442_v4, %s12255_s28 }
  0xec   : > { %v1760_v8 = vpop.permute.xlu1 %1759  ;;  %v1768_v9 = vpop.permute.xlu0 %1767 }
  0xed   : > { %v1774_v10 = vsel %vm1773_vm6, %v1760_v8, %v1762_v58  ;;  %v1777_v11 = vsel %vm1773_vm6, %v1766_v62, %v1768_v9 }
  0xee   : > { %4836 = vrot.lane.b32.xlu1 %v12445_v5, %s12255_s28  ;;  %11499 = vmatpush1.msk.msra.mxu0 %vm254_vm0, %v1774_v10 }
  0xef   : > { %4834 = vrot.lane.b32.xlu0 %v12437_v3, %s12255_s28  ;;  %11501 = vmatprep.subr.msk.mxu1 %vm254_vm0, %v1777_v11 }
  0xf0   : > { %11502 = vmatpush1.msk.msra.mxu1 %vm254_vm0, %v1776_v13  ;;  %v1772_v14 = vpop.permute.xlu1 %1771  ;;  %v1770_v15 = vpop.permute.xlu0 %1769  ;;  %11500 = vmatmul.mubr.msk.f32.vlgmr.msra.gmra.mxu0 %vm250_vm1, %v11497_v12 }
  0xf1   : > { %v1778_v16 = vsel %vm1773_vm6, %v1768_v9, %v1770_v15  ;;  %v1779_v17 = vsel %vm1773_vm6, %v1770_v15, %v1772_v14  ;;  %11888 = vmatprep.subr.mxu1 %v12242_v0  ;;  %11503 = vmatmul.mubr.msk.f32.vlgmr.msra.gmra.mxu1 %vm250_vm1, %v11497_v12  ;;  %vm233_vm6 = vcmask 259076  }
  0xf2   : > { %4838 = vrot.lane.b32.xlu1 %v12456_v7, %s12255_s28  ;;  %11504 = vmatprep.subr.msk.mxu0 %vm254_vm0, %v1779_v17 }
  0xf3   : > { %4828 = vrot.lane.b32.xlu0 %v12432_v2, %s12255_s28  ;;  %11505 = vmatpush1.msk.msra.mxu0 %vm254_vm0, %v1778_v16 }
  0xf4   : > { %v2146_v18 = vpop.permute.xlu1 %2145  ;;  %v2144_v20 = vpop.permute.xlu0 %2143  ;;  %11889 = vmatpush3.msk.msra.mxu1 %vm254_vm0, %v1772_v14  ;;  %11890 = vmatprep.mubr.msk.f32.mxu1 %vm12245_vm2, %v12242_v0 }
  0xf5   : > { %v2157_v21 = vsel %vm2155_vm7, %v2144_v20, %v2146_v18  ;;  %11891 = vmatmul.mubr.msk.f32.vlgmr.msra.gmra.mxu1 %vm250_vm1, %v11497_v12  ;;  %2003 = vmatprep.mubr.f32.mxu0 %v12242_v0 }
  0xf6   : > { %4842 = vrot.lane.b32.xlu1 %v12549_v22, %s12255_s28  ;;  %11510 = vmatprep.subr.msk.mxu0 %vm254_vm0, %v2157_v21 }
  0xf7   : > { %4840 = vrot.lane.b32.xlu0 %v12541_v19, %s12255_s28  ;;  %11506 = vmatmul.mubr.msk.f32.vlgmr.msra.gmra.mxu0 %vm250_vm1, %v11497_v12  ;;  %v11545_v12 = vld [vmem:[%s14016_s1 + $0x10] sm:$0x3]  ;;  %s12259_s28 = smov 7  }
  0xf8   : > { %v2150_v23 = vpop.permute.xlu1 %2149  ;;  %v2148_v24 = vpop.permute.xlu0 %2147  ;;  %2314 = vmatprep.mubr.f32.mxu1 %v12242_v0  ;;  %2243 = vmatprep.mubr.f32.mxu0 %v12242_v0 }
  0xf9   : > { %v2158_v25 = vsel %vm2155_vm7, %v2146_v18, %v2148_v24  ;;  %v2159_v26 = vsel %vm2155_vm7, %v2148_v24, %v2150_v23  ;;  %v6358_v18 = vld [vmem:[%s12416_s6 + $0x10] sm:$0xff] }
  0xfa   : > { %5218 = vrot.lane.b32.xlu1 %v12429_v1, %s12256_s13  ;;  %11513 = vmatprep.subr.msk.mxu1 %vm254_vm0, %v2159_v26 }
  0xfb   : > { %5216 = vrot.lane.b32.xlu0 %v12442_v4, %s12256_s13  ;;  %11514 = vmatpush1.msk.msra.mxu1 %vm254_vm0, %v2158_v25 }
  0xfc   : > { %v2152_v28 = vpop.permute.xlu1 %2151  ;;  %v2142_v29 = vpop.permute.xlu0 %2141  ;;  %11893 = vmatprep.subr.mxu1 %v12242_v0  ;;  %11515 = vmatmul.mubr.msk.f32.vlgmr.msra.gmra.mxu1 %vm250_vm1, %v11509_v27 }
  0xfd   : > { %v2156_v30 = vsel %vm2155_vm7, %v2142_v29, %v2144_v20  ;;  %11895 = vmatprep.mubr.msk.f32.mxu1 %vm12245_vm2, %v12242_v0  ;;  %v2160_v34 = vsel %vm2155_vm7, %v2150_v23, %v2152_v28 }
  0xfe   : > { %5222 = vrot.lane.b32.xlu1 %v12445_v5, %s12256_s13  ;;  %11511 = vmatpush1.msk.msra.mxu0 %vm254_vm0, %v2156_v30  ;;  %v11557_v30 = vld [vmem:[%s14016_s1 + $0x12] sm:$0x3] }
  0xff   : > { %5220 = vrot.lane.b32.xlu0 %v12437_v3, %s12256_s13  ;;  %11512 = vmatmul.mubr.msk.f32.vlgmr.msra.gmra.mxu0 %vm250_vm1, %v11509_v27 }
 0x100   : > { %v2526_v31 = vpop.permute.xlu1 %2525  ;;  %v2154_v32 = vpop.permute.xlu0 %2153  ;;  %2385 = vmatprep.mubr.f32.mxu0 %v12242_v0 }
 0x101   : > { %11894 = vmatpush3.msk.msra.mxu1 %vm254_vm0, %v2154_v32  ;;  %v2161_v33 = vsel %vm2155_vm7, %v2152_v28, %v2154_v32  ;;  %vm13081_vm7 = vmor %vm233_vm6, %vm232_vm5  ;;  %vm9067_vm5 = vcmask 359424   ;;  %vm9449_vm6 = vcmask 293888  }
 0x102   : > { %5224 = vrot.lane.b32.xlu1 %v12456_v7, %s12256_s13  ;;  %11516 = vmatprep.subr.msk.mxu0 %vm254_vm0, %v2161_v33  ;;  %235 = vst.msk [vmem:[#allocation2 + $0x8] sm:$0x3f] %vm13081_vm7, %v12242_v0 }
 0x103   : > { %5214 = vrot.lane.b32.xlu0 %v12432_v2, %s12256_s13  ;;  %11517 = vmatpush1.msk.msra.mxu0 %vm254_vm0, %v2160_v34  ;;  %v6742_v34 = vld [vmem:[%s12416_s6] sm:$0xff] }
 0x104   : > { %v2530_v35 = vpop.permute.xlu1 %2529  ;;  %v2528_v36 = vpop.permute.xlu0 %2527  ;;  %11518 = vmatmul.mubr.msk.f32.vlgmr.msra.gmra.mxu0 %vm250_vm1, %v11509_v27  ;;  %11896 = vmatmul.mubr.msk.f32.vlgmr.msra.gmra.mxu1 %vm250_vm1, %v11509_v27 }
 0x105   : > { %v2539_v37 = vsel %vm2537_vm8, %v2526_v31, %v2528_v36  ;;  %2625 = vmatprep.mubr.f32.mxu0 %v12242_v0  ;;  %2696 = vmatprep.mubr.f32.mxu1 %v12242_v0  ;;  %v2540_v43 = vsel %vm2537_vm8, %v2528_v36, %v2530_v35 }
 0x106   : > { %5228 = vrot.lane.b32.xlu1 %v12549_v22, %s12256_s13  ;;  %11522 = vmatprep.subr.msk.mxu0 %vm254_vm0, %v2539_v37  ;;  %v6754_v37 = vcombine.high %v6742_v34, %v6742_v34 }
 0x107   : > { %5226 = vrot.lane.b32.xlu0 %v12541_v19, %s12256_s13 }
 0x108   : > { %v2524_v38 = vpop.permute.xlu1 %2523  ;;  %v2532_v39 = vpop.permute.xlu0 %2531 }
 0x109   : > { %v2538_v40 = vsel %vm2537_vm8, %v2524_v38, %v2526_v31  ;;  %v2541_v41 = vsel %vm2537_vm8, %v2530_v35, %v2532_v39 }
 0x10a   : > { %5604 = vrot.lane.b32.xlu1 %v12429_v1, %s12257_s30  ;;  %11523 = vmatpush1.msk.msra.mxu0 %vm254_vm0, %v2538_v40 }
 0x10b   : > { %5602 = vrot.lane.b32.xlu0 %v12442_v4, %s12257_s30  ;;  %11525 = vmatprep.subr.msk.mxu1 %vm254_vm0, %v2541_v41 }
 0x10c   : > { %11526 = vmatpush1.msk.msra.mxu1 %vm254_vm0, %v2540_v43  ;;  %v2536_v44 = vpop.permute.xlu1 %2535  ;;  %v2534_v45 = vpop.permute.xlu0 %2533  ;;  %11524 = vmatmul.mubr.msk.f32.vlgmr.msra.gmra.mxu0 %vm250_vm1, %v11521_v42 }
 0x10d   : > { %v2542_v46 = vsel %vm2537_vm8, %v2532_v39, %v2534_v45  ;;  %v2543_v47 = vsel %vm2537_vm8, %v2534_v45, %v2536_v44  ;;  %11898 = vmatprep.subr.mxu1 %v12242_v0  ;;  %11527 = vmatmul.mubr.msk.f32.vlgmr.msra.gmra.mxu1 %vm250_vm1, %v11521_v42  ;;  %v12849_v17 = vpop.f32.mrf.mxu1  ;;  %vm5616_vm8 = vcmask 130048  }
 0x10e   : > { %5608 = vrot.lane.b32.xlu1 %v12445_v5, %s12257_s30  ;;  %11528 = vmatprep.subr.msk.mxu0 %vm254_vm0, %v2543_v47 }
 0x10f   : > { %5606 = vrot.lane.b32.xlu0 %v12437_v3, %s12257_s30  ;;  %11529 = vmatpush1.msk.msra.mxu0 %vm254_vm0, %v2542_v46  ;;  %v12858_v20 = vpop.f32.mrf.mxu1 }
 0x110   : > { %v2910_v48 = vpop.permute.xlu1 %2909  ;;  %v2908_v49 = vpop.permute.xlu0 %2907  ;;  %11899 = vmatpush3.msk.msra.mxu1 %vm254_vm0, %v2536_v44  ;;  %11900 = vmatprep.mubr.msk.f32.mxu1 %vm12245_vm2, %v12242_v0 }
 0x111   : > { %v2921_v50 = vsel %vm2919_vm9, %v2908_v49, %v2910_v48  ;;  %11901 = vmatmul.mubr.msk.f32.vlgmr.msra.gmra.mxu1 %vm250_vm1, %v11521_v42  ;;  %2767 = vmatprep.mubr.f32.mxu0 %v12242_v0  ;;  %v12866_v24 = vpop.f32.mrf.mxu1 }
 0x112   : > { %5610 = vrot.lane.b32.xlu1 %v12456_v7, %s12257_s30  ;;  %11534 = vmatprep.subr.msk.mxu0 %vm254_vm0, %v2921_v50 }
 0x113   : > { %5600 = vrot.lane.b32.xlu0 %v12432_v2, %s12257_s30  ;;  %11530 = vmatmul.mubr.msk.f32.vlgmr.msra.gmra.mxu0 %vm250_vm1, %v11521_v42  ;;  %v12873_v25 = vpop.f32.mrf.mxu1 }
 0x114   : > { %v2914_v51 = vpop.permute.xlu1 %2913  ;;  %v2912_v52 = vpop.permute.xlu0 %2911  ;;  %3078 = vmatprep.mubr.f32.mxu1 %v12242_v0  ;;  %3007 = vmatprep.mubr.f32.mxu0 %v12242_v0 }
 0x115   : > { %v2922_v53 = vsel %vm2919_vm9, %v2910_v48, %v2912_v52  ;;  %v2923_v54 = vsel %vm2919_vm9, %v2912_v52, %v2914_v51  ;;  %v11569_v52 = vld [vmem:[%s14016_s1 + $0x14] sm:$0x3] }
 0x116   : > { %5614 = vrot.lane.b32.xlu1 %v12549_v22, %s12257_s30  ;;  %11537 = vmatprep.subr.msk.mxu1 %vm254_vm0, %v2923_v54  ;;  %v12933_v54 = vld [vmem:[%s12416_s6 + $0x4] sm:$0xff] }
 0x117   : > { %5612 = vrot.lane.b32.xlu0 %v12541_v19, %s12257_s30  ;;  %11538 = vmatpush1.msk.msra.mxu1 %vm254_vm0, %v2922_v53 }
 0x118   : > { %v2916_v56 = vpop.permute.xlu1 %2915  ;;  %v2906_v57 = vpop.permute.xlu0 %2905  ;;  %11903 = vmatprep.subr.mxu1 %v12242_v0  ;;  %11539 = vmatmul.mubr.msk.f32.vlgmr.msra.gmra.mxu1 %vm250_vm1, %v11533_v55 }
 0x119   : > { %v2920_v58 = vsel %vm2919_vm9, %v2906_v57, %v2908_v49  ;;  %11905 = vmatprep.mubr.msk.f32.mxu1 %vm12245_vm2, %v12242_v0  ;;  %v2924_v62 = vsel %vm2919_vm9, %v2914_v51, %v2916_v56  ;;  %v12946_v57 = vld [vmem:[%s12416_s6 + $0xc] sm:$0xff] }
 0x11a   : > { %5990 = vrot.lane.b32.xlu1 %v12429_v1, %s12258_s23  ;;  %11535 = vmatpush1.msk.msra.mxu0 %vm254_vm0, %v2920_v58  ;;  %v12950_v58 = vcombine.high %v12933_v54, %v12933_v54 }
 0x11b   : > { %5988 = vrot.lane.b32.xlu0 %v12442_v4, %s12258_s23  ;;  %11536 = vmatmul.mubr.msk.f32.vlgmr.msra.gmra.mxu0 %vm250_vm1, %v11533_v55 }
 0x11c   : > { %v3290_v59 = vpop.permute.xlu1 %3289  ;;  %v2918_v60 = vpop.permute.xlu0 %2917  ;;  %3149 = vmatprep.mubr.f32.mxu0 %v12242_v0 }
 0x11d   : > { %11904 = vmatpush3.msk.msra.mxu1 %vm254_vm0, %v2918_v60  ;;  %v2925_v61 = vsel %vm2919_vm9, %v2916_v56, %v2918_v60  ;;  %vm6002_vm9 = vcmask 64512  }
 0x11e   : > { %5994 = vrot.lane.b32.xlu1 %v12445_v5, %s12258_s23  ;;  %11540 = vmatprep.subr.msk.mxu0 %vm254_vm0, %v2925_v61 }
 0x11f   : > { %5992 = vrot.lane.b32.xlu0 %v12437_v3, %s12258_s23  ;;  %11541 = vmatpush1.msk.msra.mxu0 %vm254_vm0, %v2924_v62  ;;  %v12961_v62 = vcombine.high %v12946_v57, %v12946_v57 }
 0x120   : > { %v3294_v63 = vpop.permute.xlu1 %3293  ;;  %v3292_v6 = vpop.permute.xlu0 %3291  ;;  %11542 = vmatmul.mubr.msk.f32.vlgmr.msra.gmra.mxu0 %vm250_vm1, %v11533_v55  ;;  %11906 = vmatmul.mubr.msk.f32.vlgmr.msra.gmra.mxu1 %vm250_vm1, %v11533_v55 }
 0x121   : > { %v3303_v8 = vsel %vm3301_vm10, %v3290_v59, %v3292_v6  ;;  %3389 = vmatprep.mubr.f32.mxu0 %v12242_v0  ;;  %3460 = vmatprep.mubr.f32.mxu1 %v12242_v0 }
 0x122   : > { %5996 = vrot.lane.b32.xlu1 %v12456_v7, %s12258_s23  ;;  %11546 = vmatprep.subr.msk.mxu0 %vm254_vm0, %v3303_v8  ;;  %v3304_v7 = vsel %vm3301_vm10, %v3292_v6, %v3294_v63 }
 0x123   : > { %5986 = vrot.lane.b32.xlu0 %v12432_v2, %s12258_s23 }
 0x124   : > { %v3288_v5 = vpop.permute.xlu1 %3287  ;;  %v3296_v9 = vpop.permute.xlu0 %3295 }
 0x125   : > { %v3302_v10 = vsel %vm3301_vm10, %v3288_v5, %v3290_v59  ;;  %v3305_v11 = vsel %vm3301_vm10, %v3294_v63, %v3296_v9  ;;  %v12967_v63 = vld [vmem:[%s12416_s6 + $0x14] sm:$0xff] }
 0x126   : > { %6000 = vrot.lane.b32.xlu1 %v12549_v22, %s12258_s23  ;;  %11547 = vmatpush1.msk.msra.mxu0 %vm254_vm0, %v3302_v10  ;;  %v12975_v5 = vcombine.high %v12967_v63, %v12967_v63 }
 0x127   : > { %5998 = vrot.lane.b32.xlu0 %v12541_v19, %s12258_s23  ;;  %11549 = vmatprep.subr.msk.mxu1 %vm254_vm0, %v3305_v11  ;;  %s12268_s23 = smov 36  }
 0x128   : > { %11550 = vmatpush1.msk.msra.mxu1 %vm254_vm0, %v3304_v7  ;;  %v3300_v13 = vpop.permute.xlu1 %3299  ;;  %v3298_v14 = vpop.permute.xlu0 %3297  ;;  %11548 = vmatmul.mubr.msk.f32.vlgmr.msra.gmra.mxu0 %vm250_vm1, %v11545_v12 }
 0x129   : > { %v3306_v15 = vsel %vm3301_vm10, %v3296_v9, %v3298_v14  ;;  %v3307_v16 = vsel %vm3301_vm10, %v3298_v14, %v3300_v13  ;;  %11908 = vmatprep.subr.mxu1 %v12242_v0  ;;  %11551 = vmatmul.mubr.msk.f32.vlgmr.msra.gmra.mxu1 %vm250_vm1, %v11545_v12  ;;  %vm6388_vm10 = vcmask 56320  }
 0x12a   : > { %6376 = vrot.lane.b32.xlu1 %v12429_v1, %s12259_s28  ;;  %11552 = vmatprep.subr.msk.mxu0 %vm254_vm0, %v3307_v16 }
 0x12b   : > { %6374 = vrot.lane.b32.xlu0 %v12442_v4, %s12259_s28  ;;  %11553 = vmatpush1.msk.msra.mxu0 %vm254_vm0, %v3306_v15  ;;  %v6370_v4 = vcombine.high %v6358_v18, %v6358_v18  ;;  %v7131_v15 = vld [vmem:[%s12416_s6 + $0x1c] sm:$0xf] }
 0x12c   : > { %v3675_v21 = vpop.permute.xlu1 %3674  ;;  %v3673_v23 = vpop.permute.xlu0 %3672  ;;  %11909 = vmatpush3.msk.msra.mxu1 %vm254_vm0, %v3300_v13  ;;  %11910 = vmatprep.mubr.msk.f32.mxu1 %vm12245_vm2, %v12242_v0  ;;  %v11581_v13 = vld [vmem:[%s14016_s1 + $0x16] sm:$0x3] }
 0x12d   : > { %v3688_v1 = vsel %vm3686_vm11, %v3673_v23, %v3675_v21  ;;  %11911 = vmatmul.mubr.msk.f32.vlgmr.msra.gmra.mxu1 %vm250_vm1, %v11545_v12  ;;  %3531 = vmatprep.mubr.f32.mxu0 %v12242_v0 }
 0x12e   : > { %6380 = vrot.lane.b32.xlu1 %v6358_v18, %s12259_s28  ;;  %11558 = vmatprep.subr.msk.mxu0 %vm254_vm0, %v3688_v1 }
 0x12f   : > { %6378 = vrot.lane.b32.xlu0 %v12437_v3, %s12259_s28  ;;  %11554 = vmatmul.mubr.msk.f32.vlgmr.msra.gmra.mxu0 %vm250_vm1, %v11545_v12  ;;  %v12882_v3 = vpop.f32.mrf.mxu1 }
 0x130   : > { %v3679_v26 = vpop.permute.xlu1 %3678  ;;  %v3677_v27 = vpop.permute.xlu0 %3676  ;;  %3846 = vmatprep.mubr.f32.mxu1 %v12242_v0  ;;  %3775 = vmatprep.mubr.f32.mxu0 %v12242_v0 }
 0x131   : > { %v3689_v28 = vsel %vm3686_vm11, %v3675_v21, %v3677_v27  ;;  %v3690_v29 = vsel %vm3686_vm11, %v3677_v27, %v3679_v26  ;;  %v12889_v31 = vpop.f32.mrf.mxu1 }
 0x132   : > { %6382 = vrot.lane.b32.xlu1 %v6370_v4, %s12259_s28  ;;  %11561 = vmatprep.subr.msk.mxu1 %vm254_vm0, %v3690_v29 }
 0x133   : > { %6372 = vrot.lane.b32.xlu0 %v12432_v2, %s12259_s28  ;;  %11562 = vmatpush1.msk.msra.mxu1 %vm254_vm0, %v3689_v28  ;;  %v12897_v36 = vpop.f32.mrf.mxu1  ;;  %v6743_v2 = vld [vmem:[%s12416_s6 + $0x8] sm:$0xff] }
 0x134   : > { %v3681_v32 = vpop.permute.xlu1 %3680  ;;  %v3671_v33 = vpop.permute.xlu0 %3670  ;;  %11913 = vmatprep.subr.mxu1 %v12242_v0  ;;  %11563 = vmatmul.mubr.msk.f32.vlgmr.msra.gmra.mxu1 %vm250_vm1, %v11557_v30  ;;  %v6755_v44 = vcombine.high %v6743_v2, %v6743_v2 }
 0x135   : > { %v3687_v35 = vsel %vm3686_vm11, %v3671_v33, %v3673_v23  ;;  %11915 = vmatprep.mubr.msk.f32.mxu1 %vm12245_vm2, %v12242_v0  ;;  %v11872_v38 = vpop.f32.mrf.mxu1  ;;  %v3691_v43 = vsel %vm3686_vm11, %v3679_v26, %v3681_v32  ;;  %v12263_v33 = vmov 1983009808  }
 0x136   : > { %6386 = vrot.lane.b32.xlu1 %v12549_v22, %s12259_s28  ;;  %11559 = vmatpush1.msk.msra.mxu0 %vm254_vm0, %v3687_v35  ;;  %v559_v38 = vcombine.low %v12849_v17, %v12858_v20 }
 0x137   : > { %6384 = vrot.lane.b32.xlu0 %v12541_v19, %s12259_s28  ;;  %11560 = vmatmul.mubr.msk.f32.vlgmr.msra.gmra.mxu0 %vm250_vm1, %v11557_v30  ;;  %s12265_s28 = smov 46  }
 0x138   : > { %v3685_v39 = vpop.permute.xlu1 %3684  ;;  %v3683_v40 = vpop.permute.xlu0 %3682  ;;  %3917 = vmatprep.mubr.f32.mxu0 %v12242_v0 }
 0x139   : > { %v3693_v41 = vsel %vm3686_vm11, %v3683_v40, %v3685_v39  ;;  %v3692_v42 = vsel %vm3686_vm11, %v3681_v32, %v3683_v40  ;;  %v7513_v32 = vld [vmem:[%s12416_s6 + $0x1c] sm:$0xf] }
 0x13a   : > { %6762 = vrot.lane.b32.xlu1 %v6743_v2, %s12260_s8  ;;  %11564 = vmatprep.subr.msk.mxu0 %vm254_vm0, %v3692_v42  ;;  %v11593_v42 = vld [vmem:[%s14016_s1 + $0x18] sm:$0x3] }
 0x13b   : > { %6760 = vrot.lane.b32.xlu0 %v6754_v37, %s12260_s8  ;;  %11914 = vmatpush3.msk.msra.mxu1 %vm254_vm0, %v3693_v41 }
 0x13c   : > { %11565 = vmatpush1.msk.msra.mxu0 %vm254_vm0, %v3691_v43  ;;  %v4061_v45 = vpop.permute.xlu1 %4060  ;;  %11916 = vmatmul.mubr.msk.f32.vlgmr.msra.gmra.mxu1 %vm250_vm1, %v11557_v30  ;;  %v560_v43 = vcombine.low %v12866_v24, %v12873_v25 }
 0x13d   : > { %v4059_v46 = vpop.permute.xlu0 %4058  ;;  %11566 = vmatmul.mubr.msk.f32.vlgmr.msra.gmra.mxu0 %vm250_vm1, %v11557_v30  ;;  %4232 = vmatprep.mubr.f32.mxu1 %v12242_v0  ;;  %v564_v30 = vlaneseq }
 0x13e   : > { %6766 = vrot.lane.b32.xlu1 %v6358_v18, %s12260_s8  ;;  %v4074_v47 = vsel %vm4072_vm12, %v4059_v46, %v4061_v45  ;;  %4161 = vmatprep.mubr.f32.mxu0 %v12242_v0 }
 0x13f   : > { %6764 = vrot.lane.b32.xlu0 %v6755_v44, %s12260_s8  ;;  %11570 = vmatprep.subr.msk.mxu0 %vm254_vm0, %v4074_v47  ;;  %v13030_v2 = vshrl.u32 %v564_v30, 7 }
 0x140   : > { %v4065_v48 = vpop.permute.xlu1 %4064 }
 0x141   : > { %v4063_v49 = vpop.permute.xlu0 %4062 }
 0x142   : > { %v4075_v50 = vsel %vm4072_vm12, %v4061_v45, %v4063_v49  ;;  %6768 = vrot.lane.b32.xlu1 %v6370_v4, %s12260_s8  ;;  %v4076_v51 = vsel %vm4072_vm12, %v4063_v49, %v4065_v48  ;;  %v576_v49 = vcombine.low %v12882_v3, %v12889_v31  ;;  %v10754_v31 = vld [vmem:[#allocation7 + $0x40] sm:$0xff] }
 0x143   : > { %6758 = vrot.lane.b32.xlu0 %v6742_v34, %s12260_s8  ;;  %11573 = vmatprep.subr.msk.mxu1 %vm254_vm0, %v4076_v51  ;;  %v562_v34 = vunpack.c.l.s4 %v12263_v33 }
 0x144   : > { %11574 = vmatpush1.msk.msra.mxu1 %vm254_vm0, %v4075_v50  ;;  %v4067_v53 = vpop.permute.xlu1 %4066 }
 0x145   : > { %v4057_v55 = vpop.permute.xlu0 %4056  ;;  %11918 = vmatprep.subr.mxu1 %v12242_v0  ;;  %11575 = vmatmul.mubr.msk.f32.vlgmr.msra.gmra.mxu1 %vm250_vm1, %v11569_v52  ;;  %v4077_v61 = vsel %vm4072_vm12, %v4065_v48, %v4067_v53  ;;  %v563_v39 = vunpack.c.0.s8 %v562_v34 }
 0x146   : > { %v4073_v56 = vsel %vm4072_vm12, %v4057_v55, %v4059_v46  ;;  %6772 = vrot.lane.b32.xlu1 %v12549_v22, %s12260_s8  ;;  %11920 = vmatprep.mubr.msk.f32.mxu1 %vm12245_vm2, %v12242_v0 }
 0x147   : > { %6770 = vrot.lane.b32.xlu0 %v12541_v19, %s12260_s8  ;;  %11571 = vmatpush1.msk.msra.mxu0 %vm254_vm0, %v4073_v56  ;;  %v13046_v17 = vsub.s32 %v563_v39, %v13030_v2  ;;  %s12266_s8 = smov 45  }
 0x148   : > { %v4071_v59 = vpop.permute.xlu1 %4070  ;;  %11572 = vmatmul.mubr.msk.f32.vlgmr.msra.gmra.mxu0 %vm250_vm1, %v11569_v52 }
 0x149   : > { %v4069_v60 = vpop.permute.xlu0 %4068  ;;  %4303 = vmatprep.mubr.f32.mxu0 %v12242_v0  ;;  %v13052_v45 = vrot.slane %v559_v38, %v13046_v17  ;;  %v13055_v24 = vrot.slane %v560_v43, %v13046_v17  ;;  %v583_v55 = vrot.slane %v576_v49, %v13046_v17  ;;  %v590_v56 = vrot.slane %v12897_v36, %v13046_v17 }
 0x14a   : > { %v4079_v22 = vsel %vm4072_vm12, %v4069_v60, %v4071_v59  ;;  %7147 = vrot.lane.b32.xlu1 %v12946_v57, %s12261_s20  ;;  %v4078_v19 = vsel %vm4072_vm12, %v4067_v53, %v4069_v60  ;;  %vm6774_vm12 = vcmask 48128  }
 0x14b   : > { %7145 = vrot.lane.b32.xlu0 %v12950_v58, %s12261_s20  ;;  %11576 = vmatprep.subr.msk.mxu0 %vm254_vm0, %v4078_v19  ;;  %v575_v46 = vcombine.low %v13052_v45, %v13055_v24 }
 0x14c   : > { %11919 = vmatpush3.msk.msra.mxu1 %vm254_vm0, %v4079_v22  ;;  %11577 = vmatpush1.msk.msra.mxu0 %vm254_vm0, %v4077_v61  ;;  %v4447_v6 = vpop.permute.xlu1 %4446  ;;  %v7895_v22 = vld [vmem:[%s12416_s6 + $0x1c] sm:$0xf]  ;;  %v591_v61 = vcombine.low %v583_v55, %v590_v56 }
 0x14d   : > { %v4445_v8 = vpop.permute.xlu0 %4444  ;;  %11921 = vmatmul.mubr.msk.f32.vlgmr.msra.gmra.mxu1 %vm250_vm1, %v11569_v52  ;;  %11578 = vmatmul.mubr.msk.f32.vlgmr.msra.gmra.mxu0 %vm250_vm1, %v11569_v52 }
 0x14e   : > { %7151 = vrot.lane.b32.xlu1 %v12967_v63, %s12261_s20  ;;  %v4460_v9 = vsel %vm4458_vm13, %v4445_v8, %v4447_v6  ;;  %4618 = vmatprep.mubr.f32.mxu1 %v12242_v0 }
 0x14f   : > { %7149 = vrot.lane.b32.xlu0 %v12961_v62, %s12261_s20  ;;  %11582 = vmatprep.subr.msk.mxu0 %vm254_vm0, %v4460_v9 }
 0x150   : > { %v4451_v10 = vpop.permute.xlu1 %4450  ;;  %4547 = vmatprep.mubr.f32.mxu0 %v12242_v0 }
 0x151   : > { %v4449_v11 = vpop.permute.xlu0 %4448 }
 0x152   : > { %v4461_v12 = vsel %vm4458_vm13, %v4447_v6, %v4449_v11  ;;  %7153 = vrot.lane.b32.xlu1 %v12975_v5, %s12261_s20  ;;  %v4462_v7 = vsel %vm4458_vm13, %v4449_v11, %v4451_v10 }
 0x153   : > { %7143 = vrot.lane.b32.xlu0 %v12933_v54, %s12261_s20  ;;  %11585 = vmatprep.subr.msk.mxu1 %vm254_vm0, %v4462_v7 }
 0x154   : > { %11586 = vmatpush1.msk.msra.mxu1 %vm254_vm0, %v4461_v12  ;;  %v4453_v14 = vpop.permute.xlu1 %4452 }
 0x155   : > { %v4443_v16 = vpop.permute.xlu0 %4442  ;;  %11923 = vmatprep.subr.mxu1 %v12242_v0  ;;  %11587 = vmatmul.mubr.msk.f32.vlgmr.msra.gmra.mxu1 %vm250_vm1, %v11581_v13  ;;  %v4463_v26 = vsel %vm4458_vm13, %v4451_v10, %v4453_v14  ;;  %v241_v10 = vld [vmem:[#allocation2 + $0x8] sm:$0x3f] }
 0x156   : > { %v4459_v18 = vsel %vm4458_vm13, %v4443_v16, %v4445_v8  ;;  %7527 = vrot.lane.b32.xlu1 %v12950_v58, %s12262_s21  ;;  %11925 = vmatprep.mubr.msk.f32.mxu1 %vm12245_vm2, %v12242_v0  ;;  %v11605_v8 = vld [vmem:[%s14016_s1 + $0x1a] sm:$0x3]  ;;  %v595_v12 = vadd.f32 %v591_v61, %v241_v10 }
 0x157   : > { %7155 = vrot.lane.b32.xlu0 %v7131_v15, %s12261_s20  ;;  %11583 = vmatpush1.msk.msra.mxu0 %vm254_vm0, %v4459_v18 }
 0x158   : > { %v4457_v21 = vpop.permute.xlu1 %4456  ;;  %11584 = vmatmul.mubr.msk.f32.vlgmr.msra.gmra.mxu0 %vm250_vm1, %v11581_v13  ;;  %597 = vst.msk [vmem:[#allocation2 + $0x8] sm:$0x3f] %vm13081_vm7, %v595_v12 }
 0x159   : > { %v4455_v23 = vpop.permute.xlu0 %4454  ;;  %4689 = vmatprep.mubr.f32.mxu0 %v12242_v0 }
 0x15a   : > { %v4465_v1 = vsel %vm4458_vm13, %v4455_v23, %v4457_v21  ;;  %7531 = vrot.lane.b32.xlu1 %v12961_v62, %s12262_s21  ;;  %v4464_v4 = vsel %vm4458_vm13, %v4453_v14, %v4455_v23  ;;  %v8277_v21 = vld [vmem:[%s12416_s6 + $0x1c] sm:$0xf]  ;;  %vm7157_vm13 = vcmask 457728  }
 0x15b   : > { %7529 = vrot.lane.b32.xlu0 %v12946_v57, %s12262_s21  ;;  %11588 = vmatprep.subr.msk.mxu0 %vm254_vm0, %v4464_v4 }
 0x15c   : > { %11924 = vmatpush3.msk.msra.mxu1 %vm254_vm0, %v4465_v1  ;;  %11589 = vmatpush1.msk.msra.mxu0 %vm254_vm0, %v4463_v26  ;;  %v4833_v27 = vpop.permute.xlu1 %4832 }
 0x15d   : > { %v4831_v28 = vpop.permute.xlu0 %4830  ;;  %11926 = vmatmul.mubr.msk.f32.vlgmr.msra.gmra.mxu1 %vm250_vm1, %v11581_v13  ;;  %11590 = vmatmul.mubr.msk.f32.vlgmr.msra.gmra.mxu0 %vm250_vm1, %v11581_v13 }
 0x15e   : > { %7525 = vrot.lane.b32.xlu1 %v12933_v54, %s12262_s21  ;;  %v4846_v29 = vsel %vm4844_vm14, %v4831_v28, %v4833_v27  ;;  %5004 = vmatprep.mubr.f32.mxu1 %v12242_v0 }
 0x15f   : > { %7533 = vrot.lane.b32.xlu0 %v12967_v63, %s12262_s21  ;;  %11594 = vmatprep.subr.msk.mxu0 %vm254_vm0, %v4846_v29 }
 0x160   : > { %v4837_v35 = vpop.permute.xlu1 %4836  ;;  %4933 = vmatprep.mubr.f32.mxu0 %v12242_v0 }
 0x161   : > { %v4835_v37 = vpop.permute.xlu0 %4834 }
 0x162   : > { %v4847_v40 = vsel %vm4844_vm14, %v4833_v27, %v4835_v37  ;;  %7537 = vrot.lane.b32.xlu1 %v7513_v32, %s12262_s21  ;;  %v4848_v41 = vsel %vm4844_vm14, %v4835_v37, %v4837_v35  ;;  %v11617_v32 = vld [vmem:[%s14016_s1 + $0x1c] sm:$0x3] }
 0x163   : > { %7535 = vrot.lane.b32.xlu0 %v12975_v5, %s12262_s21  ;;  %11597 = vmatprep.subr.msk.mxu1 %vm254_vm0, %v4848_v41 }
 0x164   : > { %11598 = vmatpush1.msk.msra.mxu1 %vm254_vm0, %v4847_v40  ;;  %v4839_v20 = vpop.permute.xlu1 %4838 }
 0x165   : > { %v4829_v44 = vpop.permute.xlu0 %4828  ;;  %11928 = vmatprep.subr.mxu1 %v12242_v0  ;;  %11599 = vmatmul.mubr.msk.f32.vlgmr.msra.gmra.mxu1 %vm250_vm1, %v11593_v42  ;;  %v4849_v52 = vsel %vm4844_vm14, %v4837_v35, %v4839_v20 }
 0x166   : > { %v4845_v25 = vsel %vm4844_vm14, %v4829_v44, %v4831_v28  ;;  %7911 = vrot.lane.b32.xlu1 %v12946_v57, %s12264_s25  ;;  %11930 = vmatprep.mubr.msk.f32.mxu1 %vm12245_vm2, %v12242_v0  ;;  %v8659_v44 = vld [vmem:[%s12416_s6 + $0x1c] sm:$0xf] }
 0x167   : > { %7909 = vrot.lane.b32.xlu0 %v12950_v58, %s12264_s25  ;;  %11595 = vmatpush1.msk.msra.mxu0 %vm254_vm0, %v4845_v25 }
 0x168   : > { %v4843_v47 = vpop.permute.xlu1 %4842  ;;  %11596 = vmatmul.mubr.msk.f32.vlgmr.msra.gmra.mxu0 %vm250_vm1, %v11593_v42 }
 0x169   : > { %v4841_v48 = vpop.permute.xlu0 %4840  ;;  %5075 = vmatprep.mubr.f32.mxu0 %v12242_v0 }
 0x16a   : > { %v4851_v50 = vsel %vm4844_vm14, %v4841_v48, %v4843_v47  ;;  %7915 = vrot.lane.b32.xlu1 %v12967_v63, %s12264_s25  ;;  %v4850_v51 = vsel %vm4844_vm14, %v4839_v20, %v4841_v48  ;;  %vm7539_vm14 = vcmask 449536  }
 0x16b   : > { %7913 = vrot.lane.b32.xlu0 %v12961_v62, %s12264_s25  ;;  %11600 = vmatprep.subr.msk.mxu0 %vm254_vm0, %v4850_v51 }
 0x16c   : > { %11929 = vmatpush3.msk.msra.mxu1 %vm254_vm0, %v4851_v50  ;;  %11601 = vmatpush1.msk.msra.mxu0 %vm254_vm0, %v4849_v52  ;;  %v5219_v3 = vpop.permute.xlu1 %5218 }
 0x16d   : > { %v5217_v53 = vpop.permute.xlu0 %5216  ;;  %11931 = vmatmul.mubr.msk.f32.vlgmr.msra.gmra.mxu1 %vm250_vm1, %v11593_v42  ;;  %11602 = vmatmul.mubr.msk.f32.vlgmr.msra.gmra.mxu0 %vm250_vm1, %v11593_v42 }
 0x16e   : > { %7917 = vrot.lane.b32.xlu1 %v12975_v5, %s12264_s25  ;;  %v5232_v59 = vsel %vm5230_vm4, %v5217_v53, %v5219_v3  ;;  %5390 = vmatprep.mubr.f32.mxu1 %v12242_v0 }
 0x16f   : > { %7907 = vrot.lane.b32.xlu0 %v12933_v54, %s12264_s25  ;;  %11606 = vmatprep.subr.msk.mxu0 %vm254_vm0, %v5232_v59 }
 0x170   : > { %v5223_v60 = vpop.permute.xlu1 %5222  ;;  %5319 = vmatprep.mubr.f32.mxu0 %v12242_v0 }
 0x171   : > { %v5221_v19 = vpop.permute.xlu0 %5220 }
 0x172   : > { %v5233_v36 = vsel %vm5230_vm4, %v5219_v3, %v5221_v19  ;;  %8291 = vrot.lane.b32.xlu1 %v12950_v58, %s12265_s28  ;;  %v5234_v6 = vsel %vm5230_vm4, %v5221_v19, %v5223_v60 }
 0x173   : > { %7919 = vrot.lane.b32.xlu0 %v7895_v22, %s12264_s25  ;;  %11609 = vmatprep.subr.msk.mxu1 %vm254_vm0, %v5234_v6  ;;  %s12273_s25 = smov 12  }
 0x174   : > { %11610 = vmatpush1.msk.msra.mxu1 %vm254_vm0, %v5233_v36  ;;  %v5225_v9 = vpop.permute.xlu1 %5224 }
 0x175   : > { %v5215_v11 = vpop.permute.xlu0 %5214  ;;  %11933 = vmatprep.subr.mxu1 %v12242_v0  ;;  %11611 = vmatmul.mubr.msk.f32.vlgmr.msra.gmra.mxu1 %vm250_vm1, %v11605_v8  ;;  %v5235_v18 = vsel %vm5230_vm4, %v5223_v60, %v5225_v9  ;;  %v11629_v60 = vld [vmem:[%s14016_s1 + $0x1e] sm:$0x3] }
 0x176   : > { %v5231_v7 = vsel %vm5230_vm4, %v5215_v11, %v5217_v53  ;;  %8295 = vrot.lane.b32.xlu1 %v12961_v62, %s12265_s28  ;;  %11935 = vmatprep.mubr.msk.f32.mxu1 %vm12245_vm2, %v12242_v0 }
 0x177   : > { %8293 = vrot.lane.b32.xlu0 %v12946_v57, %s12265_s28  ;;  %11607 = vmatpush1.msk.msra.mxu0 %vm254_vm0, %v5231_v7 }
 0x178   : > { %v5229_v13 = vpop.permute.xlu1 %5228  ;;  %11608 = vmatmul.mubr.msk.f32.vlgmr.msra.gmra.mxu0 %vm250_vm1, %v11605_v8 }
 0x179   : > { %v5227_v14 = vpop.permute.xlu0 %5226  ;;  %5461 = vmatprep.mubr.f32.mxu0 %v12242_v0 }
 0x17a   : > { %v5237_v15 = vsel %vm5230_vm4, %v5227_v14, %v5229_v13  ;;  %8289 = vrot.lane.b32.xlu1 %v12933_v54, %s12265_s28  ;;  %v5236_v16 = vsel %vm5230_vm4, %v5225_v9, %v5227_v14  ;;  %v9041_v13 = vld [vmem:[%s12416_s6 + $0x1c] sm:$0xf]  ;;  %vm8685_vm4 = vcmask 367616  }
 0x17b   : > { %8297 = vrot.lane.b32.xlu0 %v12967_v63, %s12265_s28  ;;  %11612 = vmatprep.subr.msk.mxu0 %vm254_vm0, %v5236_v16 }
 0x17c   : > { %11934 = vmatpush3.msk.msra.mxu1 %vm254_vm0, %v5237_v15  ;;  %11613 = vmatpush1.msk.msra.mxu0 %vm254_vm0, %v5235_v18  ;;  %v5605_v23 = vpop.permute.xlu1 %5604  ;;  %v603_v18 = vld [vmem:[#allocation2 + $0x8] sm:$0x3f] }
 0x17d   : > { %v5603_v1 = vpop.permute.xlu0 %5602  ;;  %11936 = vmatmul.mubr.msk.f32.vlgmr.msra.gmra.mxu1 %vm250_vm1, %v11605_v8  ;;  %11614 = vmatmul.mubr.msk.f32.vlgmr.msra.gmra.mxu0 %vm250_vm1, %v11605_v8 }
 0x17e   : > { %8301 = vrot.lane.b32.xlu1 %v8277_v21, %s12265_s28  ;;  %v5618_v4 = vsel %vm5616_vm8, %v5603_v1, %v5605_v23  ;;  %5776 = vmatprep.mubr.f32.mxu1 %v12242_v0 }
 0x17f   : > { %8299 = vrot.lane.b32.xlu0 %v12975_v5, %s12265_s28  ;;  %11618 = vmatprep.subr.msk.mxu0 %vm254_vm0, %v5618_v4  ;;  %s12269_s28 = smov 35  }
 0x180   : > { %v5609_v26 = vpop.permute.xlu1 %5608  ;;  %5705 = vmatprep.mubr.f32.mxu0 %v12242_v0 }
 0x181   : > { %v5607_v27 = vpop.permute.xlu0 %5606 }
 0x182   : > { %v5619_v28 = vsel %vm5616_vm8, %v5605_v23, %v5607_v27  ;;  %8675 = vrot.lane.b32.xlu1 %v12946_v57, %s12266_s8  ;;  %v5620_v29 = vsel %vm5616_vm8, %v5607_v27, %v5609_v26 }
 0x183   : > { %8673 = vrot.lane.b32.xlu0 %v12950_v58, %s12266_s8  ;;  %11621 = vmatprep.subr.msk.mxu1 %vm254_vm0, %v5620_v29 }
 0x184   : > { %11622 = vmatpush1.msk.msra.mxu1 %vm254_vm0, %v5619_v28  ;;  %v5611_v33 = vpop.permute.xlu1 %5610 }
 0x185   : > { %v5601_v34 = vpop.permute.xlu0 %5600  ;;  %11938 = vmatprep.subr.mxu1 %v12242_v0  ;;  %11623 = vmatmul.mubr.msk.f32.vlgmr.msra.gmra.mxu1 %vm250_vm1, %v11617_v32  ;;  %v5621_v42 = vsel %vm5616_vm8, %v5609_v26, %v5611_v33 }
 0x186   : > { %v5617_v35 = vsel %vm5616_vm8, %v5601_v34, %v5603_v1  ;;  %8679 = vrot.lane.b32.xlu1 %v12967_v63, %s12266_s8  ;;  %11940 = vmatprep.mubr.msk.f32.mxu1 %vm12245_vm2, %v12242_v0 }
 0x187   : > { %8677 = vrot.lane.b32.xlu0 %v12961_v62, %s12266_s8  ;;  %11619 = vmatpush1.msk.msra.mxu0 %vm254_vm0, %v5617_v35 }
 0x188   : > { %v5615_v37 = vpop.permute.xlu1 %5614  ;;  %11620 = vmatmul.mubr.msk.f32.vlgmr.msra.gmra.mxu0 %vm250_vm1, %v11617_v32 }
 0x189   : > { %v5613_v38 = vpop.permute.xlu0 %5612  ;;  %5847 = vmatprep.mubr.f32.mxu0 %v12242_v0  ;;  %v717_v39 = vpop.f32.mrf.mxu1 }
 0x18a   : > { %v5623_v40 = vsel %vm5616_vm8, %v5613_v38, %v5615_v37  ;;  %8681 = vrot.lane.b32.xlu1 %v12975_v5, %s12266_s8  ;;  %v5622_v41 = vsel %vm5616_vm8, %v5611_v33, %v5613_v38  ;;  %vm9831_vm8 = vcmask 285696  }
 0x18b   : > { %8671 = vrot.lane.b32.xlu0 %v12933_v54, %s12266_s8  ;;  %11624 = vmatprep.subr.msk.mxu0 %vm254_vm0, %v5622_v41  ;;  %v719_v43 = vpop.f32.mrf.mxu1 }
 0x18c   : > { %11939 = vmatpush3.msk.msra.mxu1 %vm254_vm0, %v5623_v40  ;;  %11625 = vmatpush1.msk.msra.mxu0 %vm254_vm0, %v5621_v42  ;;  %v5991_v20 = vpop.permute.xlu1 %5990  ;;  %v941_v25 = vcombine.low %v717_v39, %v719_v43 }
 0x18d   : > { %v5989_v47 = vpop.permute.xlu0 %5988  ;;  %11941 = vmatmul.mubr.msk.f32.vlgmr.msra.gmra.mxu1 %vm250_vm1, %v11617_v32  ;;  %11626 = vmatmul.mubr.msk.f32.vlgmr.msra.gmra.mxu0 %vm250_vm1, %v11617_v32  ;;  %v788_v48 = vpop.f32.mrf.mxu1 }
 0x18e   : > { %9055 = vrot.lane.b32.xlu1 %v12950_v58, %s12267_s24  ;;  %v6004_v49 = vsel %vm6002_vm9, %v5989_v47, %v5991_v20  ;;  %6162 = vmatprep.mubr.f32.mxu1 %v12242_v0  ;;  %v949_v52 = vrot.slane %v941_v25, %v13046_v17 }
 0x18f   : > { %8683 = vrot.lane.b32.xlu0 %v8659_v44, %s12266_s8  ;;  %11630 = vmatprep.subr.msk.mxu0 %vm254_vm0, %v6004_v49  ;;  %v790_v50 = vpop.f32.mrf.mxu1  ;;  %v11641_v49 = vld [vmem:[%s14016_s1 + $0x20] sm:$0x3]  ;;  %s12270_s8 = smov 34  }
 0x190   : > { %v5995_v51 = vpop.permute.xlu1 %5994  ;;  %6091 = vmatprep.mubr.f32.mxu0 %v12242_v0  ;;  %v942_v3 = vcombine.low %v788_v48, %v790_v50 }
 0x191   : > { %v5993_v53 = vpop.permute.xlu0 %5992  ;;  %v859_v55 = vpop.f32.mrf.mxu1 }
 0x192   : > { %v6005_v56 = vsel %vm6002_vm9, %v5991_v20, %v5993_v53  ;;  %9059 = vrot.lane.b32.xlu1 %v12961_v62, %s12267_s24  ;;  %v6006_v59 = vsel %vm6002_vm9, %v5993_v53, %v5995_v51  ;;  %v956_v22 = vrot.slane %v942_v3, %v13046_v17 }
 0x193   : > { %9057 = vrot.lane.b32.xlu0 %v12946_v57, %s12267_s24  ;;  %11633 = vmatprep.subr.msk.mxu1 %vm254_vm0, %v6006_v59  ;;  %v861_v19 = vpop.f32.mrf.mxu1 }
 0x194   : > { %11634 = vmatpush1.msk.msra.mxu1 %vm254_vm0, %v6005_v56  ;;  %v5997_v61 = vpop.permute.xlu1 %5996  ;;  %v957_v36 = vcombine.low %v949_v52, %v956_v22  ;;  %v958_v6 = vcombine.low %v859_v55, %v861_v19 }
 0x195   : > { %v5987_v8 = vpop.permute.xlu0 %5986  ;;  %11943 = vmatprep.subr.mxu1 %v12242_v0  ;;  %11635 = vmatmul.mubr.msk.f32.vlgmr.msra.gmra.mxu1 %vm250_vm1, %v11629_v60  ;;  %v930_v9 = vpop.f32.mrf.mxu1  ;;  %v6007_v26 = vsel %vm6002_vm9, %v5995_v51, %v5997_v61 }
 0x196   : > { %v6003_v10 = vsel %vm6002_vm9, %v5987_v8, %v5989_v47  ;;  %9053 = vrot.lane.b32.xlu1 %v12933_v54, %s12267_s24  ;;  %11945 = vmatprep.mubr.msk.f32.mxu1 %vm12245_vm2, %v12242_v0  ;;  %v976_v11 = vadd.f32 %v957_v36, %v575_v46  ;;  %v965_v12 = vrot.slane %v958_v6, %v13046_v17  ;;  %v1099_v7 = vpop.f32.mrf.mxu0 }
 0x197   : > { %9061 = vrot.lane.b32.xlu0 %v12967_v63, %s12267_s24  ;;  %11631 = vmatpush1.msk.msra.mxu0 %vm254_vm0, %v6003_v10  ;;  %v972_v14 = vrot.slane %v930_v9, %v13046_v17  ;;  %v11877_v15 = vpop.f32.mrf.mxu1  ;;  %v9423_v10 = vld [vmem:[%s12416_s6 + $0x1c] sm:$0xf] }
 0x198   : > { %v6001_v16 = vpop.permute.xlu1 %6000  ;;  %11632 = vmatmul.mubr.msk.f32.vlgmr.msra.gmra.mxu0 %vm250_vm1, %v11629_v60  ;;  %v1101_v21 = vpop.f32.mrf.mxu0 }
 0x199   : > { %v5999_v23 = vpop.permute.xlu0 %5998  ;;  %6233 = vmatprep.mubr.f32.mxu0 %v12242_v0  ;;  %v973_v45 = vcombine.low %v965_v12, %v972_v14  ;;  %v1170_v24 = vpop.f32.mrf.mxu1  ;;  %v1323_v46 = vcombine.low %v1099_v7, %v1101_v21 }
 0x19a   : > { %v6009_v1 = vsel %vm6002_vm9, %v5999_v23, %v6001_v16  ;;  %9065 = vrot.lane.b32.xlu1 %v9041_v13, %s12267_s24  ;;  %v6008_v4 = vsel %vm6002_vm9, %v5997_v61, %v5999_v23  ;;  %vm10213_vm9 = vcmask 277504  }
 0x19b   : > { %9063 = vrot.lane.b32.xlu0 %v12975_v5, %s12267_s24  ;;  %11636 = vmatprep.subr.msk.mxu0 %vm254_vm0, %v6008_v4  ;;  %v977_v27 = vadd.f32 %v973_v45, %v603_v18  ;;  %v1172_v28 = vpop.f32.mrf.mxu1  ;;  %v1331_v32 = vrot.slane %v1323_v46, %v13046_v17  ;;  %s13957_s24 = scalar_lea.hbm %s14019_s4, %s11813_s12 }
 0x19c   : > { %11944 = vmatpush3.msk.msra.mxu1 %vm254_vm0, %v6009_v1  ;;  %11637 = vmatpush1.msk.msra.mxu0 %vm254_vm0, %v6007_v26  ;;  %v6377_v29 = vpop.permute.xlu1 %6376  ;;  %v1324_v33 = vcombine.low %v1170_v24, %v1172_v28 }
 0x19d   : > { %v6375_v34 = vpop.permute.xlu0 %6374  ;;  %11946 = vmatmul.mubr.msk.f32.vlgmr.msra.gmra.mxu1 %vm250_vm1, %v11629_v60  ;;  %11638 = vmatmul.mubr.msk.f32.vlgmr.msra.gmra.mxu0 %vm250_vm1, %v11629_v60  ;;  %979 = vst.msk [vmem:[#allocation2 + $0x8] sm:$0x3f] %vm13081_vm7, %v977_v27  ;;  %v1241_v35 = vpop.f32.mrf.mxu0 }
 0x19e   : > { %9439 = vrot.lane.b32.xlu1 %v12946_v57, %s12268_s23  ;;  %v6390_v37 = vsel %vm6388_vm10, %v6375_v34, %v6377_v29  ;;  %6548 = vmatprep.mubr.f32.mxu1 %v12242_v0  ;;  %v1338_v38 = vrot.slane %v1324_v33, %v13046_v17  ;;  %v1312_v39 = vpop.f32.mrf.mxu1 }
 0x19f   : > { %9437 = vrot.lane.b32.xlu0 %v12950_v58, %s12268_s23  ;;  %11642 = vmatprep.subr.msk.mxu0 %vm254_vm0, %v6390_v37  ;;  %v1243_v40 = vpop.f32.mrf.mxu0  ;;  %v1354_v43 = vrot.slane %v1312_v39, %v13046_v17 }
 0x1a0   : > { %v6381_v41 = vpop.permute.xlu1 %6380  ;;  %6477 = vmatprep.mubr.f32.mxu0 %v12242_v0  ;;  %v1339_v42 = vcombine.low %v1331_v32, %v1338_v38  ;;  %v1340_v20 = vcombine.low %v1241_v35, %v1243_v40  ;;  %v11882_v44 = vpop.f32.mrf.mxu1  ;;  %v11653_v40 = vld [vmem:[%s14016_s1 + $0x22] sm:$0x3] }
 0x1a1   : > { %v6379_v25 = vpop.permute.xlu0 %6378 }
 0x1a2   : > { %v6391_v47 = vsel %vm6388_vm10, %v6377_v29, %v6379_v25  ;;  %v6392_v48 = vsel %vm6388_vm10, %v6379_v25, %v6381_v41  ;;  %9443 = vrot.lane.b32.xlu1 %v12967_v63, %s12268_s23  ;;  %v1358_v50 = vadd.f32 %v1339_v42, %v976_v11  ;;  %v1347_v51 = vrot.slane %v1340_v20, %v13046_v17  ;;  %v1552_v52 = vpop.f32.mrf.mxu1  ;;  %v9805_v42 = vld [vmem:[%s12416_s6 + $0x1c] sm:$0xf] }
 0x1a3   : > { %9441 = vrot.lane.b32.xlu0 %v12961_v62, %s12268_s23  ;;  %11645 = vmatprep.subr.msk.mxu1 %vm254_vm0, %v6392_v48  ;;  %v1481_v3 = vpop.f32.mrf.mxu0 }
 0x1a4   : > { %11646 = vmatpush1.msk.msra.mxu1 %vm254_vm0, %v6391_v47  ;;  %v6383_v53 = vpop.permute.xlu1 %6382  ;;  %v985_v55 = vld [vmem:[#allocation2 + $0x8] sm:$0x3f]  ;;  %v1355_v56 = vcombine.low %v1347_v51, %v1354_v43  ;;  %v1554_v59 = vpop.f32.mrf.mxu1 }
 0x1a5   : > { %v6373_v60 = vpop.permute.xlu0 %6372  ;;  %11948 = vmatprep.subr.mxu1 %v12242_v0  ;;  %11647 = vmatmul.mubr.msk.f32.vlgmr.msra.gmra.mxu1 %vm250_vm1, %v11641_v49  ;;  %v1483_v22 = vpop.f32.mrf.mxu0  ;;  %v1706_v19 = vcombine.low %v1552_v52, %v1554_v59  ;;  %v6393_v21 = vsel %vm6388_vm10, %v6381_v41, %v6383_v53 }
 0x1a6   : > { %v6389_v61 = vsel %vm6388_vm10, %v6373_v60, %v6375_v34  ;;  %9445 = vrot.lane.b32.xlu1 %v12975_v5, %s12268_s23  ;;  %11950 = vmatprep.mubr.msk.f32.mxu1 %vm12245_vm2, %v12242_v0  ;;  %v1359_v36 = vadd.f32 %v1355_v56, %v985_v55  ;;  %v1705_v6 = vcombine.low %v1481_v3, %v1483_v22 }
 0x1a7   : > { %9435 = vrot.lane.b32.xlu0 %v12933_v54, %s12268_s23  ;;  %11643 = vmatpush1.msk.msra.mxu0 %vm254_vm0, %v6389_v61  ;;  %v1720_v8 = vrot.slane %v1706_v19, %v13046_v17 }
 0x1a8   : > { %v6387_v9 = vpop.permute.xlu1 %6386  ;;  %11644 = vmatmul.mubr.msk.f32.vlgmr.msra.gmra.mxu0 %vm250_vm1, %v11641_v49  ;;  %1361 = vst.msk [vmem:[#allocation2 + $0x8] sm:$0x3f] %vm13081_vm7, %v1359_v36  ;;  %v1713_v11 = vrot.slane %v1705_v6, %v13046_v17  ;;  %v1623_v12 = vpop.f32.mrf.mxu0 }
 0x1a9   : > { %v6385_v7 = vpop.permute.xlu0 %6384  ;;  %6619 = vmatprep.mubr.f32.mxu0 %v12242_v0  ;;  %v1694_v13 = vpop.f32.mrf.mxu1 }
 0x1aa   : > { %v6394_v14 = vsel %vm6388_vm10, %v6383_v53, %v6385_v7  ;;  %v6395_v15 = vsel %vm6388_vm10, %v6385_v7, %v6387_v9  ;;  %9819 = vrot.lane.b32.xlu1 %v12950_v58, %s12269_s28  ;;  %v1721_v16 = vcombine.low %v1713_v11, %v1720_v8  ;;  %v1625_v18 = vpop.f32.mrf.mxu0  ;;  %v1736_v23 = vrot.slane %v1694_v13, %v13046_v17 }
 0x1ab   : > { %9447 = vrot.lane.b32.xlu0 %v9423_v10, %s12268_s23  ;;  %11648 = vmatprep.subr.msk.mxu0 %vm254_vm0, %v6394_v14  ;;  %v1722_v45 = vcombine.low %v1623_v12, %v1625_v18  ;;  %v11887_v24 = vpop.f32.mrf.mxu1  ;;  %vm10740_vm10 = vcmask 556032   ;;  %s12278_s23 = smov [#allocation9]  }
 0x1ac   : > { %11949 = vmatpush3.msk.msra.mxu1 %vm254_vm0, %v6395_v15  ;;  %11649 = vmatpush1.msk.msra.mxu0 %vm254_vm0, %v6393_v21  ;;  %v6763_v46 = vpop.permute.xlu1 %6762  ;;  %v1740_v1 = vadd.f32 %v1721_v16, %v1358_v50  ;;  %s12172_s14 = sshll.u32 %s12278_s23, 4  ;;  %s12173_s14 = int_to_ptr.vmem [resolvable:$false] %s12172_s14 }
 0x1ad   : > { %v6761_v4 = vpop.permute.xlu0 %6760  ;;  %11951 = vmatmul.mubr.msk.f32.vlgmr.msra.gmra.mxu1 %vm250_vm1, %v11641_v49  ;;  %11650 = vmatmul.mubr.msk.f32.vlgmr.msra.gmra.mxu0 %vm250_vm1, %v11641_v49  ;;  %v1729_v26 = vrot.slane %v1722_v45, %v13046_v17 }
 0x1ae   : > { %v6776_v27 = vsel %vm6774_vm12, %v6761_v4, %v6763_v46  ;;  %9823 = vrot.lane.b32.xlu1 %v12961_v62, %s12269_s28  ;;  %6934 = vmatprep.mubr.f32.mxu1 %v12242_v0 }
 0x1af   : > { %9821 = vrot.lane.b32.xlu0 %v12946_v57, %s12269_s28  ;;  %11654 = vmatprep.subr.msk.mxu0 %vm254_vm0, %v6776_v27  ;;  %v1367_v28 = vld [vmem:[#allocation2 + $0x8] sm:$0x3f]  ;;  %v1737_v29 = vcombine.low %v1729_v26, %v1736_v23 }
 0x1b0   : > { %v6767_v32 = vpop.permute.xlu1 %6766  ;;  %6863 = vmatprep.mubr.f32.mxu0 %v12242_v0  ;;  %v1863_v33 = vpop.f32.mrf.mxu0 }
 0x1b1   : > { %v6765_v34 = vpop.permute.xlu0 %6764  ;;  %v1741_v35 = vadd.f32 %v1737_v29, %v1367_v28  ;;  %v1934_v37 = vpop.f32.mrf.mxu1 }
 0x1b2   : > { %v6777_v38 = vsel %vm6774_vm12, %v6763_v46, %v6765_v34  ;;  %v6778_v39 = vsel %vm6774_vm12, %v6765_v34, %v6767_v32  ;;  %9817 = vrot.lane.b32.xlu1 %v12933_v54, %s12269_s28  ;;  %v1865_v41 = vpop.f32.mrf.mxu0 }
 0x1b3   : > { %9825 = vrot.lane.b32.xlu0 %v12967_v63, %s12269_s28  ;;  %11657 = vmatprep.subr.msk.mxu1 %vm254_vm0, %v6778_v39  ;;  %1743 = vst.msk [vmem:[#allocation2 + $0x8] sm:$0x3f] %vm13081_vm7, %v1741_v35  ;;  %v2087_v43 = vcombine.low %v1863_v33, %v1865_v41  ;;  %v1936_v20 = vpop.f32.mrf.mxu1 }
 0x1b4   : > { %11658 = vmatpush1.msk.msra.mxu1 %vm254_vm0, %v6777_v38  ;;  %v6769_v44 = vpop.permute.xlu1 %6768  ;;  %v2088_v25 = vcombine.low %v1934_v37, %v1936_v20 }
 0x1b5   : > { %v6759_v47 = vpop.permute.xlu0 %6758  ;;  %11953 = vmatprep.subr.mxu1 %v12242_v0  ;;  %11659 = vmatmul.mubr.msk.f32.vlgmr.msra.gmra.mxu1 %vm250_vm1, %v11653_v40  ;;  %v2095_v48 = vrot.slane %v2087_v43, %v13046_v17  ;;  %v2076_v49 = vpop.f32.mrf.mxu1  ;;  %v6779_v6 = vsel %vm6774_vm12, %v6767_v32, %v6769_v44 }
 0x1b6   : > { %v6775_v50 = vsel %vm6774_vm12, %v6759_v47, %v6761_v4  ;;  %9829 = vrot.lane.b32.xlu1 %v9805_v42, %s12269_s28  ;;  %11955 = vmatprep.mubr.msk.f32.mxu1 %vm12245_vm2, %v12242_v0  ;;  %v2102_v51 = vrot.slane %v2088_v25, %v13046_v17  ;;  %v2118_v59 = vrot.slane %v2076_v49, %v13046_v17 }
 0x1b7   : > { %9827 = vrot.lane.b32.xlu0 %v12975_v5, %s12269_s28  ;;  %11655 = vmatpush1.msk.msra.mxu0 %vm254_vm0, %v6775_v50  ;;  %v2005_v52 = vpop.f32.mrf.mxu0  ;;  %v11892_v3 = vpop.f32.mrf.mxu1  ;;  %s12275_s28 = smov 68  }
 0x1b8   : > { %v6773_v53 = vpop.permute.xlu1 %6772  ;;  %11656 = vmatmul.mubr.msk.f32.vlgmr.msra.gmra.mxu0 %vm250_vm1, %v11653_v40  ;;  %v2103_v55 = vcombine.low %v2095_v48, %v2102_v51 }
 0x1b9   : > { %v6771_v56 = vpop.permute.xlu0 %6770  ;;  %7005 = vmatprep.mubr.f32.mxu0 %v12242_v0  ;;  %v2007_v60 = vpop.f32.mrf.mxu0 }
 0x1ba   : > { %v6780_v22 = vsel %vm6774_vm12, %v6769_v44, %v6771_v56  ;;  %v6781_v19 = vsel %vm6774_vm12, %v6771_v56, %v6773_v53  ;;  %10203 = vrot.lane.b32.xlu1 %v12946_v57, %s12270_s8  ;;  %v2122_v61 = vadd.f32 %v2103_v55, %v1740_v1  ;;  %v2104_v36 = vcombine.low %v2005_v52, %v2007_v60  ;;  %v1749_v57 = vld [vmem:[#allocation2 + $0x8] sm:$0x3f]  ;;  %v10187_v1 = vld [vmem:[%s12416_s6 + $0x1c] sm:$0xf]  ;;  %v11677_v53 = vld [vmem:[%s14016_s1 + $0x26] sm:$0x3] }
 0x1bb   : > { %10201 = vrot.lane.b32.xlu0 %v12950_v58, %s12270_s8  ;;  %11660 = vmatprep.subr.msk.mxu0 %vm254_vm0, %v6780_v22  ;;  %vm13818_vm12 = vcmp.lt.s32.totalorder %v564_v30, 256 }
 0x1bc   : > { %11954 = vmatpush3.msk.msra.mxu1 %vm254_vm0, %v6781_v19  ;;  %11661 = vmatpush1.msk.msra.mxu0 %vm254_vm0, %v6779_v6  ;;  %v7148_v8 = vpop.permute.xlu1 %7147  ;;  %v2111_v9 = vrot.slane %v2104_v36, %v13046_v17  ;;  %v2316_v10 = vpop.f32.mrf.mxu1 }
 0x1bd   : > { %v7146_v11 = vpop.permute.xlu0 %7145  ;;  %11956 = vmatmul.mubr.msk.f32.vlgmr.msra.gmra.mxu1 %vm250_vm1, %v11653_v40  ;;  %11662 = vmatmul.mubr.msk.f32.vlgmr.msra.gmra.mxu0 %vm250_vm1, %v11653_v40 }
 0x1be   : > { %v7159_v12 = vsel %vm7157_vm13, %v7146_v11, %v7148_v8  ;;  %10207 = vrot.lane.b32.xlu1 %v12967_v63, %s12270_s8  ;;  %7316 = vmatprep.mubr.f32.mxu1 %v12242_v0  ;;  %v2119_v58 = vcombine.low %v2111_v9, %v2118_v59  ;;  %v2318_v7 = vpop.f32.mrf.mxu1 }
 0x1bf   : > { %10205 = vrot.lane.b32.xlu0 %v12961_v62, %s12270_s8  ;;  %11666 = vmatprep.subr.msk.mxu0 %vm254_vm0, %v7159_v12  ;;  %v2245_v13 = vpop.f32.mrf.mxu0  ;;  %v2470_v14 = vcombine.low %v2316_v10, %v2318_v7  ;;  %v11665_v62 = vld [vmem:[%s14016_s1 + $0x24] sm:$0x3] }
 0x1c0   : > { %v7152_v15 = vpop.permute.xlu1 %7151  ;;  %7245 = vmatprep.mubr.f32.mxu0 %v12242_v0  ;;  %v2123_v16 = vadd.f32 %v2119_v58, %v1749_v57 }
 0x1c1   : > { %v7150_v18 = vpop.permute.xlu0 %7149  ;;  %v2247_v21 = vpop.f32.mrf.mxu0  ;;  %v2484_v24 = vrot.slane %v2470_v14, %v13046_v17 }
 0x1c2   : > { %v7160_v63 = vsel %vm7157_vm13, %v7148_v8, %v7150_v18  ;;  %v7161_v23 = vsel %vm7157_vm13, %v7150_v18, %v7152_v15  ;;  %10209 = vrot.lane.b32.xlu1 %v12975_v5, %s12270_s8  ;;  %2125 = vst.msk [vmem:[#allocation2 + $0x8] sm:$0x3f] %vm13081_vm7, %v2123_v16  ;;  %v2469_v45 = vcombine.low %v2245_v13, %v2247_v21 }
 0x1c3   : > { %10199 = vrot.lane.b32.xlu0 %v12933_v54, %s12270_s8  ;;  %11669 = vmatprep.subr.msk.mxu1 %vm254_vm0, %v7161_v23 }
 0x1c4   : > { %11670 = vmatpush1.msk.msra.mxu1 %vm254_vm0, %v7160_v63  ;;  %v7154_v46 = vpop.permute.xlu1 %7153  ;;  %v2477_v5 = vrot.slane %v2469_v45, %v13046_v17  ;;  %v2387_v4 = vpop.f32.mrf.mxu0  ;;  %v10577_v63 = vld [vmem:[%s14017_s2] sm:$0x3] }
 0x1c5   : > { %v7144_v26 = vpop.permute.xlu0 %7143  ;;  %11958 = vmatprep.subr.mxu1 %v12242_v0  ;;  %11671 = vmatmul.mubr.msk.f32.vlgmr.msra.gmra.mxu1 %vm250_vm1, %v11665_v62  ;;  %v2458_v27 = vpop.f32.mrf.mxu1  ;;  %v7162_v42 = vsel %vm7157_vm13, %v7152_v15, %v7154_v46 }
 0x1c6   : > { %v7158_v28 = vsel %vm7157_vm13, %v7144_v26, %v7146_v11  ;;  %11960 = vmatprep.mubr.msk.f32.mxu1 %vm12245_vm2, %v12242_v0  ;;  %v2485_v54 = vcombine.low %v2477_v5, %v2484_v24  ;;  %v2389_v29 = vpop.f32.mrf.mxu0  ;;  %v2500_v32 = vrot.slane %v2458_v27, %v13046_v17  ;;  %v12271_v5 = vmov 0  }
 0x1c7   : > { %10211 = vrot.lane.b32.xlu0 %v10187_v1, %s12270_s8  ;;  %11667 = vmatpush1.msk.msra.mxu0 %vm254_vm0, %v7158_v28  ;;  %v2486_v33 = vcombine.low %v2387_v4, %v2389_v29  ;;  %v11897_v34 = vpop.f32.mrf.mxu1  ;;  %s13829_s8 = scalar_lea.vmem [#allocation9], %s11449_s7 }
 0x1c8   : > { %v7528_v35 = vpop.permute.xlu1 %7527  ;;  %11668 = vmatmul.mubr.msk.f32.vlgmr.msra.gmra.mxu0 %vm250_vm1, %v11665_v62  ;;  %v2504_v37 = vadd.f32 %v2485_v54, %v2122_v61  ;;  %12102 = vset.pattern.permute.xlu1 %v12271_v5  ;;  %s11359_s19 = sshll.u32 %s13829_s8, 4  ;;  %s13965_s19 = int_to_ptr.vmem [resolvable:$true] %s11359_s19 }
 0x1c9   : > { %v7156_v38 = vpop.permute.xlu0 %7155  ;;  %7387 = vmatprep.mubr.f32.mxu0 %v12242_v0  ;;  %v2493_v39 = vrot.slane %v2486_v33, %v13046_v17  ;;  %v2131_v41 = vld [vmem:[#allocation2 + $0x8] sm:$0x3f]  ;;  %10580 = vperm.xlu1 %12102, %v10577_v63   ;;  %s12168_s21 = scalar_lea.vmem %s13965_s19, 1024  ;;  %p12175_p10 = scmp.lt.s32.totalorder %s13965_s19, %s12173_s14 }
 0x1ca   : > { %v7163_v40 = vsel %vm7157_vm13, %v7154_v46, %v7156_v38  ;;  %11959 = vmatpush3.msk.msra.mxu1 %vm254_vm0, %v7156_v38  ;;  %12103 = vset.pattern.permute.xlu0 %v12271_v5  ;;  %v10650_v5 = vld [vmem:[%s14017_s2] sm:$0x3]  ;;  %p12169_p8 = scmp.ne.s32.totalorder %s13965_s19, %s12168_s21 }
 0x1cb   : > { %11672 = vmatprep.subr.msk.mxu0 %vm254_vm0, %v7163_v40  ;;  %11961 = vmatmul.mubr.msk.f32.vlgmr.msra.gmra.mxu1 %vm250_vm1, %v11665_v62  ;;  %v2501_v43 = vcombine.low %v2493_v39, %v2500_v32  ;;  %v11689_v32 = vld [vmem:[%s14016_s1 + $0x28] sm:$0x3] }
 0x1cc   : > { %11673 = vmatpush1.msk.msra.mxu0 %vm254_vm0, %v7162_v42  ;;  %v7532_v20 = vpop.permute.xlu1 %7531  ;;  %7698 = vmatprep.mubr.f32.mxu1 %v12242_v0  ;;  %v2627_v44 = vpop.f32.mrf.mxu0  ;;  %v10601_v42 = vld [vmem:[%s14017_s2] sm:$0x3]  ;;  %p12170_p5 = pnand %p12169_p8, %p14039_p3 }
 0x1cd   : > { %v7530_v25 = vpop.permute.xlu0 %7529  ;;  %11674 = vmatmul.mubr.msk.f32.vlgmr.msra.gmra.mxu0 %vm250_vm1, %v11665_v62  ;;  %v2505_v47 = vadd.f32 %v2501_v43, %v2131_v41  ;;  %v2698_v48 = vpop.f32.mrf.mxu1  ;;  %v10625_v41 = vld [vmem:[%s14017_s2] sm:$0x3]  ;;  %10604 = vperm.xlu0 %12103, %v10601_v42  }
 0x1ce   : > { %v7541_v49 = vsel %vm7539_vm14, %v7528_v35, %v7530_v25  ;;  %7627 = vmatprep.mubr.f32.mxu0 %v12242_v0  ;;  %v2629_v50 = vpop.f32.mrf.mxu0  ;;  %v7542_v36 = vsel %vm7539_vm14, %v7530_v25, %v7532_v20  ;;  %10628 = vperm.xlu1 %12102, %v10625_v41   ;;  %p12171_p7 = pneg %p12170_p5 }
 0x1cf   : > { %11678 = vmatprep.subr.msk.mxu0 %vm254_vm0, %v7541_v49  ;;  %2507 = vst.msk [vmem:[#allocation2 + $0x8] sm:$0x3f] %vm13081_vm7, %v2505_v47  ;;  %v2851_v51 = vcombine.low %v2627_v44, %v2629_v50  ;;  %v2700_v52 = vpop.f32.mrf.mxu1  ;;  %v10670_v49 = vld [vmem:[%s14017_s2] sm:$0x3] }
 0x1d0   : > { %v7526_v3 = vpop.permute.xlu1 %7525  ;;  %v2852_v55 = vcombine.low %v2698_v48, %v2700_v52 }
 0x1d1   : > { %v7540_v56 = vsel %vm7539_vm14, %v7526_v3, %v7528_v35  ;;  %v7534_v59 = vpop.permute.xlu0 %7533  ;;  %v2859_v60 = vrot.slane %v2851_v51, %v13046_v17  ;;  %v2840_v22 = vpop.f32.mrf.mxu1 }
 0x1d2   : > { %v7543_v19 = vsel %vm7539_vm14, %v7532_v20, %v7534_v59  ;;  %11679 = vmatpush1.msk.msra.mxu0 %vm254_vm0, %v7540_v56  ;;  %v2866_v61 = vrot.slane %v2852_v55, %v13046_v17  ;;  %v2882_v13 = vrot.slane %v2840_v22, %v13046_v17  ;;  %10673 = vperm.xlu1 %12102, %v10670_v49   ;;  %v11713_v49 = vld [vmem:[%s14016_s1 + $0x2c] sm:$0x3] }
 0x1d3   : > { %11681 = vmatprep.subr.msk.mxu1 %vm254_vm0, %v7543_v19  ;;  %11680 = vmatmul.mubr.msk.f32.vlgmr.msra.gmra.mxu0 %vm250_vm1, %v11677_v53  ;;  %v2769_v6 = vpop.f32.mrf.mxu0  ;;  %v11902_v8 = vpop.f32.mrf.mxu1  ;;  %v10720_v19 = vld [vmem:[%s14017_s2] sm:$0x3] }
 0x1d4   : > { %11682 = vmatpush1.msk.msra.mxu1 %vm254_vm0, %v7542_v36  ;;  %v7538_v9 = vpop.permute.xlu1 %7537  ;;  %7769 = vmatprep.mubr.f32.mxu0 %v12242_v0  ;;  %v2867_v10 = vcombine.low %v2859_v60, %v2866_v61  ;;  %v10695_v61 = vld [vmem:[%s14017_s2] sm:$0x3] }
 0x1d5   : > { %v7536_v11 = vpop.permute.xlu0 %7535  ;;  %11963 = vmatprep.subr.mxu1 %v12242_v0  ;;  %11683 = vmatmul.mubr.msk.f32.vlgmr.msra.gmra.mxu1 %vm250_vm1, %v11677_v53  ;;  %v2771_v7 = vpop.f32.mrf.mxu0 }
 0x1d6   : > { %v7544_v57 = vsel %vm7539_vm14, %v7534_v59, %v7536_v11  ;;  %v7545_v12 = vsel %vm7539_vm14, %v7536_v11, %v7538_v9  ;;  %11964 = vmatpush3.msk.msra.mxu1 %vm254_vm0, %v7538_v9  ;;  %11965 = vmatprep.mubr.msk.f32.mxu1 %vm12245_vm2, %v12242_v0  ;;  %v2886_v58 = vadd.f32 %v2867_v10, %v2504_v37  ;;  %v2513_v62 = vld [vmem:[#allocation2 + $0x8] sm:$0x3f] }
 0x1d7   : > { %11684 = vmatprep.subr.msk.mxu0 %vm254_vm0, %v7545_v12  ;;  %v2868_v14 = vcombine.low %v2769_v6, %v2771_v7  ;;  %10698 = vperm.xlu0 %12103, %v10695_v61  }
 0x1d8   : > { %11685 = vmatpush1.msk.msra.mxu0 %vm254_vm0, %v7544_v57  ;;  %v7912_v15 = vpop.permute.xlu1 %7911  ;;  %v3080_v16 = vpop.f32.mrf.mxu1  ;;  %10723 = vperm.xlu1 %12102, %v10720_v19  }
 0x1d9   : > { %v7910_v18 = vpop.permute.xlu0 %7909  ;;  %11966 = vmatmul.mubr.msk.f32.vlgmr.msra.gmra.mxu1 %vm250_vm1, %v11677_v53  ;;  %11686 = vmatmul.mubr.msk.f32.vlgmr.msra.gmra.mxu0 %vm250_vm1, %v11677_v53  ;;  %v2875_v21 = vrot.slane %v2868_v14, %v13046_v17 }
 0x1da   : > { %v7923_v23 = vsel %vm7921_vm15, %v7910_v18, %v7912_v15  ;;  %8080 = vmatprep.mubr.f32.mxu1 %v12242_v0  ;;  %8009 = vmatprep.mubr.f32.mxu0 %v12242_v0  ;;  %v3082_v45 = vpop.f32.mrf.mxu1 }
 0x1db   : > { %11690 = vmatprep.subr.msk.mxu0 %vm254_vm0, %v7923_v23  ;;  %v2883_v24 = vcombine.low %v2875_v21, %v2882_v13  ;;  %v3009_v46 = vpop.f32.mrf.mxu0  ;;  %v3234_v1 = vcombine.low %v3080_v16, %v3082_v45  ;;  %10653 = vperm.xlu0 %12103, %v10650_v5  }
 0x1dc   : > { %v7916_v4 = vpop.permute.xlu1 %7915 }
 0x1dd   : > { %v7914_v26 = vpop.permute.xlu0 %7913  ;;  %v2887_v27 = vadd.f32 %v2883_v24, %v2513_v62  ;;  %v3011_v28 = vpop.f32.mrf.mxu0  ;;  %v3248_v34 = vrot.slane %v3234_v1, %v13046_v17  ;;  %v10567_v1 = vld [vmem:[%s14017_s2] sm:$0x3] }
 0x1de   : > { %v7924_v54 = vsel %vm7921_vm15, %v7912_v15, %v7914_v26  ;;  %v7925_v29 = vsel %vm7921_vm15, %v7914_v26, %v7916_v4  ;;  %v3233_v33 = vcombine.low %v3009_v46, %v3011_v28  ;;  %10570 = vperm.xlu1 %12102, %v10567_v1  }
 0x1df   : > { %11693 = vmatprep.subr.msk.mxu1 %vm254_vm0, %v7925_v29  ;;  %2889 = vst.msk [vmem:[#allocation2 + $0x8] sm:$0x3f] %vm13081_vm7, %v2887_v27 }
 0x1e0   : > { %11694 = vmatpush1.msk.msra.mxu1 %vm254_vm0, %v7924_v54  ;;  %v7918_v35 = vpop.permute.xlu1 %7917  ;;  %v3241_v37 = vrot.slane %v3233_v33, %v13046_v17  ;;  %v3151_v38 = vpop.f32.mrf.mxu0 }
 0x1e1   : > { %v7908_v39 = vpop.permute.xlu0 %7907  ;;  %11968 = vmatprep.subr.mxu1 %v12242_v0  ;;  %11695 = vmatmul.mubr.msk.f32.vlgmr.msra.gmra.mxu1 %vm250_vm1, %v11689_v32  ;;  %v3222_v40 = vpop.f32.mrf.mxu1  ;;  %v7926_v56 = vsel %vm7921_vm15, %v7916_v4, %v7918_v35 }
 0x1e2   : > { %v7922_v43 = vsel %vm7921_vm15, %v7908_v39, %v7910_v18  ;;  %11970 = vmatprep.mubr.msk.f32.mxu1 %vm12245_vm2, %v12242_v0  ;;  %v3249_v20 = vcombine.low %v3241_v37, %v3248_v34  ;;  %v3153_v44 = vpop.f32.mrf.mxu0  ;;  %v3264_v25 = vrot.slane %v3222_v40, %v13046_v17 }
 0x1e3   : > { %11691 = vmatpush1.msk.msra.mxu0 %vm254_vm0, %v7922_v43  ;;  %v3250_v47 = vcombine.low %v3151_v38, %v3153_v44  ;;  %v11907_v48 = vpop.f32.mrf.mxu1 }
 0x1e4   : > { %v8292_v50 = vpop.permute.xlu1 %8291  ;;  %11692 = vmatmul.mubr.msk.f32.vlgmr.msra.gmra.mxu0 %vm250_vm1, %v11689_v32  ;;  %v3268_v51 = vadd.f32 %v3249_v20, %v2886_v58  ;;  %v11701_v58 = vld [vmem:[%s14016_s1 + $0x2a] sm:$0x3] }
 0x1e5   : > { %v7920_v52 = vpop.permute.xlu0 %7919  ;;  %8151 = vmatprep.mubr.f32.mxu0 %v12242_v0  ;;  %v3257_v3 = vrot.slane %v3250_v47, %v13046_v17 }
 0x1e6   : > { %v7927_v53 = vsel %vm7921_vm15, %v7918_v35, %v7920_v52  ;;  %11969 = vmatpush3.msk.msra.mxu1 %vm254_vm0, %v7920_v52  ;;  %v2895_v55 = vld [vmem:[#allocation2 + $0x8] sm:$0x3f] }
 0x1e7   : > { %11696 = vmatprep.subr.msk.mxu0 %vm254_vm0, %v7927_v53  ;;  %11971 = vmatmul.mubr.msk.f32.vlgmr.msra.gmra.mxu1 %vm250_vm1, %v11689_v32  ;;  %v3265_v59 = vcombine.low %v3257_v3, %v3264_v25 }
 0x1e8   : > { %11697 = vmatpush1.msk.msra.mxu0 %vm254_vm0, %v7926_v56  ;;  %v8296_v60 = vpop.permute.xlu1 %8295  ;;  %8462 = vmatprep.mubr.f32.mxu1 %v12242_v0  ;;  %v3391_v22 = vpop.f32.mrf.mxu0 }
 0x1e9   : > { %v8294_v36 = vpop.permute.xlu0 %8293  ;;  %11698 = vmatmul.mubr.msk.f32.vlgmr.msra.gmra.mxu0 %vm250_vm1, %v11689_v32  ;;  %v3269_v6 = vadd.f32 %v3265_v59, %v2895_v55  ;;  %v3462_v8 = vpop.f32.mrf.mxu1 }
 0x1ea   : > { %v8305_v9 = vsel %vm8303_vm3, %v8292_v50, %v8294_v36  ;;  %8391 = vmatprep.mubr.f32.mxu0 %v12242_v0  ;;  %v3393_v10 = vpop.f32.mrf.mxu0  ;;  %v8306_v63 = vsel %vm8303_vm3, %v8294_v36, %v8296_v60 }
 0x1eb   : > { %11702 = vmatprep.subr.msk.mxu0 %vm254_vm0, %v8305_v9  ;;  %3271 = vst.msk [vmem:[#allocation2 + $0x8] sm:$0x3f] %vm13081_vm7, %v3269_v6  ;;  %v3615_v11 = vcombine.low %v3391_v22, %v3393_v10  ;;  %v3464_v57 = vpop.f32.mrf.mxu1 }
 0x1ec   : > { %v8290_v12 = vpop.permute.xlu1 %8289  ;;  %v3616_v7 = vcombine.low %v3462_v8, %v3464_v57 }
 0x1ed   : > { %v8304_v13 = vsel %vm8303_vm3, %v8290_v12, %v8292_v50  ;;  %v8298_v14 = vpop.permute.xlu0 %8297  ;;  %v3623_v15 = vrot.slane %v3615_v11, %v13046_v17  ;;  %v3604_v16 = vpop.f32.mrf.mxu1 }
 0x1ee   : > { %v8307_v18 = vsel %vm8303_vm3, %v8296_v60, %v8298_v14  ;;  %11703 = vmatpush1.msk.msra.mxu0 %vm254_vm0, %v8304_v13  ;;  %v3630_v21 = vrot.slane %v3616_v7, %v13046_v17  ;;  %v3646_v54 = vrot.slane %v3604_v16, %v13046_v17 }
 0x1ef   : > { %11705 = vmatprep.subr.msk.mxu1 %vm254_vm0, %v8307_v18  ;;  %11704 = vmatmul.mubr.msk.f32.vlgmr.msra.gmra.mxu0 %vm250_vm1, %v11701_v58  ;;  %v3533_v23 = vpop.f32.mrf.mxu0  ;;  %v11912_v62 = vpop.f32.mrf.mxu1 }
 0x1f0   : > { %11706 = vmatpush1.msk.msra.mxu1 %vm254_vm0, %v8306_v63  ;;  %v8302_v45 = vpop.permute.xlu1 %8301  ;;  %8533 = vmatprep.mubr.f32.mxu0 %v12242_v0  ;;  %v3631_v24 = vcombine.low %v3623_v15, %v3630_v21  ;;  %v11725_v63 = vld [vmem:[%s14016_s1 + $0x2e] sm:$0x3] }
 0x1f1   : > { %v8300_v46 = vpop.permute.xlu0 %8299  ;;  %11973 = vmatprep.subr.mxu1 %v12242_v0  ;;  %11707 = vmatmul.mubr.msk.f32.vlgmr.msra.gmra.mxu1 %vm250_vm1, %v11701_v58  ;;  %v3535_v28 = vpop.f32.mrf.mxu0 }
 0x1f2   : > { %v8308_v4 = vsel %vm8303_vm3, %v8298_v14, %v8300_v46  ;;  %v8309_v26 = vsel %vm8303_vm3, %v8300_v46, %v8302_v45  ;;  %11974 = vmatpush3.msk.msra.mxu1 %vm254_vm0, %v8302_v45  ;;  %11975 = vmatprep.mubr.msk.f32.mxu1 %vm12245_vm2, %v12242_v0  ;;  %v3650_v27 = vadd.f32 %v3631_v24, %v3268_v51  ;;  %v3277_v38 = vld [vmem:[#allocation2 + $0x8] sm:$0x3f] }
 0x1f3   : > { %11708 = vmatprep.subr.msk.mxu0 %vm254_vm0, %v8309_v26  ;;  %v3632_v29 = vcombine.low %v3533_v23, %v3535_v28 }
 0x1f4   : > { %11709 = vmatpush1.msk.msra.mxu0 %vm254_vm0, %v8308_v4  ;;  %v8676_v32 = vpop.permute.xlu1 %8675  ;;  %v3848_v33 = vpop.f32.mrf.mxu1 }
 0x1f5   : > { %v8674_v34 = vpop.permute.xlu0 %8673  ;;  %11976 = vmatmul.mubr.msk.f32.vlgmr.msra.gmra.mxu1 %vm250_vm1, %v11701_v58  ;;  %11710 = vmatmul.mubr.msk.f32.vlgmr.msra.gmra.mxu0 %vm250_vm1, %v11701_v58  ;;  %v3639_v35 = vrot.slane %v3632_v29, %v13046_v17 }
 0x1f6   : > { %v8687_v37 = vsel %vm8685_vm4, %v8674_v34, %v8676_v32  ;;  %8844 = vmatprep.mubr.f32.mxu1 %v12242_v0  ;;  %8773 = vmatprep.mubr.f32.mxu0 %v12242_v0  ;;  %v3850_v39 = vpop.f32.mrf.mxu1 }
 0x1f7   : > { %11714 = vmatprep.subr.msk.mxu0 %vm254_vm0, %v8687_v37  ;;  %v3647_v40 = vcombine.low %v3639_v35, %v3646_v54  ;;  %v3777_v41 = vpop.f32.mrf.mxu0  ;;  %v4002_v42 = vcombine.low %v3848_v33, %v3850_v39 }
 0x1f8   : > { %v8680_v43 = vpop.permute.xlu1 %8679 }
 0x1f9   : > { %v8678_v20 = vpop.permute.xlu0 %8677  ;;  %v3651_v44 = vadd.f32 %v3647_v40, %v3277_v38  ;;  %v3779_v25 = vpop.f32.mrf.mxu0  ;;  %v4016_v51 = vrot.slane %v4002_v42, %v13046_v17 }
 0x1fa   : > { %v8688_v47 = vsel %vm8685_vm4, %v8676_v32, %v8678_v20  ;;  %v8689_v48 = vsel %vm8685_vm4, %v8678_v20, %v8680_v43  ;;  %v4001_v50 = vcombine.low %v3777_v41, %v3779_v25 }
 0x1fb   : > { %11717 = vmatprep.subr.msk.mxu1 %vm254_vm0, %v8689_v48  ;;  %3653 = vst.msk [vmem:[#allocation2 + $0x8] sm:$0x3f] %vm13081_vm7, %v3651_v44 }
 0x1fc   : > { %11718 = vmatpush1.msk.msra.mxu1 %vm254_vm0, %v8688_v47  ;;  %v8682_v52 = vpop.permute.xlu1 %8681  ;;  %v4009_v3 = vrot.slane %v4001_v50, %v13046_v17  ;;  %v3990_v53 = vpop.f32.mrf.mxu1 }
 0x1fd   : > { %v8672_v55 = vpop.permute.xlu0 %8671  ;;  %11978 = vmatprep.subr.mxu1 %v12242_v0  ;;  %11719 = vmatmul.mubr.msk.f32.vlgmr.msra.gmra.mxu1 %vm250_vm1, %v11713_v49  ;;  %v3919_v56 = vpop.f32.mrf.mxu0  ;;  %v4032_v6 = vrot.slane %v3990_v53, %v13046_v17  ;;  %v8690_v57 = vsel %vm8685_vm4, %v8680_v43, %v8682_v52 }
 0x1fe   : > { %v8686_v59 = vsel %vm8685_vm4, %v8672_v55, %v8674_v34  ;;  %11980 = vmatprep.mubr.msk.f32.mxu1 %vm12245_vm2, %v12242_v0  ;;  %v4017_v60 = vcombine.low %v4009_v3, %v4016_v51  ;;  %v11917_v22 = vpop.f32.mrf.mxu1  ;;  %v11737_v3 = vld [vmem:[%s14016_s1 + $0x30] sm:$0x3] }
 0x1ff   : > { %11715 = vmatpush1.msk.msra.mxu0 %vm254_vm0, %v8686_v59  ;;  %v3921_v19 = vpop.f32.mrf.mxu0 }
 0x200   : > { %v9056_v61 = vpop.permute.xlu1 %9055  ;;  %11716 = vmatmul.mubr.msk.f32.vlgmr.msra.gmra.mxu0 %vm250_vm1, %v11713_v49  ;;  %v13519_v36 = vadd.f32 %v4017_v60, %v3650_v27  ;;  %v4018_v8 = vcombine.low %v3919_v56, %v3921_v19 }
 0x201   : > { %v8684_v9 = vpop.permute.xlu0 %8683  ;;  %8915 = vmatprep.mubr.f32.mxu0 %v12242_v0 }
 0x202   : > { %v8691_v10 = vsel %vm8685_vm4, %v8682_v52, %v8684_v9  ;;  %11979 = vmatpush3.msk.msra.mxu1 %vm254_vm0, %v8684_v9  ;;  %v4025_v11 = vrot.slane %v4018_v8, %v13046_v17  ;;  %v3659_v12 = vld [vmem:[#allocation2 + $0x8] sm:$0x3f] }
 0x203   : > { %11720 = vmatprep.subr.msk.mxu0 %vm254_vm0, %v8691_v10  ;;  %11981 = vmatmul.mubr.msk.f32.vlgmr.msra.gmra.mxu1 %vm250_vm1, %v11713_v49 }
 0x204   : > { %11721 = vmatpush1.msk.msra.mxu0 %vm254_vm0, %v8690_v57  ;;  %v9060_v58 = vpop.permute.xlu1 %9059  ;;  %9226 = vmatprep.mubr.f32.mxu1 %v12242_v0  ;;  %v4033_v7 = vcombine.low %v4025_v11, %v4032_v6 }
 0x205   : > { %v9058_v13 = vpop.permute.xlu0 %9057  ;;  %11722 = vmatmul.mubr.msk.f32.vlgmr.msra.gmra.mxu0 %vm250_vm1, %v11713_v49  ;;  %v4234_v14 = vpop.f32.mrf.mxu1 }
 0x206   : > { %v9069_v15 = vsel %vm9067_vm5, %v9056_v61, %v9058_v13  ;;  %9155 = vmatprep.mubr.f32.mxu0 %v12242_v0  ;;  %v4037_v16 = vadd.f32 %v4033_v7, %v3659_v12  ;;  %v9070_v5 = vsel %vm9067_vm5, %v9058_v13, %v9060_v58 }
 0x207   : > { %11726 = vmatprep.subr.msk.mxu0 %vm254_vm0, %v9069_v15  ;;  %v4236_v18 = vpop.f32.mrf.mxu1 }
 0x208   : > { %v9054_v21 = vpop.permute.xlu1 %9053  ;;  %4039 = vst.msk [vmem:[#allocation2 + $0x8] sm:$0x3f] %vm13081_vm7, %v4037_v16  ;;  %v4163_v23 = vpop.f32.mrf.mxu0  ;;  %v4388_v62 = vcombine.low %v4234_v14, %v4236_v18 }
 0x209   : > { %v9068_v45 = vsel %vm9067_vm5, %v9054_v21, %v9056_v61  ;;  %v9062_v24 = vpop.permute.xlu0 %9061 }
 0x20a   : > { %v9071_v46 = vsel %vm9067_vm5, %v9060_v58, %v9062_v24  ;;  %11727 = vmatpush1.msk.msra.mxu0 %vm254_vm0, %v9068_v45  ;;  %v4165_v1 = vpop.f32.mrf.mxu0  ;;  %v4402_v26 = vrot.slane %v4388_v62, %v13046_v17 }
 0x20b   : > { %11729 = vmatprep.subr.msk.mxu1 %vm254_vm0, %v9071_v46  ;;  %11728 = vmatmul.mubr.msk.f32.vlgmr.msra.gmra.mxu0 %vm250_vm1, %v11725_v63  ;;  %v4387_v4 = vcombine.low %v4163_v23, %v4165_v1  ;;  %v11749_v46 = vld [vmem:[%s14016_s1 + $0x32] sm:$0x3] }
 0x20c   : > { %11730 = vmatpush1.msk.msra.mxu1 %vm254_vm0, %v9070_v5  ;;  %v9066_v27 = vpop.permute.xlu1 %9065  ;;  %9297 = vmatprep.mubr.f32.mxu0 %v12242_v0 }
 0x20d   : > { %v9064_v28 = vpop.permute.xlu0 %9063  ;;  %11731 = vmatmul.mubr.msk.f32.vlgmr.msra.gmra.mxu1 %vm250_vm1, %v11725_v63  ;;  %11983 = vmatprep.subr.mxu1 %v12242_v0  ;;  %v4395_v54 = vrot.slane %v4387_v4, %v13046_v17  ;;  %v4305_v29 = vpop.f32.mrf.mxu0 }
 0x20e   : > { %v9072_v32 = vsel %vm9067_vm5, %v9062_v24, %v9064_v28  ;;  %v9073_v33 = vsel %vm9067_vm5, %v9064_v28, %v9066_v27  ;;  %11984 = vmatpush3.msk.msra.mxu1 %vm254_vm0, %v9066_v27  ;;  %11985 = vmatprep.mubr.msk.f32.mxu1 %vm12245_vm2, %v12242_v0  ;;  %v4376_v34 = vpop.f32.mrf.mxu1 }
 0x20f   : > { %11732 = vmatprep.subr.msk.mxu0 %vm254_vm0, %v9073_v33  ;;  %v4403_v35 = vcombine.low %v4395_v54, %v4402_v26  ;;  %v4307_v37 = vpop.f32.mrf.mxu0  ;;  %v4418_v39 = vrot.slane %v4376_v34, %v13046_v17  ;;  %v4045_v25 = vld [vmem:[#allocation2 + $0x8] sm:$0x3f] }
 0x210   : > { %11733 = vmatpush1.msk.msra.mxu0 %vm254_vm0, %v9072_v32  ;;  %v9440_v38 = vpop.permute.xlu1 %9439  ;;  %v4404_v40 = vcombine.low %v4305_v29, %v4307_v37  ;;  %v11922_v41 = vpop.f32.mrf.mxu1 }
 0x211   : > { %v9438_v42 = vpop.permute.xlu0 %9437  ;;  %11734 = vmatmul.mubr.msk.f32.vlgmr.msra.gmra.mxu0 %vm250_vm1, %v11725_v63  ;;  %11986 = vmatmul.mubr.msk.f32.vlgmr.msra.gmra.mxu1 %vm250_vm1, %v11725_v63  ;;  %v4422_v43 = vadd.f32 %v4403_v35, %v13519_v36 }
 0x212   : > { %v9451_v20 = vsel %vm9449_vm6, %v9438_v42, %v9440_v38  ;;  %9537 = vmatprep.mubr.f32.mxu0 %v12242_v0  ;;  %9608 = vmatprep.mubr.f32.mxu1 %v12242_v0  ;;  %v4411_v44 = vrot.slane %v4404_v40, %v13046_v17 }
 0x213   : > { %11738 = vmatprep.subr.msk.mxu0 %vm254_vm0, %v9451_v20 }
 0x214   : > { %v9444_v47 = vpop.permute.xlu1 %9443  ;;  %v4419_v48 = vcombine.low %v4411_v44, %v4418_v39 }
 0x215   : > { %v9442_v49 = vpop.permute.xlu0 %9441  ;;  %v4620_v50 = vpop.f32.mrf.mxu1 }
 0x216   : > { %v9452_v51 = vsel %vm9449_vm6, %v9440_v38, %v9442_v49  ;;  %v9453_v52 = vsel %vm9449_vm6, %v9442_v49, %v9444_v47  ;;  %v4423_v53 = vadd.f32 %v4419_v48, %v4045_v25 }
 0x217   : > { %11741 = vmatprep.subr.msk.mxu1 %vm254_vm0, %v9453_v52  ;;  %v4622_v55 = vpop.f32.mrf.mxu1 }
 0x218   : > { %11742 = vmatpush1.msk.msra.mxu1 %vm254_vm0, %v9452_v51  ;;  %v9446_v56 = vpop.permute.xlu1 %9445  ;;  %4425 = vst.msk [vmem:[#allocation2 + $0x8] sm:$0x3f] %vm13081_vm7, %v4423_v53  ;;  %v4549_v59 = vpop.f32.mrf.mxu0  ;;  %v4774_v60 = vcombine.low %v4620_v50, %v4622_v55 }
 0x219   : > { %v9436_v22 = vpop.permute.xlu0 %9435  ;;  %11743 = vmatmul.mubr.msk.f32.vlgmr.msra.gmra.mxu1 %vm250_vm1, %v11737_v3  ;;  %11988 = vmatprep.subr.mxu1 %v12242_v0  ;;  %v9454_v58 = vsel %vm9449_vm6, %v9444_v47, %v9446_v56 }
 0x21a   : > { %v9450_v19 = vsel %vm9449_vm6, %v9436_v22, %v9438_v42  ;;  %11990 = vmatprep.mubr.msk.f32.mxu1 %vm12245_vm2, %v12242_v0  ;;  %v4551_v61 = vpop.f32.mrf.mxu0  ;;  %v4788_v6 = vrot.slane %v4774_v60, %v13046_v17  ;;  %v11761_v60 = vld [vmem:[%s14016_s1 + $0x34] sm:$0x3] }
 0x21b   : > { %11739 = vmatpush1.msk.msra.mxu0 %vm254_vm0, %v9450_v19  ;;  %v4773_v36 = vcombine.low %v4549_v59, %v4551_v61 }
 0x21c   : > { %11740 = vmatmul.mubr.msk.f32.vlgmr.msra.gmra.mxu0 %vm250_vm1, %v11737_v3  ;;  %v9820_v8 = vpop.permute.xlu1 %9819 }
 0x21d   : > { %v9448_v9 = vpop.permute.xlu0 %9447  ;;  %9679 = vmatprep.mubr.f32.mxu0 %v12242_v0  ;;  %v4781_v10 = vrot.slane %v4773_v36, %v13046_v17  ;;  %v4691_v11 = vpop.f32.mrf.mxu0 }
 0x21e   : > { %v9455_v57 = vsel %vm9449_vm6, %v9446_v56, %v9448_v9  ;;  %11989 = vmatpush3.msk.msra.mxu1 %vm254_vm0, %v9448_v9  ;;  %v4762_v12 = vpop.f32.mrf.mxu1 }
 0x21f   : > { %11744 = vmatprep.subr.msk.mxu0 %vm254_vm0, %v9455_v57  ;;  %11991 = vmatmul.mubr.msk.f32.vlgmr.msra.gmra.mxu1 %vm250_vm1, %v11737_v3  ;;  %v4789_v7 = vcombine.low %v4781_v10, %v4788_v6  ;;  %v4693_v13 = vpop.f32.mrf.mxu0  ;;  %v4804_v15 = vrot.slane %v4762_v12, %v13046_v17  ;;  %v4431_v45 = vld [vmem:[#allocation2 + $0x8] sm:$0x3f] }
 0x220   : > { %11745 = vmatpush1.msk.msra.mxu0 %vm254_vm0, %v9454_v58  ;;  %v9824_v14 = vpop.permute.xlu1 %9823  ;;  %9990 = vmatprep.mubr.f32.mxu1 %v12242_v0  ;;  %v4790_v16 = vcombine.low %v4691_v11, %v4693_v13  ;;  %v11927_v18 = vpop.f32.mrf.mxu1 }
 0x221   : > { %11746 = vmatmul.mubr.msk.f32.vlgmr.msra.gmra.mxu0 %vm250_vm1, %v11737_v3  ;;  %v9822_v21 = vpop.permute.xlu0 %9821  ;;  %v4808_v63 = vadd.f32 %v4789_v7, %v4422_v43 }
 0x222   : > { %v9833_v23 = vsel %vm9831_vm8, %v9820_v8, %v9822_v21  ;;  %9919 = vmatprep.mubr.f32.mxu0 %v12242_v0  ;;  %v4797_v62 = vrot.slane %v4790_v16, %v13046_v17  ;;  %v9834_v54 = vsel %vm9831_vm8, %v9822_v21, %v9824_v14 }
 0x223   : > { %11750 = vmatprep.subr.msk.mxu0 %vm254_vm0, %v9833_v23 }
 0x224   : > { %v9818_v24 = vpop.permute.xlu1 %9817  ;;  %v4805_v1 = vcombine.low %v4797_v62, %v4804_v15 }
 0x225   : > { %v9832_v5 = vsel %vm9831_vm8, %v9818_v24, %v9820_v8  ;;  %v9826_v4 = vpop.permute.xlu0 %9825  ;;  %v5006_v26 = vpop.f32.mrf.mxu1 }
 0x226   : > { %v9835_v27 = vsel %vm9831_vm8, %v9824_v14, %v9826_v4  ;;  %11751 = vmatpush1.msk.msra.mxu0 %vm254_vm0, %v9832_v5  ;;  %v4809_v28 = vadd.f32 %v4805_v1, %v4431_v45 }
 0x227   : > { %11753 = vmatprep.subr.msk.mxu1 %vm254_vm0, %v9835_v27  ;;  %11752 = vmatmul.mubr.msk.f32.vlgmr.msra.gmra.mxu0 %vm250_vm1, %v11749_v46  ;;  %v5008_v29 = vpop.f32.mrf.mxu1 }
 0x228   : > { %11754 = vmatpush1.msk.msra.mxu1 %vm254_vm0, %v9834_v54  ;;  %v9830_v32 = vpop.permute.xlu1 %9829  ;;  %10061 = vmatprep.mubr.f32.mxu0 %v12242_v0  ;;  %4811 = vst.msk [vmem:[#allocation2 + $0x8] sm:$0x3f] %vm13081_vm7, %v4809_v28  ;;  %v4935_v33 = vpop.f32.mrf.mxu0  ;;  %v5160_v34 = vcombine.low %v5006_v26, %v5008_v29 }
 0x229   : > { %v9828_v35 = vpop.permute.xlu0 %9827  ;;  %11755 = vmatmul.mubr.msk.f32.vlgmr.msra.gmra.mxu1 %vm250_vm1, %v11749_v46  ;;  %11993 = vmatprep.subr.mxu1 %v12242_v0 }
 0x22a   : > { %v9836_v37 = vsel %vm9831_vm8, %v9826_v4, %v9828_v35  ;;  %v9837_v38 = vsel %vm9831_vm8, %v9828_v35, %v9830_v32  ;;  %11994 = vmatpush3.msk.msra.mxu1 %vm254_vm0, %v9830_v32  ;;  %11995 = vmatprep.mubr.msk.f32.mxu1 %vm12245_vm2, %v12242_v0  ;;  %v4937_v39 = vpop.f32.mrf.mxu0  ;;  %v5174_v41 = vrot.slane %v5160_v34, %v13046_v17 }
 0x22b   : > { %11756 = vmatprep.subr.msk.mxu0 %vm254_vm0, %v9837_v38  ;;  %v5159_v40 = vcombine.low %v4935_v33, %v4937_v39 }
 0x22c   : > { %11757 = vmatpush1.msk.msra.mxu0 %vm254_vm0, %v9836_v37  ;;  %v10204_v42 = vpop.permute.xlu1 %10203 }
 0x22d   : > { %11758 = vmatmul.mubr.msk.f32.vlgmr.msra.gmra.mxu0 %vm250_vm1, %v11749_v46  ;;  %v10202_v43 = vpop.permute.xlu0 %10201  ;;  %11996 = vmatmul.mubr.msk.f32.vlgmr.msra.gmra.mxu1 %vm250_vm1, %v11749_v46  ;;  %v5167_v20 = vrot.slane %v5159_v40, %v13046_v17  ;;  %v5077_v44 = vpop.f32.mrf.mxu0 }
 0x22e   : > { %v10215_v25 = vsel %vm10213_vm9, %v10202_v43, %v10204_v42  ;;  %10301 = vmatprep.mubr.f32.mxu0 %v12242_v0  ;;  %10372 = vmatprep.mubr.f32.mxu1 %v12242_v0  ;;  %v5148_v47 = vpop.f32.mrf.mxu1 }
 0x22f   : > { %11762 = vmatprep.subr.msk.mxu0 %vm254_vm0, %v10215_v25  ;;  %v5175_v48 = vcombine.low %v5167_v20, %v5174_v41  ;;  %v5079_v49 = vpop.f32.mrf.mxu0  ;;  %v5190_v51 = vrot.slane %v5148_v47, %v13046_v17  ;;  %v4817_v19 = vld [vmem:[#allocation2 + $0x8] sm:$0x3f] }
 0x230   : > { %v10208_v50 = vpop.permute.xlu1 %10207  ;;  %v5176_v52 = vcombine.low %v5077_v44, %v5079_v49  ;;  %v11932_v3 = vpop.f32.mrf.mxu1 }
 0x231   : > { %v10206_v53 = vpop.permute.xlu0 %10205  ;;  %v5194_v55 = vadd.f32 %v5175_v48, %v4808_v63 }
 0x232   : > { %v10216_v56 = vsel %vm10213_vm9, %v10204_v42, %v10206_v53  ;;  %v10217_v59 = vsel %vm10213_vm9, %v10206_v53, %v10208_v50  ;;  %v5183_v22 = vrot.slane %v5176_v52, %v13046_v17 }
 0x233   : > { %11765 = vmatprep.subr.msk.mxu1 %vm254_vm0, %v10217_v59 }
 0x234   : > { %11766 = vmatpush1.msk.msra.mxu1 %vm254_vm0, %v10216_v56  ;;  %v5191_v61 = vcombine.low %v5183_v22, %v5190_v51  ;;  %v10210_v11 = vpop.permute.xlu1 %10209 }
 0x235   : > { %v10200_v36 = vpop.permute.xlu0 %10199  ;;  %11767 = vmatmul.mubr.msk.f32.vlgmr.msra.gmra.mxu1 %vm250_vm1, %v11761_v60  ;;  %11998 = vmatprep.subr.mxu1 %v12242_v0  ;;  %v5392_v6 = vpop.f32.mrf.mxu1  ;;  %v10218_v14 = vsel %vm10213_vm9, %v10208_v50, %v10210_v11 }
 0x236   : > { %v10214_v8 = vsel %vm10213_vm9, %v10200_v36, %v10202_v43  ;;  %12000 = vmatprep.mubr.msk.f32.mxu1 %vm12245_vm2, %v12242_v0  ;;  %v5195_v9 = vadd.f32 %v5191_v61, %v4817_v19  ;;  %vm10690_vm2 = vcmask 97280  }
 0x237   : > { %11763 = vmatpush1.msk.msra.mxu0 %vm254_vm0, %v10214_v8  ;;  %v5394_v10 = vpop.f32.mrf.mxu1 }
 0x238   : > { %11764 = vmatmul.mubr.msk.f32.vlgmr.msra.gmra.mxu0 %vm250_vm1, %v11761_v60  ;;  %5197 = vst.msk [vmem:[#allocation2 + $0x8] sm:$0x3f] %vm13081_vm7, %v5195_v9  ;;  %v5321_v57 = vpop.f32.mrf.mxu0  ;;  %v5546_v12 = vcombine.low %v5392_v6, %v5394_v10 }
 0x239   : > { %v10212_v58 = vpop.permute.xlu0 %10211  ;;  %10443 = vmatprep.mubr.f32.mxu0 %v12242_v0 }
 0x23a   : > { %v10219_v7 = vsel %vm10213_vm9, %v10210_v11, %v10212_v58  ;;  %11999 = vmatpush3.msk.msra.mxu1 %vm254_vm0, %v10212_v58  ;;  %v5323_v13 = vpop.f32.mrf.mxu0  ;;  %v5560_v16 = vrot.slane %v5546_v12, %v13046_v17 }
 0x23b   : > { %11768 = vmatprep.subr.msk.mxu0 %vm254_vm0, %v10219_v7  ;;  %12001 = vmatmul.mubr.msk.f32.vlgmr.msra.gmra.mxu1 %vm250_vm1, %v11761_v60  ;;  %v5545_v15 = vcombine.low %v5321_v57, %v5323_v13 }
 0x23c   : > { %11769 = vmatpush1.msk.msra.mxu0 %vm254_vm0, %v10218_v14 }
 0x23d   : > { %11770 = vmatmul.mubr.msk.f32.vlgmr.msra.gmra.mxu0 %vm250_vm1, %v11761_v60  ;;  %v5553_v18 = vrot.slane %v5545_v15, %v13046_v17  ;;  %v5463_v21 = vpop.f32.mrf.mxu0  ;;  %v5534_v63 = vpop.f32.mrf.mxu1  ;;  %vm10645_vm1 = vcmask 687104  }
 0x23e   : > { %10849 = vmatprep.mubr.f32.mxu0 %v12242_v0  ;;  %v5576_v24 = vrot.slane %v5534_v63, %v13046_v17 }
 0x23f   : > { %v5561_v23 = vcombine.low %v5553_v18, %v5560_v16  ;;  %v5465_v62 = vpop.f32.mrf.mxu0  ;;  %v11937_v45 = vpop.f32.mrf.mxu1  ;;  %v5203_v4 = vld [vmem:[#allocation2 + $0x8] sm:$0x3f] }
 0x240   : > { %v5562_v46 = vcombine.low %v5463_v21, %v5465_v62 }
 0x241   : > { %v5580_v1 = vadd.f32 %v5561_v23, %v5194_v55 }
 0x242   : > { %v5569_v5 = vrot.slane %v5562_v46, %v13046_v17 }
 0x244   : > { %v5577_v26 = vcombine.low %v5569_v5, %v5576_v24 }
 0x245   : > { %v5778_v27 = vpop.f32.mrf.mxu1 }
 0x246   : > { %v5581_v28 = vadd.f32 %v5577_v26, %v5203_v4 }
 0x247   : > { %v5780_v54 = vpop.f32.mrf.mxu1 }
 0x248   : > { %5583 = vst.msk [vmem:[#allocation2 + $0x8] sm:$0x3f] %vm13081_vm7, %v5581_v28  ;;  %v5707_v29 = vpop.f32.mrf.mxu0  ;;  %v5932_v32 = vcombine.low %v5778_v27, %v5780_v54 }
 0x24a   : > { %v5709_v33 = vpop.f32.mrf.mxu0  ;;  %v5946_v35 = vrot.slane %v5932_v32, %v13046_v17 }
 0x24b   : > { %v5931_v34 = vcombine.low %v5707_v29, %v5709_v33 }
 0x24d   : > { %v5939_v37 = vrot.slane %v5931_v34, %v13046_v17  ;;  %v5849_v38 = vpop.f32.mrf.mxu0  ;;  %v5920_v39 = vpop.f32.mrf.mxu1 }
 0x24e   : > { %v5962_v43 = vrot.slane %v5920_v39, %v13046_v17 }
 0x24f   : > { %v5947_v40 = vcombine.low %v5939_v37, %v5946_v35  ;;  %v5851_v41 = vpop.f32.mrf.mxu0  ;;  %v11942_v42 = vpop.f32.mrf.mxu1  ;;  %v5589_v47 = vld [vmem:[#allocation2 + $0x8] sm:$0x3f] }
 0x250   : > { %v5948_v20 = vcombine.low %v5849_v38, %v5851_v41 }
 0x251   : > { %v5966_v44 = vadd.f32 %v5947_v40, %v5580_v1 }
 0x252   : > { %v5955_v25 = vrot.slane %v5948_v20, %v13046_v17 }
 0x254   : > { %v5963_v48 = vcombine.low %v5955_v25, %v5962_v43 }
 0x255   : > { %v6164_v49 = vpop.f32.mrf.mxu1 }
 0x256   : > { %v5967_v50 = vadd.f32 %v5963_v48, %v5589_v47 }
 0x257   : > { %v6166_v51 = vpop.f32.mrf.mxu1 }
 0x258   : > { %5969 = vst.msk [vmem:[#allocation2 + $0x8] sm:$0x3f] %vm13081_vm7, %v5967_v50  ;;  %v6093_v52 = vpop.f32.mrf.mxu0  ;;  %v6318_v3 = vcombine.low %v6164_v49, %v6166_v51 }
 0x25a   : > { %v6095_v53 = vpop.f32.mrf.mxu0  ;;  %v6332_v56 = vrot.slane %v6318_v3, %v13046_v17 }
 0x25b   : > { %v6317_v55 = vcombine.low %v6093_v52, %v6095_v53 }
 0x25d   : > { %v6325_v59 = vrot.slane %v6317_v55, %v13046_v17  ;;  %v6235_v60 = vpop.f32.mrf.mxu0  ;;  %v6306_v22 = vpop.f32.mrf.mxu1 }
 0x25e   : > { %v6348_v6 = vrot.slane %v6306_v22, %v13046_v17 }
 0x25f   : > { %v6333_v19 = vcombine.low %v6325_v59, %v6332_v56  ;;  %v6237_v61 = vpop.f32.mrf.mxu0  ;;  %v11947_v36 = vpop.f32.mrf.mxu1  ;;  %v5975_v11 = vld [vmem:[#allocation2 + $0x8] sm:$0x3f] }
 0x260   : > { %v6334_v8 = vcombine.low %v6235_v60, %v6237_v61 }
 0x261   : > { %v6352_v9 = vadd.f32 %v6333_v19, %v5966_v44 }
 0x262   : > { %v6341_v10 = vrot.slane %v6334_v8, %v13046_v17 }
 0x264   : > { %v6349_v57 = vcombine.low %v6341_v10, %v6348_v6 }
 0x265   : > { %v6550_v12 = vpop.f32.mrf.mxu1 }
 0x266   : > { %v6353_v58 = vadd.f32 %v6349_v57, %v5975_v11 }
 0x267   : > { %v6552_v7 = vpop.f32.mrf.mxu1 }
 0x268   : > { %6355 = vst.msk [vmem:[#allocation2 + $0x8] sm:$0x3f] %vm13081_vm7, %v6353_v58  ;;  %v6479_v13 = vpop.f32.mrf.mxu0  ;;  %v6704_v14 = vcombine.low %v6550_v12, %v6552_v7 }
 0x26a   : > { %v6481_v15 = vpop.f32.mrf.mxu0  ;;  %v6718_v18 = vrot.slane %v6704_v14, %v13046_v17 }
 0x26b   : > { %v6703_v16 = vcombine.low %v6479_v13, %v6481_v15 }
 0x26d   : > { %v6711_v21 = vrot.slane %v6703_v16, %v13046_v17  ;;  %v6621_v63 = vpop.f32.mrf.mxu0  ;;  %v6692_v23 = vpop.f32.mrf.mxu1 }
 0x26e   : > { %v6734_v46 = vrot.slane %v6692_v23, %v13046_v17 }
 0x26f   : > { %v6719_v62 = vcombine.low %v6711_v21, %v6718_v18  ;;  %v6623_v45 = vpop.f32.mrf.mxu0  ;;  %v11952_v24 = vpop.f32.mrf.mxu1  ;;  %v6361_v26 = vld [vmem:[#allocation2 + $0x8] sm:$0x3f] }
 0x270   : > { %v6720_v1 = vcombine.low %v6621_v63, %v6623_v45 }
 0x271   : > { %v6738_v5 = vadd.f32 %v6719_v62, %v6352_v9 }
 0x272   : > { %v6727_v4 = vrot.slane %v6720_v1, %v13046_v17 }
 0x274   : > { %v6735_v27 = vcombine.low %v6727_v4, %v6734_v46 }
 0x275   : > { %v6936_v28 = vpop.f32.mrf.mxu1 }
 0x276   : > { %v6739_v54 = vadd.f32 %v6735_v27, %v6361_v26 }
 0x277   : > { %v6938_v29 = vpop.f32.mrf.mxu1 }
 0x278   : > { %6741 = vst.msk [vmem:[#allocation2 + $0x8] sm:$0x3f] %vm13081_vm7, %v6739_v54  ;;  %v6865_v32 = vpop.f32.mrf.mxu0  ;;  %v7090_v33 = vcombine.low %v6936_v28, %v6938_v29 }
 0x27a   : > { %v6867_v34 = vpop.f32.mrf.mxu0  ;;  %v7104_v37 = vrot.slane %v7090_v33, %v13046_v17 }
 0x27b   : > { %v7089_v35 = vcombine.low %v6865_v32, %v6867_v34 }
 0x27d   : > { %v7097_v38 = vrot.slane %v7089_v35, %v13046_v17  ;;  %v7007_v39 = vpop.f32.mrf.mxu0  ;;  %v7078_v40 = vpop.f32.mrf.mxu1 }
 0x27e   : > { %v7120_v20 = vrot.slane %v7078_v40, %v13046_v17  ;;  %v10771_v40 = vld [vmem:[#allocation7 + $0xc8] sm:$0xf] }
 0x27f   : > { %v7105_v41 = vcombine.low %v7097_v38, %v7104_v37  ;;  %v7009_v42 = vpop.f32.mrf.mxu0  ;;  %v11957_v43 = vpop.f32.mrf.mxu1  ;;  %v6747_v48 = vld [vmem:[#allocation2 + $0x8] sm:$0x3f]  ;;  %11773 = vmatprep.subr.msk.mxu0 %vm254_vm0, %v10771_v40 }
 0x280   : > { %v7106_v44 = vcombine.low %v7007_v39, %v7009_v42  ;;  %v10769_v42 = vld [vmem:[#allocation7 + $0xb8] sm:$0xff] }
 0x281   : > { %v7124_v25 = vadd.f32 %v7105_v41, %v6738_v5  ;;  %v10770_v41 = vld [vmem:[#allocation7 + $0xc0] sm:$0xf] }
 0x282   : > { %v7113_v47 = vrot.slane %v7106_v44, %v13046_v17  ;;  %11774 = vmatpush1.msk.msra.mxu0 %vm254_vm0, %v10770_v41  ;;  %vm10574_vm0 = vcmask 812032  }
 0x283   : > { %10793 = vmatprep.subr.mxu0 %v10769_v42 }
 0x284   : > { %v7121_v49 = vcombine.low %v7113_v47, %v7120_v20  ;;  %v10767_v47 = vld [vmem:[#allocation7 + $0xa8] sm:$0xff] }
 0x285   : > { %v7318_v50 = vpop.f32.mrf.mxu1 }
 0x286   : > { %v7125_v51 = vadd.f32 %v7121_v49, %v6747_v48 }
 0x287   : > { %v7320_v52 = vpop.f32.mrf.mxu1 }
 0x288   : > { %7127 = vst.msk [vmem:[#allocation2 + $0x8] sm:$0x3f] %vm13081_vm7, %v7125_v51  ;;  %v7247_v3 = vpop.f32.mrf.mxu0  ;;  %v7472_v53 = vcombine.low %v7318_v50, %v7320_v52  ;;  %v10766_v50 = vld [vmem:[#allocation7 + $0xa0] sm:$0xff] }
 0x28a   : > { %v7249_v55 = vpop.f32.mrf.mxu0  ;;  %v7486_v59 = vrot.slane %v7472_v53, %v13046_v17 }
 0x28b   : > { %v7471_v56 = vcombine.low %v7247_v3, %v7249_v55  ;;  %v7460_v60 = vpop.f32.mrf.mxu1  ;;  %v10765_v3 = vld [vmem:[#allocation7 + $0x98] sm:$0xff] }
 0x28c   : > { %v7502_v8 = vrot.slane %v7460_v60, %v13046_v17 }
 0x28d   : > { %v7479_v22 = vrot.slane %v7471_v56, %v13046_v17  ;;  %v7389_v19 = vpop.f32.mrf.mxu0  ;;  %v11962_v61 = vpop.f32.mrf.mxu1 }
 0x28f   : > { %v7487_v36 = vcombine.low %v7479_v22, %v7486_v59  ;;  %v7391_v6 = vpop.f32.mrf.mxu0  ;;  %v7133_v57 = vld [vmem:[#allocation2 + $0x8] sm:$0x3f] }
 0x290   : > { %v7488_v9 = vcombine.low %v7389_v19, %v7391_v6 }
 0x291   : > { %v7506_v10 = vadd.f32 %v7487_v36, %v7124_v25  ;;  %v10768_v25 = vld [vmem:[#allocation7 + $0xb0] sm:$0xff] }
 0x292   : > { %v7495_v11 = vrot.slane %v7488_v9, %v13046_v17  ;;  %10794 = vmatpush1.msra.mxu0 %v10768_v25 }
 0x293   : > { %v7629_v12 = vpop.f32.mrf.mxu0  ;;  %10795 = vmatprep.subr.mxu0 %v10767_v47 }
 0x294   : > { %v7503_v58 = vcombine.low %v7495_v11, %v7502_v8  ;;  %10796 = vmatpush1.msra.mxu0 %v10766_v50 }
 0x295   : > { %v7700_v7 = vpop.f32.mrf.mxu1  ;;  %v7631_v13 = vpop.f32.mrf.mxu0  ;;  %10797 = vmatprep.subr.mxu0 %v10765_v3 }
 0x296   : > { %v7507_v14 = vadd.f32 %v7503_v58, %v7133_v57  ;;  %v7853_v15 = vcombine.low %v7629_v12, %v7631_v13 }
 0x297   : > { %v7702_v16 = vpop.f32.mrf.mxu1 }
 0x298   : > { %7509 = vst.msk [vmem:[#allocation2 + $0x8] sm:$0x3f] %vm13081_vm7, %v7507_v14  ;;  %v7861_v18 = vrot.slane %v7853_v15, %v13046_v17  ;;  %v7854_v21 = vcombine.low %v7700_v7, %v7702_v16 }
 0x299   : > { %v7771_v63 = vpop.f32.mrf.mxu0  ;;  %v7842_v23 = vpop.f32.mrf.mxu1 }
 0x29a   : > { %v7868_v62 = vrot.slane %v7854_v21, %v13046_v17  ;;  %v7884_v1 = vrot.slane %v7842_v23, %v13046_v17 }
 0x29b   : > { %v7773_v45 = vpop.f32.mrf.mxu0  ;;  %v11967_v24 = vpop.f32.mrf.mxu1 }
 0x29c   : > { %v7869_v46 = vcombine.low %v7861_v18, %v7868_v62  ;;  %v7870_v5 = vcombine.low %v7771_v63, %v7773_v45 }
 0x29e   : > { %v7888_v4 = vadd.f32 %v7869_v46, %v7506_v10  ;;  %v7877_v26 = vrot.slane %v7870_v5, %v13046_v17 }
 0x29f   : > { %v7515_v27 = vld [vmem:[#allocation2 + $0x8] sm:$0x3f] }
 0x2a0   : > { %v7885_v28 = vcombine.low %v7877_v26, %v7884_v1 }
 0x2a1   : > { %v8082_v54 = vpop.f32.mrf.mxu1 }
 0x2a2   : > { %v7889_v29 = vadd.f32 %v7885_v28, %v7515_v27 }
 0x2a3   : > { %v8084_v32 = vpop.f32.mrf.mxu1 }
 0x2a4   : > { %7891 = vst.msk [vmem:[#allocation2 + $0x8] sm:$0x3f] %vm13081_vm7, %v7889_v29  ;;  %v8011_v33 = vpop.f32.mrf.mxu0  ;;  %v8236_v34 = vcombine.low %v8082_v54, %v8084_v32 }
 0x2a6   : > { %v8013_v35 = vpop.f32.mrf.mxu0  ;;  %v8250_v38 = vrot.slane %v8236_v34, %v13046_v17 }
 0x2a7   : > { %v8235_v37 = vcombine.low %v8011_v33, %v8013_v35  ;;  %v8224_v39 = vpop.f32.mrf.mxu1 }
 0x2a8   : > { %v8266_v51 = vrot.slane %v8224_v39, %v13046_v17 }
 0x2a9   : > { %v8243_v43 = vrot.slane %v8235_v37, %v13046_v17  ;;  %v8153_v20 = vpop.f32.mrf.mxu0  ;;  %v11972_v44 = vpop.f32.mrf.mxu1 }
 0x2ab   : > { %v8251_v48 = vcombine.low %v8243_v43, %v8250_v38  ;;  %v8155_v49 = vpop.f32.mrf.mxu0  ;;  %v7897_v56 = vld [vmem:[#allocation2 + $0x8] sm:$0x3f] }
 0x2ac   : > { %v8252_v52 = vcombine.low %v8153_v20, %v8155_v49 }
 0x2ad   : > { %v13704_v53 = vadd.f32 %v8251_v48, %v7888_v4 }
 0x2ae   : > { %v8259_v55 = vrot.slane %v8252_v52, %v13046_v17 }
 0x2af   : > { %v13707_v59 = vpop.f32.mrf.mxu0 }
 0x2b0   : > { %v8267_v60 = vcombine.low %v8259_v55, %v8266_v51 }
 0x2b1   : > { %v13709_v22 = vpop.f32.mrf.mxu1  ;;  %v13711_v61 = vpop.f32.mrf.mxu0 }
 0x2b2   : > { %v8271_v19 = vadd.f32 %v8267_v60, %v7897_v56 }
 0x2b3   : > { %v13713_v36 = vpop.f32.mrf.mxu1 }
 0x2b4   : > { %8273 = vst.msk [vmem:[#allocation2 + $0x8] sm:$0x3f] %vm13081_vm7, %v8271_v19  ;;  %v8617_v19 = vcombine.low %v13707_v59, %v13711_v61 }
 0x2b5   : > { %v8535_v6 = vpop.f32.mrf.mxu0  ;;  %v8606_v8 = vpop.f32.mrf.mxu1 }
 0x2b6   : > { %v8648_v11 = vrot.slane %v8606_v8, %v13046_v17 }
 0x2b7   : > { %v8537_v9 = vpop.f32.mrf.mxu0  ;;  %v11977_v10 = vpop.f32.mrf.mxu1 }
 0x2b8   : > { %v8634_v57 = vcombine.low %v8535_v6, %v8537_v9  ;;  %v8618_v6 = vcombine.low %v13709_v22, %v13713_v36 }
 0x2ba   : > { %v8641_v12 = vrot.slane %v8634_v57, %v13046_v17  ;;  %v8632_v59 = vrot.slane %v8618_v6, %v13046_v17 }
 0x2bb   : > { %v8279_v58 = vld [vmem:[#allocation2 + $0x8] sm:$0x3f] }
 0x2bc   : > { %v8649_v7 = vcombine.low %v8641_v12, %v8648_v11 }
 0x2bd   : > { %v13719_v13 = vpop.f32.mrf.mxu1 }
 0x2be   : > { %v8653_v14 = vadd.f32 %v8649_v7, %v8279_v58  ;;  %v8625_v7 = vrot.slane %v8617_v19, %v13046_v17 }
 0x2bf   : > { %v13725_v16 = vpop.f32.mrf.mxu1 }
 0x2c0   : > { %8655 = vst.msk [vmem:[#allocation2 + $0x8] sm:$0x3f] %vm13081_vm7, %v8653_v14  ;;  %v13723_v15 = vpop.f32.mrf.mxu0  ;;  %v9000_v57 = vcombine.low %v13719_v13, %v13725_v16 }
 0x2c2   : > { %v8777_v18 = vpop.f32.mrf.mxu0 }
 0x2c3   : > { %v8988_v21 = vpop.f32.mrf.mxu1  ;;  %v8999_v11 = vcombine.low %v13723_v15, %v8777_v18  ;;  %v9014_v18 = vrot.slane %v9000_v57, %v13046_v17  ;;  %v10763_v57 = vld [vmem:[#allocation7 + $0x88] sm:$0xff] }
 0x2c4   : > { %v9030_v45 = vrot.slane %v8988_v21, %v13046_v17 }
 0x2c5   : > { %v8917_v63 = vpop.f32.mrf.mxu0  ;;  %v11982_v23 = vpop.f32.mrf.mxu1  ;;  %v9007_v15 = vrot.slane %v8999_v11, %v13046_v17  ;;  %v10764_v11 = vld [vmem:[#allocation7 + $0x90] sm:$0xff] }
 0x2c6   : > { %v13749_v23 = vpop.permute.xlu1 %10580  ;;  %10798 = vmatpush1.msra.mxu0 %v10764_v11 }
 0x2c7   : > { %v8919_v62 = vpop.f32.mrf.mxu0  ;;  %v8661_v1 = vld [vmem:[#allocation2 + $0x8] sm:$0x3f]  ;;  %10799 = vmatprep.subr.mxu0 %v10763_v57 }
 0x2c8   : > { %v9016_v24 = vcombine.low %v8917_v63, %v8919_v62  ;;  %v8633_v62 = vcombine.low %v8625_v7, %v8632_v59  ;;  %v10761_v59 = vld [vmem:[#allocation7 + $0x78] sm:$0xff] }
 0x2ca   : > { %v9023_v46 = vrot.slane %v9016_v24, %v13046_v17 }
 0x2cb   : > { %v9157_v5 = vpop.f32.mrf.mxu0 }
 0x2cc   : > { %v9031_v4 = vcombine.low %v9023_v46, %v9030_v45 }
 0x2cd   : > { %v9228_v26 = vpop.f32.mrf.mxu1  ;;  %v9159_v28 = vpop.f32.mrf.mxu0 }
 0x2ce   : > { %v9035_v27 = vadd.f32 %v9031_v4, %v8661_v1  ;;  %v9381_v61 = vcombine.low %v9157_v5, %v9159_v28 }
 0x2cf   : > { %v9230_v54 = vpop.f32.mrf.mxu1 }
 0x2d0   : > { %9037 = vst.msk [vmem:[#allocation2 + $0x8] sm:$0x3f] %vm13081_vm7, %v9035_v27  ;;  %v9382_v14 = vcombine.low %v9228_v26, %v9230_v54  ;;  %v9389_v24 = vrot.slane %v9381_v61, %v13046_v17  ;;  %v9015_v27 = vcombine.low %v9007_v15, %v9014_v18 }
 0x2d1   : > { %v9299_v29 = vpop.f32.mrf.mxu0  ;;  %v9370_v32 = vpop.f32.mrf.mxu1 }
 0x2d2   : > { %v9412_v35 = vrot.slane %v9370_v32, %v13046_v17  ;;  %v9396_v46 = vrot.slane %v9382_v14, %v13046_v17  ;;  %v10760_v14 = vld [vmem:[#allocation7 + $0x70] sm:$0xff] }
 0x2d3   : > { %v9301_v33 = vpop.f32.mrf.mxu0  ;;  %v11987_v34 = vpop.f32.mrf.mxu1 }
 0x2d4   : > { %v9398_v37 = vcombine.low %v9299_v29, %v9301_v33  ;;  %v13758_v33 = vpop.permute.xlu1 %10628  ;;  %v8652_v34 = vadd.f32 %v8633_v62, %v13704_v53 }
 0x2d6   : > { %v9405_v38 = vrot.slane %v9398_v37, %v13046_v17 }
 0x2d7   : > { %v9043_v39 = vld [vmem:[#allocation2 + $0x8] sm:$0x3f] }
 0x2d8   : > { %v9413_v40 = vcombine.low %v9405_v38, %v9412_v35  ;;  %v9397_v35 = vcombine.low %v9389_v24, %v9396_v46 }
 0x2d9   : > { %v9610_v41 = vpop.f32.mrf.mxu1 }
 0x2da   : > { %v9417_v42 = vadd.f32 %v9413_v40, %v9043_v39 }
 0x2db   : > { %v9612_v20 = vpop.f32.mrf.mxu1 }
 0x2dc   : > { %9419 = vst.msk [vmem:[#allocation2 + $0x8] sm:$0x3f] %vm13081_vm7, %v9417_v42  ;;  %v9539_v43 = vpop.f32.mrf.mxu0  ;;  %v9764_v16 = vcombine.low %v9610_v41, %v9612_v20  ;;  %v9034_v41 = vadd.f32 %v9015_v27, %v8652_v34  ;;  %v10752_v27 = vld [vmem:[#allocation7 + $0x30] sm:$0xff] }
 0x2de   : > { %v9541_v44 = vpop.f32.mrf.mxu0  ;;  %v9778_v54 = vrot.slane %v9764_v16, %v13046_v17 }
 0x2df   : > { %v9752_v25 = vpop.f32.mrf.mxu1  ;;  %v9763_v13 = vcombine.low %v9539_v43, %v9541_v44  ;;  %v9416_v44 = vadd.f32 %v9397_v35, %v9034_v41  ;;  %v10749_v35 = vld [vmem:[#allocation7 + $0x18] sm:$0xff]  ;;  %v10746_v41 = vld [vmem:[#allocation7] sm:$0xff] }
 0x2e0   : > { %v9794_v51 = vrot.slane %v9752_v25, %v13046_v17 }
 0x2e1   : > { %v9681_v47 = vpop.f32.mrf.mxu0  ;;  %v11992_v48 = vpop.f32.mrf.mxu1  ;;  %v9771_v28 = vrot.slane %v9763_v13, %v13046_v17 }
 0x2e2   : > { %v10605_v13 = vpop.permute.xlu0 %10604 }
 0x2e3   : > { %v9683_v49 = vpop.f32.mrf.mxu0  ;;  %v9425_v3 = vld [vmem:[#allocation2 + $0x8] sm:$0x3f]  ;;  %v9779_v42 = vcombine.low %v9771_v28, %v9778_v54  ;;  %v10751_v28 = vld [vmem:[#allocation7 + $0x28] sm:$0xff] }
 0x2e4   : > { %v9780_v50 = vcombine.low %v9681_v47, %v9683_v49  ;;  %v13765_v49 = vpop.permute.xlu1 %10673 }
 0x2e5   : > { %v9798_v53 = vadd.f32 %v9779_v42, %v9416_v44 }
 0x2e6   : > { %v9787_v52 = vrot.slane %v9780_v50, %v13046_v17 }
 0x2e7   : > { %v9921_v55 = vpop.f32.mrf.mxu0 }
 0x2e8   : > { %v9795_v56 = vcombine.low %v9787_v52, %v9794_v51 }
 0x2e9   : > { %v9992_v60 = vpop.f32.mrf.mxu1  ;;  %v9923_v9 = vpop.f32.mrf.mxu0 }
 0x2ea   : > { %v9799_v8 = vadd.f32 %v9795_v56, %v9425_v3  ;;  %v10145_v1 = vcombine.low %v9921_v55, %v9923_v9 }
 0x2eb   : > { %v9994_v10 = vpop.f32.mrf.mxu1 }
 0x2ec   : > { %9801 = vst.msk [vmem:[#allocation2 + $0x8] sm:$0x3f] %vm13081_vm7, %v9799_v8  ;;  %v10146_v5 = vcombine.low %v9992_v60, %v9994_v10  ;;  %v10153_v37 = vrot.slane %v10145_v1, %v13046_v17  ;;  %v13771_v10 = vpop.permute.xlu1 %10723  ;;  %v10755_v1 = vld [vmem:[#allocation7 + $0x48] sm:$0xff] }
 0x2ed   : > { %v10063_v12 = vpop.f32.mrf.mxu0  ;;  %v10134_v58 = vpop.f32.mrf.mxu1 }
 0x2ee   : > { %v10176_v63 = vrot.slane %v10134_v58, %v13046_v17  ;;  %v10160_v38 = vrot.slane %v10146_v5, %v13046_v17  ;;  %v10762_v58 = vld [vmem:[#allocation7 + $0x80] sm:$0xff] }
 0x2ef   : > { %v10065_v22 = vpop.f32.mrf.mxu0  ;;  %v11997_v36 = vpop.f32.mrf.mxu1  ;;  %10800 = vmatpush1.msra.mxu0 %v10762_v58 }
 0x2f0   : > { %v10162_v21 = vcombine.low %v10063_v12, %v10065_v22  ;;  %v10161_v25 = vcombine.low %v10153_v37, %v10160_v38  ;;  %10801 = vmatprep.subr.mxu0 %v10761_v59  ;;  %v10759_v22 = vld [vmem:[#allocation7 + $0x68] sm:$0xff]  ;;  %v10571_v36 = vpop.permute.xlu1 %10570  ;;  %v10748_v37 = vld [vmem:[#allocation7 + $0x10] sm:$0xff] }
 0x2f1   : > { %10802 = vmatpush1.msra.mxu0 %v10760_v14  ;;  %v10747_v38 = vld [vmem:[#allocation7 + $0x8] sm:$0xff] }
 0x2f2   : > { %v10169_v45 = vrot.slane %v10162_v21, %v13046_v17  ;;  %v10180_v55 = vadd.f32 %v10161_v25, %v9798_v53  ;;  %10803 = vmatprep.subr.mxu0 %v10759_v22  ;;  %v10758_v21 = vld [vmem:[#allocation7 + $0x60] sm:$0xff] }
 0x2f3   : > { %v9807_v4 = vld [vmem:[#allocation2 + $0x8] sm:$0x3f]  ;;  %10804 = vmatpush1.msra.mxu0 %v10758_v21 }
 0x2f4   : > { %v10177_v26 = vcombine.low %v10169_v45, %v10176_v63  ;;  %v10757_v63 = vld [vmem:[#allocation7 + $0x58] sm:$0xff]  ;;  %v10756_v45 = vld [vmem:[#allocation7 + $0x50] sm:$0xff] }
 0x2f5   : > { %v10374_v29 = vpop.f32.mrf.mxu1  ;;  %10805 = vmatprep.subr.mxu0 %v10757_v63 }
 0x2f6   : > { %v10181_v32 = vadd.f32 %v10177_v26, %v9807_v4  ;;  %10806 = vmatpush1.msra.mxu0 %v10756_v45  ;;  %v10753_v4 = vld [vmem:[#allocation7 + $0x38] sm:$0xff] }
 0x2f7   : > { %v10376_v39 = vpop.f32.mrf.mxu1  ;;  %10807 = vmatprep.subr.mxu0 %v10755_v1 }
 0x2f8   : > { %10183 = vst.msk [vmem:[#allocation2 + $0x8] sm:$0x3f] %vm13081_vm7, %v10181_v32  ;;  %v10303_v40 = vpop.f32.mrf.mxu0  ;;  %v10528_v43 = vcombine.low %v10374_v29, %v10376_v39  ;;  %10808 = vmatpush1.msra.mxu0 %v10754_v31  ;;  %v10750_v32 = vld [vmem:[#allocation7 + $0x20] sm:$0xff] }
 0x2f9   : > { %10809 = vmatprep.subr.mxu0 %v10753_v4 }
 0x2fa   : > { %v10305_v20 = vpop.f32.mrf.mxu0  ;;  %v10542_v51 = vrot.slane %v10528_v43, %v13046_v17  ;;  %10810 = vmatpush1.msra.mxu0 %v10752_v27  ;;  %v10699_v43 = vpop.permute.xlu0 %10698 }
 0x2fb   : > { %v10527_v47 = vcombine.low %v10303_v40, %v10305_v20  ;;  %v10516_v48 = vpop.f32.mrf.mxu1  ;;  %10811 = vmatprep.subr.mxu0 %v10751_v28 }
 0x2fc   : > { %v10558_v6 = vrot.slane %v10516_v48, %v13046_v17  ;;  %10812 = vmatpush1.msra.mxu0 %v10750_v32 }
 0x2fd   : > { %v10535_v50 = vrot.slane %v10527_v47, %v13046_v17  ;;  %v10445_v52 = vpop.f32.mrf.mxu0  ;;  %v12002_v3 = vpop.f32.mrf.mxu1  ;;  %10813 = vmatprep.subr.mxu0 %v10749_v35 }
 0x2fe   : > { %10814 = vmatpush1.msra.mxu0 %v10748_v37 }
 0x2ff   : > { %v10543_v56 = vcombine.low %v10535_v50, %v10542_v51  ;;  %v10447_v60 = vpop.f32.mrf.mxu0  ;;  %v10189_v7 = vld [vmem:[#allocation2 + $0x8] sm:$0x3f]  ;;  %10815 = vmatprep.subr.mxu0 %v10747_v38  ;;  %v10654_v50 = vpop.permute.xlu0 %10653 }
 0x300   : > { %v10544_v19 = vcombine.low %v10445_v52, %v10447_v60  ;;  %10816 = vmatpush1.msra.mxu0 %v10746_v41 }
 0x301   : > { %v10562_v8 = vadd.f32 %v10543_v56, %v10180_v55 }
 0x302   : > { %v10551_v9 = vrot.slane %v10544_v19, %v13046_v17 }
 0x303   : > { %10564 = vst [vmem:[#allocation2] sm:$0xff] %v10562_v8 }
 0x304   : > { %v10559_v12 = vcombine.low %v10551_v9, %v10558_v6 }
 0x306   : > { %v10563_v61 = vadd.f32 %v10559_v12, %v10189_v7 }
 0x308   : > { %10565 = vst.msk [vmem:[#allocation2 + $0x8] sm:$0x3f] %vm13081_vm7, %v10563_v61  ;;  %vm10772_vm7 = vcmask 818176  }
 0x30a   : > { %v10600_v15 = vld [vmem:[#allocation2 + $0x2] sm:$0xf]  ;;  %v10566_v18 = vld [vmem:[#allocation2] sm:$0x3]  ;;  %v10649_v51 = vld [vmem:[#allocation2 + $0x6] sm:$0x3] }
 0x30b   : > { %v10573_v16 = vadd.f32 %v10571_v36, %v10566_v18  ;;  %v10576_v62 = vld [vmem:[#allocation2] sm:$0xf]  ;;  %v10607_v24 = vadd.f32 %v10605_v13, %v10600_v15  ;;  %v10624_v5 = vld [vmem:[#allocation2 + $0x4] sm:$0xf]  ;;  %v10656_v55 = vadd.f32 %v10654_v50, %v10649_v51 }
 0x30c   : > { %v10583_v46 = vadd.f32 %v13749_v23, %v10576_v62  ;;  %v10631_v54 = vadd.f32 %v13758_v33, %v10624_v5 }
 0x30d   : > { %10575 = vst.msk [vmem:[#allocation3] sm:$0x3] %vm10574_vm0, %v10573_v16  ;;  %v10615_v29 = vrot.slane %v10607_v24, %v13046_v17  ;;  %v10664_v60 = vrot.slane %v10656_v55, %v13046_v17  ;;  %v12277_v16 = vmov 1966171168  }
 0x30e   : > { %v10591_v26 = vrot.slane %v10583_v46, %v13046_v17  ;;  %v10639_v39 = vrot.slane %v10631_v54, %v13046_v17  ;;  %v10866_v62 = vunpack.c.l.s4 %v12277_v16 }
 0x30f   : > { %v10669_v34 = vld [vmem:[#allocation2 + $0x6] sm:$0xf]  ;;  %v10616_v33 = vcombine.high %v10615_v29, %v10615_v29  ;;  %v10719_v47 = vld [vmem:[#allocation2 + $0xa] sm:$0xf] }
 0x310   : > { %10593 = vrot.lane.b32.xlu0 %v10591_v26, %s12252_s11  ;;  %v10592_v23 = vcombine.high %v10591_v26, %v10591_v26  ;;  %v10676_v40 = vadd.f32 %v13765_v49, %v10669_v34  ;;  %v10694_v42 = vld [vmem:[#allocation2 + $0x8] sm:$0xf]  ;;  %v10640_v20 = vcombine.high %v10639_v39, %v10639_v39  ;;  %v10726_v49 = vadd.f32 %v13771_v10, %v10719_v47 }
 0x311   : > { %v10701_v25 = vadd.f32 %v10699_v43, %v10694_v42  ;;  %v10867_v45 = vunpack.c.0.s8 %v10866_v62 }
 0x312   : > { %10595 = vrot.lane.b32.xlu1 %v10592_v23, %s12252_s11  ;;  %v10684_v44 = vrot.slane %v10676_v40, %v13046_v17  ;;  %s12272_s11 = smov 84   ;;  %v10734_v52 = vrot.slane %v10726_v49, %v13046_v17 }
 0x313   : > { %v10709_v53 = vrot.slane %v10701_v25, %v13046_v17 }
 0x314   : > { %10617 = vrot.lane.b32.xlu0 %v10615_v29, %s12261_s20  ;;  %v10685_v48 = vcombine.high %v10684_v44, %v10684_v44  ;;  %v10735_v56 = vcombine.high %v10734_v52, %v10734_v52 }
 0x315   : > { %v10710_v3 = vcombine.high %v10709_v53, %v10709_v53 }
 0x316   : > { %10619 = vrot.lane.b32.xlu1 %v10616_v33, %s12261_s20  ;;  %s12274_s20 = smov 40  }
 0x318   : > { %10641 = vrot.lane.b32.xlu0 %v10639_v39, %s12272_s11 }
 0x31a   : > { %10643 = vrot.lane.b32.xlu1 %v10640_v20, %s12272_s11  ;;  %s12174_s11 = scalar_lea.vmem %s12173_s14, 2048 }
 0x31b   : > { %p12176_p2 = scmp.lt.s32.totalorder %s12174_s11, %s12168_s21 }
 0x31c   : > { %10686 = vrot.lane.b32.xlu0 %v10684_v44, %s12273_s25 }
 0x31d   : > { %p12177_p13 = por %p12176_p2, %p12175_p10 }
 0x31e   : > { %10688 = vrot.lane.b32.xlu1 %v10685_v48, %s12273_s25 }
 0x31f   : > { %p12178_p0 = pnand %p12177_p13, %p12171_p7 }
 0x320   : > { %10711 = vrot.lane.b32.xlu0 %v10709_v53, %s12274_s20 }
 0x322   : > { %10713 = vrot.lane.b32.xlu1 %v10710_v3, %s12274_s20 }
 0x324   : > { %10736 = vrot.lane.b32.xlu0 %v10734_v52, %s12275_s28 }
 0x326   : > { %10738 = vrot.lane.b32.xlu1 %v10735_v56, %s12275_s28 }
 0x328   : > { %10665 = vrot.lane.b32.xlu0 %v10664_v60, %s12276_s29 }
 0x382   : > { %v10594_v19 = vpop.permute.xlu0 %10593 }
 0x384   : > { %v10596_v6 = vpop.permute.xlu1 %10595 }
 0x385   : > { %v10597_v8 = vsel %vm3686_vm11, %v10594_v19, %v10596_v6  ;;  %vm10715_vm11 = vcmask 326656  }
 0x386   : > { %10599 = vst.msk [vmem:[#allocation3 + $0x2] sm:$0x3] %vm10574_vm0, %v10597_v8  ;;  %v10618_v9 = vpop.permute.xlu0 %10617 }
 0x388   : > { %v10620_v10 = vpop.permute.xlu1 %10619 }
 0x389   : > { %v10621_v11 = vsel %vm7157_vm13, %v10618_v9, %v10620_v10 }
 0x38a   : > { %10623 = vst.msk [vmem:[#allocation3 + $0x4] sm:$0x3] %vm10574_vm0, %v10621_v11  ;;  %v10642_v57 = vpop.permute.xlu0 %10641 }
 0x38c   : > { %v10644_v12 = vpop.permute.xlu1 %10643 }
 0x38d   : > { %v10646_v58 = vsel %vm10645_vm1, %v10642_v57, %v10644_v12 }
 0x38e   : > { %10648 = vst.msk [vmem:[#allocation3 + $0x6] sm:$0x3] %vm10574_vm0, %v10646_v58  ;;  %v10687_v17 = vpop.permute.xlu0 %10686 }
 0x390   : > { %v10689_v7 = vpop.permute.xlu1 %10688 }
 0x391   : > { %v10691_v59 = vsel %vm10690_vm2, %v10687_v17, %v10689_v7 }
 0x392   : > { %10693 = vst.msk [vmem:[#allocation3 + $0xa] sm:$0x3] %vm10574_vm0, %v10691_v59  ;;  %v10712_v61 = vpop.permute.xlu0 %10711 }
 0x394   : > { %v10714_v14 = vpop.permute.xlu1 %10713 }
 0x395   : > { %v10716_v22 = vsel %vm10715_vm11, %v10712_v61, %v10714_v14  ;;  %v10744_v36 = vld [vmem:[#allocation3] sm:$0xff] }
 0x396   : > { %10718 = vst.msk [vmem:[#allocation3 + $0xc] sm:$0x3] %vm10574_vm0, %v10716_v22  ;;  %v10737_v21 = vpop.permute.xlu0 %10736  ;;  %11775 = vmatmul.mubr.msk.f32.vlgmr.msra.gmra.mxu0 %vm10772_vm7, %v10744_v36 }
 0x397   : > { %10855 = vmatprep.mubr.f32.mxu0 %v12242_v0  ;;  %v13806_v0 = vsub.s32 %v10867_v45, %v13030_v2 }
 0x398   : > { %v10739_v63 = vpop.permute.xlu1 %10738 }
 0x399   : > { %v10741_v15 = vsel %vm10740_vm10, %v10737_v21, %v10739_v63 }
 0x39a   : > { %10743 = vst.msk [vmem:[#allocation3 + $0xe] sm:$0x3] %vm10574_vm0, %v10741_v15  ;;  %v10666_v18 = vpop.permute.xlu0 %10665 }
 0x39b   : > { %10668 = vst.msk [vmem:[#allocation3 + $0x8] sm:$0x3] %vm10574_vm0, %v10666_v18 }
 0x3a2   : > { %v10745_v13 = vld [vmem:[#allocation3 + $0x8] sm:$0xff] }
 0x3a3   : > { %11776 = vmatmul.mubr.msk.f32.gmra.mxu0 %vm10772_vm7, %v10745_v13 }
 0x456   : > { %v10851_v24 = vpop.f32.mrf.mxu0 }
 0x457   : > { %v13801_v46 = vmul.f32 0.75, %v10851_v24  ;;  %v13803_v1 = vmul.f32 0.25, %v10851_v24 }
 0x458   : > { %v10853_v31 = vpop.f32.mrf.mxu0 }
 0x459   : > { %v10945_v5 = vrot.slane %v13801_v46, 2  ;;  %v10864_v4 = vcombine.low %v10851_v24, %v10853_v31  ;;  %v13810_v26 = vmul.f32 0.75, %v10853_v31  ;;  %v10904_v27 = vrot.slane %v13803_v1, 2 }
 0x45a   : > { %v13813_v28 = vmul.f32 0.25, %v10853_v31 }
 0x45b   : > { %v10871_v54 = vrot.slane %v10864_v4, %v13806_v0  ;;  %v10946_v29 = vrot.slane %v13810_v26, 2  ;;  %v10949_v32 = vadd.f32 %v10945_v5, %v13803_v1  ;;  %v10908_v38 = vadd.f32 %v10904_v27, %v13801_v46 }
 0x45c   : > { %v10905_v2 = vrot.slane %v13813_v28, 2 }
 0x45d   : > { %v10872_v34 = vcombine.high %v10871_v54, %v10871_v54  ;;  %v10879_v35 = vrot.slane %v10871_v54, %v13806_v0  ;;  %v10950_v37 = vadd.f32 %v10946_v29, %v13813_v28 }
 0x45e   : > { %v10909_v39 = vadd.f32 %v10905_v2, %v13810_v26 }
 0x45f   : > { %v10886_v40 = vrot.slane %v10872_v34, %v13806_v0  ;;  %10893 = vst.msk [vmem:[%s13829_s8] ss:$8 sm:$0x3] %vm13818_vm12, %v10879_v35  ;;  %v10953_v30 = vcombine.low %v10949_v32, %v10950_v37  ;;  %v11035_v33 = vcombine.high %v10949_v32, %v10950_v37 }
 0x460   : > { %v10912_v41 = vcombine.low %v10908_v38, %v10909_v39  ;;  %v11004_v42 = vcombine.high %v10908_v38, %v10909_v39 }
 0x461   : > { %11777 = vst.msk [vmem:[%s13829_s8 + $0x20] ss:$8 sm:$0x3] %vm13818_vm12, %v10886_v40  ;;  %v10960_v43 = vrot.slane %v10953_v30, %v13806_v0  ;;  %v11042_v20 = vrot.slane %v11035_v33, %v13806_v0 }
 0x462   : > { %v10919_v44 = vrot.slane %v10912_v41, %v13806_v0  ;;  %v11011_v25 = vrot.slane %v11004_v42, %v13806_v0 }
 0x463   : > { %v10961_v47 = vcombine.high %v10960_v43, %v10960_v43  ;;  %v10968_v48 = vrot.slane %v10960_v43, %v13806_v0  ;;  %v11043_v49 = vcombine.high %v11042_v20, %v11042_v20  ;;  %v11050_v53 = vrot.slane %v11042_v20, %v13806_v0  ;;  %v10857_v50 = vpop.f32.mrf.mxu0 }
 0x464   : > { %v10920_v51 = vcombine.high %v10919_v44, %v10919_v44  ;;  %v10927_v52 = vrot.slane %v10919_v44, %v13806_v0  ;;  %v11012_v3 = vcombine.high %v11011_v25, %v11011_v25  ;;  %v11019_v55 = vrot.slane %v11011_v25, %v13806_v0 }
 0x465   : > { %v10975_v56 = vrot.slane %v10961_v47, %v13806_v0  ;;  %11780 = vst.msk [vmem:[%s13829_s8 + $0x2] ss:$8 sm:$0x3] %vm13818_vm12, %v10968_v48  ;;  %v10994_v60 = vcombine.high %v10968_v48, %v10968_v48  ;;  %v11057_v19 = vrot.slane %v11043_v49, %v13806_v0  ;;  %11788 = vst.msk [vmem:[%s13829_s8 + $0x6] ss:$8 sm:$0x3] %vm13818_vm12, %v11050_v53  ;;  %v10859_v8 = vpop.f32.mrf.mxu0 }
 0x466   : > { %v11066_v6 = vmul.f32 0.25, %v10857_v50  ;;  %v10934_v9 = vrot.slane %v10920_v51, %v13806_v0  ;;  %11778 = vst.msk [vmem:[%s13829_s8 + $0x1] ss:$8 sm:$0x3] %vm13818_vm12, %v10927_v52  ;;  %v10984_v10 = vcombine.high %v10927_v52, %v10927_v52  ;;  %v11026_v11 = vrot.slane %v11012_v3, %v13806_v0 }
 0x467   : > { %11786 = vst.msk [vmem:[%s13829_s8 + $0x5] ss:$8 sm:$0x3] %vm13818_vm12, %v11019_v55  ;;  %v11111_v57 = vmul.f32 0.75, %v10857_v50  ;;  %v10995_v12 = vcombine.high %v10975_v56, %v10975_v56  ;;  %v11067_v17 = vmul.f32 0.25, %v10859_v8  ;;  %v11112_v7 = vmul.f32 0.75, %v10859_v8 }
 0x468   : > { %11781 = vst.msk [vmem:[%s13829_s8 + $0x22] ss:$8 sm:$0x3] %vm13818_vm12, %v10975_v56  ;;  %11784 = vst.msk [vmem:[%s13829_s8 + $0x4] ss:$8 sm:$0x3] %vm13818_vm12, %v10994_v60  ;;  %v10985_v59 = vcombine.high %v10934_v9, %v10934_v9 }
 0x469   : > { %11789 = vst.msk [vmem:[%s13829_s8 + $0x26] ss:$8 sm:$0x3] %vm13818_vm12, %v11057_v19  ;;  %v11070_v58 = vrot.slane %v11066_v6, 2  ;;  %v11115_v61 = vrot.slane %v11111_v57, 2  ;;  %v11308_v22 = vadd.f32 %v11111_v57, %v11066_v6  ;;  %v11071_v36 = vrot.slane %v11067_v17, 2 }
 0x46a   : > { %11779 = vst.msk [vmem:[%s13829_s8 + $0x21] ss:$8 sm:$0x3] %vm13818_vm12, %v10934_v9  ;;  %11782 = vst.msk [vmem:[%s13829_s8 + $0x3] ss:$8 sm:$0x3] %vm13818_vm12, %v10984_v10  ;;  %v11309_v13 = vadd.f32 %v11112_v7, %v11067_v17 }
 0x46b   : > { %11787 = vst.msk [vmem:[%s13829_s8 + $0x25] ss:$8 sm:$0x3] %vm13818_vm12, %v11026_v11  ;;  %11785 = vst.msk [vmem:[%s13829_s8 + $0x24] ss:$8 sm:$0x3] %vm13818_vm12, %v10995_v12  ;;  %v11074_v14 = vadd.f32 %v11070_v58, %v13801_v46  ;;  %v11119_v63 = vadd.f32 %v11115_v61, %v13803_v1  ;;  %v11156_v15 = vadd.f32 %v11111_v57, %v11070_v58 }
 0x46c   : > { %v11116_v21 = vrot.slane %v11112_v7, 2  ;;  %11783 = vst.msk [vmem:[%s13829_s8 + $0x23] ss:$8 sm:$0x3] %vm13818_vm12, %v10985_v59  ;;  %v11191_v18 = vadd.f32 %v11115_v61, %v11066_v6  ;;  %v11075_v16 = vadd.f32 %v11071_v36, %v13810_v26  ;;  %v11157_v45 = vadd.f32 %v11112_v7, %v11071_v36 }
 0x46d   : > { %v11312_v31 = vcombine.high %v11308_v22, %v11309_v13 }
 0x46e   : > { %v11120_v62 = vadd.f32 %v11116_v21, %v13813_v28  ;;  %v11192_v24 = vadd.f32 %v11116_v21, %v11067_v17  ;;  %v11078_v5 = vcombine.high %v11074_v14, %v11075_v16  ;;  %v11160_v4 = vcombine.low %v11156_v15, %v11157_v45 }
 0x46f   : > { %v11246_v54 = vcombine.high %v11156_v15, %v11157_v45  ;;  %v11319_v2 = vrot.slane %v11312_v31, %v13806_v0 }
 0x470   : > { %v11123_v46 = vcombine.high %v11119_v63, %v11120_v62  ;;  %v11195_v27 = vcombine.low %v11191_v18, %v11192_v24  ;;  %v11277_v29 = vcombine.high %v11191_v18, %v11192_v24  ;;  %v11085_v1 = vrot.slane %v11078_v5, %v13806_v0 }
 0x471   : > { %v11167_v34 = vrot.slane %v11160_v4, %v13806_v0  ;;  %v11253_v28 = vrot.slane %v11246_v54, %v13806_v0  ;;  %v11320_v37 = vcombine.high %v11319_v2, %v11319_v2  ;;  %v11327_v38 = vrot.slane %v11319_v2, %v13806_v0 }
 0x472   : > { %v11130_v32 = vrot.slane %v11123_v46, %v13806_v0  ;;  %v11202_v26 = vrot.slane %v11195_v27, %v13806_v0  ;;  %v11284_v35 = vrot.slane %v11277_v29, %v13806_v0  ;;  %v11086_v39 = vcombine.high %v11085_v1, %v11085_v1 }
 0x473   : > { %v11093_v40 = vrot.slane %v11085_v1, %v13806_v0  ;;  %v11168_v41 = vcombine.high %v11167_v34, %v11167_v34  ;;  %v11175_v42 = vrot.slane %v11167_v34, %v13806_v0  ;;  %v11254_v55 = vcombine.high %v11253_v28, %v11253_v28 }
 0x474   : > { %v11131_v30 = vcombine.high %v11130_v32, %v11130_v32  ;;  %v11138_v33 = vrot.slane %v11130_v32, %v13806_v0  ;;  %v11203_v43 = vcombine.high %v11202_v26, %v11202_v26  ;;  %v11210_v20 = vrot.slane %v11202_v26, %v13806_v0 }
 0x475   : > { %v11100_v44 = vrot.slane %v11086_v39, %v13806_v0  ;;  %v11101_v25 = vcombine.high %v11093_v40, %v11093_v40  ;;  %v11182_v49 = vrot.slane %v11168_v41, %v13806_v0  ;;  %11794 = vst.msk [vmem:[%s13829_s8 + $0x11] ss:$8 sm:$0x3] %vm13818_vm12, %v11175_v42  ;;  %v11226_v50 = vcombine.high %v11175_v42, %v11175_v42 }
 0x476   : > { %v11145_v47 = vrot.slane %v11131_v30, %v13806_v0  ;;  %v11146_v48 = vcombine.high %v11138_v33, %v11138_v33  ;;  %v11217_v53 = vrot.slane %v11203_v43, %v13806_v0  ;;  %11796 = vst.msk [vmem:[%s13829_s8 + $0x12] ss:$8 sm:$0x3] %vm13818_vm12, %v11210_v20  ;;  %v11236_v51 = vcombine.high %v11210_v20, %v11210_v20 }
 0x477   : > { %v11102_v52 = vcombine.high %v11100_v44, %v11100_v44  ;;  %11790 = vst.msk [vmem:[%s13829_s8 + $0x7] ss:$8 sm:$0x3] %vm13818_vm12, %v11101_v25  ;;  %v11261_v56 = vrot.slane %v11253_v28, %v13806_v0  ;;  %11795 = vst.msk [vmem:[%s13829_s8 + $0x31] ss:$8 sm:$0x3] %vm13818_vm12, %v11182_v49  ;;  %v11227_v60 = vcombine.high %v11182_v49, %v11182_v49 }
 0x478   : > { %v11147_v3 = vcombine.high %v11145_v47, %v11145_v47  ;;  %11792 = vst.msk [vmem:[%s13829_s8 + $0x10] ss:$8 sm:$0x3] %vm13818_vm12, %v11146_v48  ;;  %11797 = vst.msk [vmem:[%s13829_s8 + $0x32] ss:$8 sm:$0x3] %vm13818_vm12, %v11217_v53  ;;  %v11237_v19 = vcombine.high %v11217_v53, %v11217_v53  ;;  %v11285_v6 = vcombine.high %v11284_v35, %v11284_v35 }
 0x479   : > { %11798 = vst.msk [vmem:[%s13829_s8 + $0x13] ss:$8 sm:$0x3] %vm13818_vm12, %v11226_v50  ;;  %11800 = vst.msk [vmem:[%s13829_s8 + $0x14] ss:$8 sm:$0x3] %vm13818_vm12, %v11236_v51  ;;  %v11292_v8 = vrot.slane %v11284_v35, %v13806_v0  ;;  %v11268_v9 = vrot.slane %v11254_v55, %v13806_v0  ;;  %v11334_v10 = vrot.slane %v11320_v37, %v13806_v0 }
 0x47a   : > { %11791 = vst.msk [vmem:[%s13829_s8 + $0x27] ss:$8 sm:$0x3] %vm13818_vm12, %v11102_v52  ;;  %11793 = vst.msk [vmem:[%s13829_s8 + $0x30] ss:$8 sm:$0x3] %vm13818_vm12, %v11147_v3  ;;  %v11335_v11 = vcombine.high %v11327_v38, %v11327_v38  ;;  %v11299_v57 = vrot.slane %v11285_v6, %v13806_v0 }
 0x47b   : > { %11802 = vst.msk [vmem:[%s13829_s8 + $0x15] ss:$8 sm:$0x3] %vm13818_vm12, %v11261_v56  ;;  %11799 = vst.msk [vmem:[%s13829_s8 + $0x33] ss:$8 sm:$0x3] %vm13818_vm12, %v11227_v60  ;;  %v11336_v12 = vcombine.high %v11334_v10, %v11334_v10 }
 0x47c   : > { %11801 = vst.msk [vmem:[%s13829_s8 + $0x34] ss:$8 sm:$0x3] %vm13818_vm12, %v11237_v19  ;;  %11804 = vst.msk [vmem:[%s13829_s8 + $0x16] ss:$8 sm:$0x3] %vm13818_vm12, %v11292_v8 }
 0x47d   : > { %11803 = vst.msk [vmem:[%s13829_s8 + $0x35] ss:$8 sm:$0x3] %vm13818_vm12, %v11268_v9  ;;  %11806 = vst.msk [vmem:[%s13829_s8 + $0x17] ss:$8 sm:$0x3] %vm13818_vm12, %v11335_v11 }
 0x47e   : > { %11805 = vst.msk [vmem:[%s13829_s8 + $0x36] ss:$8 sm:$0x3] %vm13818_vm12, %v11299_v57  ;;  %11807 = vst.msk [vmem:[%s13829_s8 + $0x37] ss:$8 sm:$0x3] %vm13818_vm12, %v11336_v12 }
 0x47f   : > { %12181 = shalt.err (!%p12178_p0)
}
 0x480   : > { %s12182_s25 = scalar_lea.hbm %s13957_s24, 1024  ;;  %s12186_s29 = scalar_lea.hbm %s14019_s4, 2048 }
 0x481   : > { %p12183_p11 = scmp.ne.s32.totalorder %s13957_s24, %s12182_s25  ;;  %p12187_p1 = scmp.lt.s32.totalorder %s13957_s24, %s14019_s4 }
 0x482   : > { %p12188_p4 = scmp.lt.s32.totalorder %s12186_s29, %s12182_s25 }
 0x483   : > { %p12184_p9 = pnand %p12183_p11, %p14039_p3 }
 0x484   : > { %p12189_p6 = por %p12188_p4, %p12187_p1 }
 0x485   : > { %p12185_p12 = pneg %p12184_p9 }
 0x487   : > { %p12190_p8 = pnand %p12189_p6, %p12185_p12 }
 0x489   : > { %12193 = shalt.err (!%p12190_p8)
}
 0x48a   : > { %s12279_s12 = smov 256  }
 0x48b   : > { %12012 = dma.vmem_to_hbm [thread:$0]  (%p14039_p3), %s13965_s19, 1024, %s13957_s24, %s11346_s5, %s12279_s12, %s12279_s12, %s12257_s30  }
 0x48c PF: > { %s11374_s13 = sand.u32 1, %s12224_s15   ;;  %p14040_p5 = scmp.ne.s32.totalorder %s14025_s22, 0 }
 0x48d   : > { %p14041_p7 = scmp.ge.s32.totalorder %s12236_s18, 2  ;;  %s11375_s6 = scalar_lea.sflag [#allocation6], %s11374_s13 }
 0x48f   : > { %p12023_p10 = pnand %p14041_p7, %p14040_p5 }
 0x491   : > { %p12024_p2 = pneg %p12023_p10 }
 0x493   : > { %12219 = dma.done.wait (%p12024_p2), %s11375_s6, 1024  }
 0x494   : > { %12221 = vsyncadd (%p12024_p2), %s11375_s6, 4294966272  ;;  %p18_p13 = scmp.ge.s32.totalorder %s12359_s27, 4   ;;  %s14042_s15 = smov %s12228_s16 }
 0x495   : > { %s14043_s16 = smov %s12232_s17  ;;  %s14044_s17 = smov %s12376_s9 }
 0x496   : > { %s14045_s18 = smov %s12359_s27  ;;  %20 = sbr.rel (!%p18_p13) target bundleno = 6 (0x6), region = 142 }
 0x49b   :  { %11380 = vsyncpa [#allocation5], 1 }
 0x49c   :  { %11382 = vsyncpa [#allocation5 + $0x1], 1 }
 0x49d   :  { %11383 = vsyncpa [#allocation8], 1 }
 0x49e   :  { %11384 = vsyncpa [#allocation6], 1 }
 0x49f   :  { %11386 = vsyncpa [#allocation6 + $0x1], 1 }

</bundles_post_ra>
